<compile_context>
chip_gen: v6e
topology: v6e:2x2x1
jax: 0.10.0
libtpu: 0.0.40
codegen_flags: <defaults>
</compile_context>

<pallas_src>
import jax
import jax.numpy as jnp
from jax import lax
from jax.experimental import pallas as pl
from jax.experimental.pallas import tpu as pltpu

# ---- small, module-consistent sizes ----
B = 2            # batch
C = 4            # image channels
C_PAD = 128      # channels padded to lane width for the image linear
SP = 16          # image spatial (16 x 16)
T = 8            # text sequence length
E_IN = 300       # GRU input size (nn.GRU(300, ...))
E_PAD = 384      # lane-aligned padded input size
HID = 256        # GRU hidden size (module uses 2048; shrunk to a small runnable size)
LAYERS = 4       # GRU layers
EMB = HID        # image embedding dim produced by the injected ImageNetwork
B_PAD = 8        # batch padded to sublane width
TB = T * B_PAD   # rows of the hoisted (time*batch, feature) slabs


# ---------------- fused forward kernel (grid axis = GRU layer) ----------------
def _fused_kernel(ximg_ref, imgw_ref, imgb_ref,
                  xtxt_ref, wih0_ref, wih_ref, whhrz_ref, whhn_ref,
                  bcomb_ref, bhn_ref,
                  i_out_ref, hn_out_ref,
                  gi_sc, y_sc):
    l = pl.program_id(0)

    # ---- layer 0 only: image encoder + hoisted layer-0 input projection ----
    @pl.when(l == 0)
    def _():
        # image encoder linear (GAP already applied in wrapper); bf16 MXU, f32 accumulate
        i_out_ref[...] = (
            jnp.dot(ximg_ref[...], imgw_ref[...], preferred_element_type=jnp.float32)
            + imgb_ref[...]
        ).astype(i_out_ref.dtype)
        # f.normalize(i, p=2, dim=-1) in the reference is not assigned back -> no-op (reproduced).
        gi_sc[...] = (
            jnp.dot(xtxt_ref[...], wih0_ref[...], preferred_element_type=jnp.float32)
            + bcomb_ref[0]
        )

    # ---- layers 1..3: hoisted input projection from previous layer's VMEM-resident sequence ----
    @pl.when(l > 0)
    def _():
        gi_sc[...] = (
            jnp.dot(y_sc[...], wih_ref[0], preferred_element_type=jnp.float32)
            + bcomb_ref[0]
        )

    # Hoisted per-layer values (outside the unrolled time loop).
    whh_rz = whhrz_ref[0]                                      # (HID, 2H) bf16
    whh_n = whhn_ref[0]                                        # (HID, H)  bf16
    bhn_b = jnp.broadcast_to(bhn_ref[0], (B_PAD, HID))         # broadcast once per layer

    def step(t, h):
        row = pl.multiple_of(t * B_PAD, B_PAD)
        gi_t = gi_sc[pl.ds(row, B_PAD), :]                     # (B_PAD, 3H) f32
        h_b = h.astype(jnp.bfloat16)
        # r/z columns first so the sigmoids can overlap the n-gate matmul drain.
        gh_rz = jnp.dot(h_b, whh_rz, preferred_element_type=jnp.float32)   # (B_PAD, 2H)
        r = jax.nn.sigmoid(gi_t[:, :HID] + gh_rz[:, :HID])
        z = jax.nn.sigmoid(gi_t[:, HID:2 * HID] + gh_rz[:, HID:])
        gh_n = jnp.dot(h_b, whh_n, preferred_element_type=jnp.float32)     # (B_PAD, H)
        n = jnp.tanh(gi_t[:, 2 * HID:] + r * (gh_n + bhn_b))
        h_new = (1.0 - z) * n + z * h                          # PyTorch GRU update (f32 carry)
        y_sc[pl.ds(row, B_PAD), :] = h_new.astype(y_sc.dtype)  # feeds next layer's projection
        return h_new

    h0 = jnp.zeros((B_PAD, HID), jnp.float32)   # matches torch.zeros(4, B, H) initial state
    h_final = lax.fori_loop(0, T, step, h0, unroll=True)
    hn_out_ref[0, :, :] = h_final.astype(hn_out_ref.dtype)
    # TODO(synk): nn.GRU inter-layer dropout(0.1) is training-mode stochastic; eval-mode
    # (no dropout) semantics implemented here.
    # f.normalize(t, p=2, dim=-1) in the reference is not assigned back -> no-op (reproduced).


def _fused_forward_call(ximg, imgw, imgb, xtxt, wih0, wih_rest, whh_rz, whh_n, b_comb, bhh_n):
    return pl.pallas_call(
        _fused_kernel,
        out_shape=(
            jax.ShapeDtypeStruct((B_PAD, EMB), jnp.float32),
            jax.ShapeDtypeStruct((LAYERS, B_PAD, HID), jnp.float32),
        ),
        grid_spec=pltpu.PrefetchScalarGridSpec(
            num_scalar_prefetch=0,
            grid=(LAYERS,),
            in_specs=[
                pl.BlockSpec((B_PAD, C_PAD), lambda l: (0, 0)),                 # ximg (bf16)
                pl.BlockSpec((C_PAD, EMB), lambda l: (0, 0)),                   # image linear W (bf16)
                pl.BlockSpec((1, EMB), lambda l: (0, 0)),                       # image linear b (f32)
                pl.BlockSpec((TB, E_PAD), lambda l: (0, 0)),                    # text sequence (bf16)
                pl.BlockSpec((E_PAD, 3 * HID), lambda l: (0, 0)),               # layer-0 Wih (bf16)
                pl.BlockSpec((1, HID, 3 * HID),
                             lambda l: (jnp.maximum(l - 1, 0), 0, 0)),          # layers 1..3 Wih (bf16)
                pl.BlockSpec((1, HID, 2 * HID), lambda l: (l, 0, 0)),           # Whh [r|z] cols (bf16)
                pl.BlockSpec((1, HID, HID), lambda l: (l, 0, 0)),               # Whh [n] cols (bf16)
                pl.BlockSpec((1, 1, 3 * HID), lambda l: (l, 0, 0)),             # folded bias (f32)
                pl.BlockSpec((1, 1, HID), lambda l: (l, 0, 0)),                 # bhh_n (f32)
            ],
            out_specs=(
                pl.BlockSpec((B_PAD, EMB), lambda l: (0, 0)),                   # image embedding
                pl.BlockSpec((1, B_PAD, HID), lambda l: (l, 0, 0)),             # h_n per layer
            ),
            scratch_shapes=[
                pltpu.VMEM((TB, 3 * HID), jnp.float32),   # hoisted gate projections gi (persists)
                pltpu.VMEM((TB, HID), jnp.bfloat16),      # inter-layer output sequence (persists)
            ],
        ),
        compiler_params=pltpu.CompilerParams(dimension_semantics=("arbitrary",)),
    )(ximg, imgw, imgb, xtxt, wih0, wih_rest, whh_rz, whh_n, b_comb, bhh_n)


# ---------------- full forward (wrapper: padding / dtype casts / GAP) ----------------
@jax.jit
def image_caption_net_forward(fused, image, text):
    Bx = image.shape[0]
    # GAP (part of the injected ImageNetwork) as a cheap XLA reduction; the kernel's image
    # weight stays at its true (C, EMB) size (padded to 128 lanes) instead of a GAP-unrolled slab.
    img_gap = image.mean(axis=(2, 3))                                   # (B, C)
    ximg = jnp.pad(img_gap, ((0, B_PAD - Bx), (0, C_PAD - C))).astype(jnp.bfloat16)
    # text: (T, B, 300) -> (T*B_PAD, E_PAD) bf16; zero padding rows/lanes contribute nothing
    xtxt = jnp.pad(text, ((0, 0), (0, B_PAD - Bx), (0, E_PAD - E_IN)))
    xtxt = xtxt.astype(jnp.bfloat16).reshape(TB, E_PAD)

    i_full, hn_full = _fused_forward_call(
        ximg, fused["img_w"], fused["img_b"], xtxt,
        fused["wih0_t"], fused["wih_rest_t"], fused["whh_rz"], fused["whh_n"],
        fused["b_comb"], fused["bhh_n"],
    )
    return i_full[:Bx], hn_full[:, :Bx]


# ---------------- parameter init (PyTorch-like layout) + folding ----------------
def init_params(key):
    ks = jax.random.split(key, 2 + 4 * LAYERS)
    scale = 1.0 / jnp.sqrt(jnp.float32(HID))
    params = {
        "img_w": jax.random.uniform(ks[0], (C, EMB), jnp.float32, -scale, scale),
        "img_b": jax.random.uniform(ks[1], (EMB,), jnp.float32, -scale, scale),
        "wih": [], "whh": [], "bih": [], "bhh": [],   # PyTorch layout: (3H, Din)/(3H, H)/(3H,)
    }
    idx = 2
    for l in range(LAYERS):
        din = E_IN if l == 0 else HID
        params["wih"].append(
            jax.random.uniform(ks[idx], (3 * HID, din), jnp.float32, -scale, scale)); idx += 1
        params["whh"].append(
            jax.random.uniform(ks[idx], (3 * HID, HID), jnp.float32, -scale, scale)); idx += 1
        params["bih"].append(
            jax.random.uniform(ks[idx], (3 * HID,), jnp.float32, -scale, scale)); idx += 1
        params["bhh"].append(
            jax.random.uniform(ks[idx], (3 * HID,), jnp.float32, -scale, scale)); idx += 1
    return params


def fuse_params(params):
    """Transpose / stack / pad / bias-fold / bf16-cast the raw params (done once)."""
    # Image linear: pad channel rows 4 -> 128, cast bf16.
    img_w = jnp.pad(params["img_w"], ((0, C_PAD - C), (0, 0))).astype(jnp.bfloat16)
    img_b = params["img_b"].reshape(1, EMB)

    # Layer 0 input weight: transpose to (Din, 3H), zero-pad rows 300 -> 384, bf16.
    wih0_t = jnp.pad(params["wih"][0].T, ((0, E_PAD - E_IN), (0, 0))).astype(jnp.bfloat16)
    wih_rest_t = jnp.stack(
        [params["wih"][l].T for l in range(1, LAYERS)], axis=0).astype(jnp.bfloat16)   # (3, H, 3H)

    whh_t = jnp.stack([params["whh"][l].T for l in range(LAYERS)], axis=0)             # (4, H, 3H) f32
    whh_rz = whh_t[:, :, :2 * HID].astype(jnp.bfloat16)                                # (4, H, 2H)
    whh_n = whh_t[:, :, 2 * HID:].astype(jnp.bfloat16)                                 # (4, H, H)

    # Bias folding: b_comb = bih + [bhh_r | bhh_z | 0]; bhh_n stays inside the r*(...) term.
    b_comb, bhh_n = [], []
    for l in range(LAYERS):
        bih, bhh = params["bih"][l], params["bhh"][l]
        fold = jnp.concatenate([bhh[:HID], bhh[HID:2 * HID], jnp.zeros((HID,), jnp.float32)])
        b_comb.append((bih + fold).reshape(1, 3 * HID))
        bhh_n.append(bhh[2 * HID:].reshape(1, HID))
    return {
        "img_w": img_w, "img_b": img_b,
        "wih0_t": wih0_t, "wih_rest_t": wih_rest_t,
        "whh_rz": whh_rz, "whh_n": whh_n,
        "b_comb": jnp.stack(b_comb, axis=0),    # (LAYERS, 1, 3H) f32
        "bhh_n": jnp.stack(bhh_n, axis=0),      # (LAYERS, 1, H)  f32
    }


if __name__ == "__main__":
    key = jax.random.PRNGKey(0)
    kp, ki, kt = jax.random.split(key, 3)
    params = init_params(kp)
    fused = fuse_params(params)

    image = jax.random.normal(ki, (B, C, SP, SP), jnp.float32)   # NCHW, like PyTorch
    text = jax.random.normal(kt, (T, B, E_IN), jnp.float32)      # (seq, batch, 300)

    i_emb, t_emb = image_caption_net_forward(fused, image, text)
    jax.block_until_ready((i_emb, t_emb))

    assert i_emb.shape == (B, EMB)
    assert t_emb.shape == (LAYERS, B, HID)
    assert bool(jnp.all(jnp.isfinite(i_emb))) and bool(jnp.all(jnp.isfinite(t_emb)))
    print("KERNEL_OK")
</pallas_src>

<mosaic_0001>
module attributes {stable_mosaic.version = 11 : i64} {
  func.func @_fused_kernel(%arg0: i32, %arg1: memref<8x128xbf16, #tpu.memory_space<vmem>>, %arg2: memref<128x256xbf16, #tpu.memory_space<vmem>>, %arg3: memref<1x256xf32, #tpu.memory_space<vmem>>, %arg4: memref<64x384xbf16, #tpu.memory_space<vmem>>, %arg5: memref<384x768xbf16, #tpu.memory_space<vmem>>, %arg6: memref<1x256x768xbf16, #tpu.memory_space<vmem>>, %arg7: memref<1x256x512xbf16, #tpu.memory_space<vmem>>, %arg8: memref<1x256x256xbf16, #tpu.memory_space<vmem>>, %arg9: memref<1x1x768xf32, #tpu.memory_space<vmem>>, %arg10: memref<1x1x256xf32, #tpu.memory_space<vmem>>, %arg11: memref<8x256xf32, #tpu.memory_space<vmem>>, %arg12: memref<1x8x256xf32, #tpu.memory_space<vmem>>, %arg13: memref<64x768xf32, #tpu.memory_space<vmem>>, %arg14: memref<64x256xbf16, #tpu.memory_space<vmem>>) attributes {dimension_semantics = [#tpu.dimension_semantics<arbitrary>], iteration_bounds = array<i64: 4>, scalar_prefetch = 0 : i64, scratch_operands = 2 : i64, tpu.core_type = #tpu.core_type<tc>, window_params = [{pipeline_mode = #tpu.pipeline_mode<synchronous>, transform_indices = @transform_0, window_bounds = array<i64: 8, 128>}, {pipeline_mode = #tpu.pipeline_mode<synchronous>, transform_indices = @transform_1, window_bounds = array<i64: 128, 256>}, {pipeline_mode = #tpu.pipeline_mode<synchronous>, transform_indices = @transform_2, window_bounds = array<i64: 1, 256>}, {pipeline_mode = #tpu.pipeline_mode<synchronous>, transform_indices = @transform_3, window_bounds = array<i64: 64, 384>}, {pipeline_mode = #tpu.pipeline_mode<synchronous>, transform_indices = @transform_4, window_bounds = array<i64: 384, 768>}, {transform_indices = @transform_5, window_bounds = array<i64: 1, 256, 768>}, {transform_indices = @transform_6, window_bounds = array<i64: 1, 256, 512>}, {transform_indices = @transform_7, window_bounds = array<i64: 1, 256, 256>}, {transform_indices = @transform_8, window_bounds = array<i64: 1, 1, 768>}, {transform_indices = @transform_9, window_bounds = array<i64: 1, 1, 256>}, {pipeline_mode = #tpu.pipeline_mode<synchronous>, transform_indices = @transform_10, window_bounds = array<i64: 8, 256>}, {transform_indices = @transform_11, window_bounds = array<i64: 1, 8, 256>}]} {
    %c0_i32 = arith.constant 0 : i32
    %0 = arith.cmpi eq, %arg0, %c0_i32 : i32
    %1 = arith.extui %0 : i1 to i32
    %c0_i32_0 = arith.constant 0 : i32
    %2 = arith.cmpi ne, %1, %c0_i32_0 : i32
    scf.if %2 {
      %c0_79 = arith.constant 0 : index
      %c0_80 = arith.constant 0 : index
      %306 = vector.load %arg1[%c0_79, %c0_80] : memref<8x128xbf16, #tpu.memory_space<vmem>>, vector<8x128xbf16>
      %c0_81 = arith.constant 0 : index
      %c0_82 = arith.constant 0 : index
      %307 = vector.load %arg2[%c0_81, %c0_82] : memref<128x256xbf16, #tpu.memory_space<vmem>>, vector<128x256xbf16>
      %cst_83 = arith.constant dense<0.000000e+00> : vector<8x256xf32>
      %308 = tpu.matmul %306, %307, %cst_83 {dimension_numbers = #tpu.dot_dimension_numbers<[1], [0], [0], [1], [0, 0, 1, 1], [], []>} : vector<8x128xbf16>, vector<128x256xbf16>, vector<8x256xf32> -> vector<8x256xf32>
      %c0_84 = arith.constant 0 : index
      %c0_85 = arith.constant 0 : index
      %309 = vector.load %arg3[%c0_84, %c0_85] : memref<1x256xf32, #tpu.memory_space<vmem>>, vector<1x256xf32>
      %310 = vector.broadcast %309 : vector<1x256xf32> to vector<8x256xf32>
      %311 = arith.addf %308, %310 : vector<8x256xf32>
      %c0_86 = arith.constant 0 : index
      %c0_87 = arith.constant 0 : index
      %312 = vector.load %arg11[%c0_86, %c0_87] : memref<8x256xf32, #tpu.memory_space<vmem>>, vector<8x256xf32>
      tpu.vector_store %arg11[%c0_86, %c0_87], %311 {strides = array<i32>} : memref<8x256xf32, #tpu.memory_space<vmem>>, vector<8x256xf32>,
      %c0_88 = arith.constant 0 : index
      %c0_89 = arith.constant 0 : index
      %313 = vector.load %arg4[%c0_88, %c0_89] : memref<64x384xbf16, #tpu.memory_space<vmem>>, vector<64x384xbf16>
      %c0_90 = arith.constant 0 : index
      %c0_91 = arith.constant 0 : index
      %314 = vector.load %arg5[%c0_90, %c0_91] : memref<384x768xbf16, #tpu.memory_space<vmem>>, vector<384x768xbf16>
      %cst_92 = arith.constant dense<0.000000e+00> : vector<64x768xf32>
      %315 = tpu.matmul %313, %314, %cst_92 {dimension_numbers = #tpu.dot_dimension_numbers<[1], [0], [0], [1], [0, 0, 1, 1], [], []>} : vector<64x384xbf16>, vector<384x768xbf16>, vector<64x768xf32> -> vector<64x768xf32>
      %c0_93 = arith.constant 0 : index
      %c0_94 = arith.constant 0 : index
      %c0_95 = arith.constant 0 : index
      %316 = vector.load %arg9[%c0_93, %c0_94, %c0_95] : memref<1x1x768xf32, #tpu.memory_space<vmem>>, vector<1x1x768xf32>
      %317 = vector.shape_cast %316 : vector<1x1x768xf32> to vector<1x768xf32>
      %318 = vector.broadcast %317 : vector<1x768xf32> to vector<64x768xf32>
      %319 = arith.addf %315, %318 : vector<64x768xf32>
      %c0_96 = arith.constant 0 : index
      %c0_97 = arith.constant 0 : index
      %320 = vector.load %arg13[%c0_96, %c0_97] : memref<64x768xf32, #tpu.memory_space<vmem>>, vector<64x768xf32>
      tpu.vector_store %arg13[%c0_96, %c0_97], %319 {strides = array<i32>} : memref<64x768xf32, #tpu.memory_space<vmem>>, vector<64x768xf32>,
    } else {
    }
    %c0_i32_1 = arith.constant 0 : i32
    %3 = arith.cmpi sgt, %arg0, %c0_i32_1 : i32
    %4 = arith.extui %3 : i1 to i32
    %c0_i32_2 = arith.constant 0 : i32
    %5 = arith.cmpi ne, %4, %c0_i32_2 : i32
    scf.if %5 {
      %c0_79 = arith.constant 0 : index
      %c0_80 = arith.constant 0 : index
      %306 = vector.load %arg14[%c0_79, %c0_80] : memref<64x256xbf16, #tpu.memory_space<vmem>>, vector<64x256xbf16>
      %c0_81 = arith.constant 0 : index
      %c0_82 = arith.constant 0 : index
      %c0_83 = arith.constant 0 : index
      %307 = vector.load %arg6[%c0_81, %c0_82, %c0_83] : memref<1x256x768xbf16, #tpu.memory_space<vmem>>, vector<1x256x768xbf16>
      %308 = vector.shape_cast %307 : vector<1x256x768xbf16> to vector<256x768xbf16>
      %cst_84 = arith.constant dense<0.000000e+00> : vector<64x768xf32>
      %309 = tpu.matmul %306, %308, %cst_84 {dimension_numbers = #tpu.dot_dimension_numbers<[1], [0], [0], [1], [0, 0, 1, 1], [], []>} : vector<64x256xbf16>, vector<256x768xbf16>, vector<64x768xf32> -> vector<64x768xf32>
      %c0_85 = arith.constant 0 : index
      %c0_86 = arith.constant 0 : index
      %c0_87 = arith.constant 0 : index
      %310 = vector.load %arg9[%c0_85, %c0_86, %c0_87] : memref<1x1x768xf32, #tpu.memory_space<vmem>>, vector<1x1x768xf32>
      %311 = vector.shape_cast %310 : vector<1x1x768xf32> to vector<1x768xf32>
      %312 = vector.broadcast %311 : vector<1x768xf32> to vector<64x768xf32>
      %313 = arith.addf %309, %312 : vector<64x768xf32>
      %c0_88 = arith.constant 0 : index
      %c0_89 = arith.constant 0 : index
      %314 = vector.load %arg13[%c0_88, %c0_89] : memref<64x768xf32, #tpu.memory_space<vmem>>, vector<64x768xf32>
      tpu.vector_store %arg13[%c0_88, %c0_89], %313 {strides = array<i32>} : memref<64x768xf32, #tpu.memory_space<vmem>>, vector<64x768xf32>,
    } else {
    }
    %c0 = arith.constant 0 : index
    %c0_3 = arith.constant 0 : index
    %c0_4 = arith.constant 0 : index
    %6 = vector.load %arg7[%c0, %c0_3, %c0_4] : memref<1x256x512xbf16, #tpu.memory_space<vmem>>, vector<1x256x512xbf16>
    %7 = vector.shape_cast %6 : vector<1x256x512xbf16> to vector<256x512xbf16>
    %c0_5 = arith.constant 0 : index
    %c0_6 = arith.constant 0 : index
    %c0_7 = arith.constant 0 : index
    %8 = vector.load %arg8[%c0_5, %c0_6, %c0_7] : memref<1x256x256xbf16, #tpu.memory_space<vmem>>, vector<1x256x256xbf16>
    %9 = vector.shape_cast %8 : vector<1x256x256xbf16> to vector<256x256xbf16>
    %c0_8 = arith.constant 0 : index
    %c0_9 = arith.constant 0 : index
    %c0_10 = arith.constant 0 : index
    %10 = vector.load %arg10[%c0_8, %c0_9, %c0_10] : memref<1x1x256xf32, #tpu.memory_space<vmem>>, vector<1x1x256xf32>
    %11 = vector.shape_cast %10 : vector<1x1x256xf32> to vector<1x256xf32>
    %12 = vector.shape_cast %11 : vector<1x256xf32> to vector<1x256xf32>
    %13 = vector.broadcast %12 : vector<1x256xf32> to vector<8x256xf32>
    %cst = arith.constant 0.000000e+00 : f32
    %14 = vector.broadcast %cst : f32 to vector<8x256xf32>
    %c0_i32_11 = arith.constant 0 : i32
    %c8_i32 = arith.constant 8 : i32
    %15 = arith.muli %c0_i32_11, %c8_i32 : i32
    %16 = tpu.assume_multiple %15, 8 : i32
    %17 = arith.index_cast %16 : i32 to index
    %c0_12 = arith.constant 0 : index
    %18 = vector.load %arg13[%17, %c0_12] : memref<64x768xf32, #tpu.memory_space<vmem>>, vector<8x768xf32>
    %19 = arith.truncf %14 : vector<8x256xf32> to vector<8x256xbf16>
    %cst_13 = arith.constant dense<0.000000e+00> : vector<8x512xf32>
    %20 = tpu.matmul %19, %7, %cst_13 {dimension_numbers = #tpu.dot_dimension_numbers<[1], [0], [0], [1], [0, 0, 1, 1], [], []>} : vector<8x256xbf16>, vector<256x512xbf16>, vector<8x512xf32> -> vector<8x512xf32>
    %21 = vector.extract_strided_slice %18 {offsets = [0, 0], sizes = [8, 256], strides = [1, 1]} : vector<8x768xf32> to vector<8x256xf32>
    %22 = vector.extract_strided_slice %20 {offsets = [0, 0], sizes = [8, 256], strides = [1, 1]} : vector<8x512xf32> to vector<8x256xf32>
    %23 = arith.addf %21, %22 : vector<8x256xf32>
    %24 = arith.negf %23 : vector<8x256xf32>
    %25 = math.exp %24 : vector<8x256xf32>
    %cst_14 = arith.constant 1.000000e+00 : f32
    %26 = vector.broadcast %cst_14 : f32 to vector<8x256xf32>
    %27 = arith.addf %26, %25 : vector<8x256xf32>
    %28 = arith.divf %26, %27 : vector<8x256xf32>
    %29 = vector.extract_strided_slice %18 {offsets = [0, 256], sizes = [8, 256], strides = [1, 1]} : vector<8x768xf32> to vector<8x256xf32>
    %30 = vector.extract_strided_slice %20 {offsets = [0, 256], sizes = [8, 256], strides = [1, 1]} : vector<8x512xf32> to vector<8x256xf32>
    %31 = arith.addf %29, %30 : vector<8x256xf32>
    %32 = arith.negf %31 : vector<8x256xf32>
    %33 = math.exp %32 : vector<8x256xf32>
    %cst_15 = arith.constant 1.000000e+00 : f32
    %34 = vector.broadcast %cst_15 : f32 to vector<8x256xf32>
    %35 = arith.addf %34, %33 : vector<8x256xf32>
    %36 = arith.divf %34, %35 : vector<8x256xf32>
    %cst_16 = arith.constant dense<0.000000e+00> : vector<8x256xf32>
    %37 = tpu.matmul %19, %9, %cst_16 {dimension_numbers = #tpu.dot_dimension_numbers<[1], [0], [0], [1], [0, 0, 1, 1], [], []>} : vector<8x256xbf16>, vector<256x256xbf16>, vector<8x256xf32> -> vector<8x256xf32>
    %38 = vector.extract_strided_slice %18 {offsets = [0, 512], sizes = [8, 256], strides = [1, 1]} : vector<8x768xf32> to vector<8x256xf32>
    %39 = arith.addf %37, %13 : vector<8x256xf32>
    %40 = arith.mulf %28, %39 : vector<8x256xf32>
    %41 = arith.addf %38, %40 : vector<8x256xf32>
    %42 = math.tanh %41 : vector<8x256xf32>
    %cst_17 = arith.constant 1.000000e+00 : f32
    %43 = vector.broadcast %cst_17 : f32 to vector<8x256xf32>
    %44 = arith.subf %43, %36 : vector<8x256xf32>
    %45 = arith.mulf %44, %42 : vector<8x256xf32>
    %46 = arith.mulf %36, %14 : vector<8x256xf32>
    %47 = arith.addf %45, %46 : vector<8x256xf32>
    %48 = arith.truncf %47 : vector<8x256xf32> to vector<8x256xbf16>
    %49 = arith.index_cast %16 : i32 to index
    %c0_18 = arith.constant 0 : index
    %50 = vector.load %arg14[%49, %c0_18] : memref<64x256xbf16, #tpu.memory_space<vmem>>, vector<8x256xbf16>
    tpu.vector_store %arg14[%49, %c0_18], %48 {strides = array<i32>} : memref<64x256xbf16, #tpu.memory_space<vmem>>, vector<8x256xbf16>,
    %c1_i32 = arith.constant 1 : i32
    %c8_i32_19 = arith.constant 8 : i32
    %51 = arith.muli %c1_i32, %c8_i32_19 : i32
    %52 = tpu.assume_multiple %51, 8 : i32
    %53 = arith.index_cast %52 : i32 to index
    %c0_20 = arith.constant 0 : index
    %54 = vector.load %arg13[%53, %c0_20] : memref<64x768xf32, #tpu.memory_space<vmem>>, vector<8x768xf32>
    %55 = arith.truncf %47 : vector<8x256xf32> to vector<8x256xbf16>
    %cst_21 = arith.constant dense<0.000000e+00> : vector<8x512xf32>
    %56 = tpu.matmul %55, %7, %cst_21 {dimension_numbers = #tpu.dot_dimension_numbers<[1], [0], [0], [1], [0, 0, 1, 1], [], []>} : vector<8x256xbf16>, vector<256x512xbf16>, vector<8x512xf32> -> vector<8x512xf32>
    %57 = vector.extract_strided_slice %54 {offsets = [0, 0], sizes = [8, 256], strides = [1, 1]} : vector<8x768xf32> to vector<8x256xf32>
    %58 = vector.extract_strided_slice %56 {offsets = [0, 0], sizes = [8, 256], strides = [1, 1]} : vector<8x512xf32> to vector<8x256xf32>
    %59 = arith.addf %57, %58 : vector<8x256xf32>
    %60 = arith.negf %59 : vector<8x256xf32>
    %61 = math.exp %60 : vector<8x256xf32>
    %cst_22 = arith.constant 1.000000e+00 : f32
    %62 = vector.broadcast %cst_22 : f32 to vector<8x256xf32>
    %63 = arith.addf %62, %61 : vector<8x256xf32>
    %64 = arith.divf %62, %63 : vector<8x256xf32>
    %65 = vector.extract_strided_slice %54 {offsets = [0, 256], sizes = [8, 256], strides = [1, 1]} : vector<8x768xf32> to vector<8x256xf32>
    %66 = vector.extract_strided_slice %56 {offsets = [0, 256], sizes = [8, 256], strides = [1, 1]} : vector<8x512xf32> to vector<8x256xf32>
    %67 = arith.addf %65, %66 : vector<8x256xf32>
    %68 = arith.negf %67 : vector<8x256xf32>
    %69 = math.exp %68 : vector<8x256xf32>
    %cst_23 = arith.constant 1.000000e+00 : f32
    %70 = vector.broadcast %cst_23 : f32 to vector<8x256xf32>
    %71 = arith.addf %70, %69 : vector<8x256xf32>
    %72 = arith.divf %70, %71 : vector<8x256xf32>
    %cst_24 = arith.constant dense<0.000000e+00> : vector<8x256xf32>
    %73 = tpu.matmul %55, %9, %cst_24 {dimension_numbers = #tpu.dot_dimension_numbers<[1], [0], [0], [1], [0, 0, 1, 1], [], []>} : vector<8x256xbf16>, vector<256x256xbf16>, vector<8x256xf32> -> vector<8x256xf32>
    %74 = vector.extract_strided_slice %54 {offsets = [0, 512], sizes = [8, 256], strides = [1, 1]} : vector<8x768xf32> to vector<8x256xf32>
    %75 = arith.addf %73, %13 : vector<8x256xf32>
    %76 = arith.mulf %64, %75 : vector<8x256xf32>
    %77 = arith.addf %74, %76 : vector<8x256xf32>
    %78 = math.tanh %77 : vector<8x256xf32>
    %cst_25 = arith.constant 1.000000e+00 : f32
    %79 = vector.broadcast %cst_25 : f32 to vector<8x256xf32>
    %80 = arith.subf %79, %72 : vector<8x256xf32>
    %81 = arith.mulf %80, %78 : vector<8x256xf32>
    %82 = arith.mulf %72, %47 : vector<8x256xf32>
    %83 = arith.addf %81, %82 : vector<8x256xf32>
    %84 = arith.truncf %83 : vector<8x256xf32> to vector<8x256xbf16>
    %85 = arith.index_cast %52 : i32 to index
    %c0_26 = arith.constant 0 : index
    %86 = vector.load %arg14[%85, %c0_26] : memref<64x256xbf16, #tpu.memory_space<vmem>>, vector<8x256xbf16>
    tpu.vector_store %arg14[%85, %c0_26], %84 {strides = array<i32>} : memref<64x256xbf16, #tpu.memory_space<vmem>>, vector<8x256xbf16>,
    %c2_i32 = arith.constant 2 : i32
    %c8_i32_27 = arith.constant 8 : i32
    %87 = arith.muli %c2_i32, %c8_i32_27 : i32
    %88 = tpu.assume_multiple %87, 8 : i32
    %89 = arith.index_cast %88 : i32 to index
    %c0_28 = arith.constant 0 : index
    %90 = vector.load %arg13[%89, %c0_28] : memref<64x768xf32, #tpu.memory_space<vmem>>, vector<8x768xf32>
    %91 = arith.truncf %83 : vector<8x256xf32> to vector<8x256xbf16>
    %cst_29 = arith.constant dense<0.000000e+00> : vector<8x512xf32>
    %92 = tpu.matmul %91, %7, %cst_29 {dimension_numbers = #tpu.dot_dimension_numbers<[1], [0], [0], [1], [0, 0, 1, 1], [], []>} : vector<8x256xbf16>, vector<256x512xbf16>, vector<8x512xf32> -> vector<8x512xf32>
    %93 = vector.extract_strided_slice %90 {offsets = [0, 0], sizes = [8, 256], strides = [1, 1]} : vector<8x768xf32> to vector<8x256xf32>
    %94 = vector.extract_strided_slice %92 {offsets = [0, 0], sizes = [8, 256], strides = [1, 1]} : vector<8x512xf32> to vector<8x256xf32>
    %95 = arith.addf %93, %94 : vector<8x256xf32>
    %96 = arith.negf %95 : vector<8x256xf32>
    %97 = math.exp %96 : vector<8x256xf32>
    %cst_30 = arith.constant 1.000000e+00 : f32
    %98 = vector.broadcast %cst_30 : f32 to vector<8x256xf32>
    %99 = arith.addf %98, %97 : vector<8x256xf32>
    %100 = arith.divf %98, %99 : vector<8x256xf32>
    %101 = vector.extract_strided_slice %90 {offsets = [0, 256], sizes = [8, 256], strides = [1, 1]} : vector<8x768xf32> to vector<8x256xf32>
    %102 = vector.extract_strided_slice %92 {offsets = [0, 256], sizes = [8, 256], strides = [1, 1]} : vector<8x512xf32> to vector<8x256xf32>
    %103 = arith.addf %101, %102 : vector<8x256xf32>
    %104 = arith.negf %103 : vector<8x256xf32>
    %105 = math.exp %104 : vector<8x256xf32>
    %cst_31 = arith.constant 1.000000e+00 : f32
    %106 = vector.broadcast %cst_31 : f32 to vector<8x256xf32>
    %107 = arith.addf %106, %105 : vector<8x256xf32>
    %108 = arith.divf %106, %107 : vector<8x256xf32>
    %cst_32 = arith.constant dense<0.000000e+00> : vector<8x256xf32>
    %109 = tpu.matmul %91, %9, %cst_32 {dimension_numbers = #tpu.dot_dimension_numbers<[1], [0], [0], [1], [0, 0, 1, 1], [], []>} : vector<8x256xbf16>, vector<256x256xbf16>, vector<8x256xf32> -> vector<8x256xf32>
    %110 = vector.extract_strided_slice %90 {offsets = [0, 512], sizes = [8, 256], strides = [1, 1]} : vector<8x768xf32> to vector<8x256xf32>
    %111 = arith.addf %109, %13 : vector<8x256xf32>
    %112 = arith.mulf %100, %111 : vector<8x256xf32>
    %113 = arith.addf %110, %112 : vector<8x256xf32>
    %114 = math.tanh %113 : vector<8x256xf32>
    %cst_33 = arith.constant 1.000000e+00 : f32
    %115 = vector.broadcast %cst_33 : f32 to vector<8x256xf32>
    %116 = arith.subf %115, %108 : vector<8x256xf32>
    %117 = arith.mulf %116, %114 : vector<8x256xf32>
    %118 = arith.mulf %108, %83 : vector<8x256xf32>
    %119 = arith.addf %117, %118 : vector<8x256xf32>
    %120 = arith.truncf %119 : vector<8x256xf32> to vector<8x256xbf16>
    %121 = arith.index_cast %88 : i32 to index
    %c0_34 = arith.constant 0 : index
    %122 = vector.load %arg14[%121, %c0_34] : memref<64x256xbf16, #tpu.memory_space<vmem>>, vector<8x256xbf16>
    tpu.vector_store %arg14[%121, %c0_34], %120 {strides = array<i32>} : memref<64x256xbf16, #tpu.memory_space<vmem>>, vector<8x256xbf16>,
    %c3_i32 = arith.constant 3 : i32
    %c8_i32_35 = arith.constant 8 : i32
    %123 = arith.muli %c3_i32, %c8_i32_35 : i32
    %124 = tpu.assume_multiple %123, 8 : i32
    %125 = arith.index_cast %124 : i32 to index
    %c0_36 = arith.constant 0 : index
    %126 = vector.load %arg13[%125, %c0_36] : memref<64x768xf32, #tpu.memory_space<vmem>>, vector<8x768xf32>
    %127 = arith.truncf %119 : vector<8x256xf32> to vector<8x256xbf16>
    %cst_37 = arith.constant dense<0.000000e+00> : vector<8x512xf32>
    %128 = tpu.matmul %127, %7, %cst_37 {dimension_numbers = #tpu.dot_dimension_numbers<[1], [0], [0], [1], [0, 0, 1, 1], [], []>} : vector<8x256xbf16>, vector<256x512xbf16>, vector<8x512xf32> -> vector<8x512xf32>
    %129 = vector.extract_strided_slice %126 {offsets = [0, 0], sizes = [8, 256], strides = [1, 1]} : vector<8x768xf32> to vector<8x256xf32>
    %130 = vector.extract_strided_slice %128 {offsets = [0, 0], sizes = [8, 256], strides = [1, 1]} : vector<8x512xf32> to vector<8x256xf32>
    %131 = arith.addf %129, %130 : vector<8x256xf32>
    %132 = arith.negf %131 : vector<8x256xf32>
    %133 = math.exp %132 : vector<8x256xf32>
    %cst_38 = arith.constant 1.000000e+00 : f32
    %134 = vector.broadcast %cst_38 : f32 to vector<8x256xf32>
    %135 = arith.addf %134, %133 : vector<8x256xf32>
    %136 = arith.divf %134, %135 : vector<8x256xf32>
    %137 = vector.extract_strided_slice %126 {offsets = [0, 256], sizes = [8, 256], strides = [1, 1]} : vector<8x768xf32> to vector<8x256xf32>
    %138 = vector.extract_strided_slice %128 {offsets = [0, 256], sizes = [8, 256], strides = [1, 1]} : vector<8x512xf32> to vector<8x256xf32>
    %139 = arith.addf %137, %138 : vector<8x256xf32>
    %140 = arith.negf %139 : vector<8x256xf32>
    %141 = math.exp %140 : vector<8x256xf32>
    %cst_39 = arith.constant 1.000000e+00 : f32
    %142 = vector.broadcast %cst_39 : f32 to vector<8x256xf32>
    %143 = arith.addf %142, %141 : vector<8x256xf32>
    %144 = arith.divf %142, %143 : vector<8x256xf32>
    %cst_40 = arith.constant dense<0.000000e+00> : vector<8x256xf32>
    %145 = tpu.matmul %127, %9, %cst_40 {dimension_numbers = #tpu.dot_dimension_numbers<[1], [0], [0], [1], [0, 0, 1, 1], [], []>} : vector<8x256xbf16>, vector<256x256xbf16>, vector<8x256xf32> -> vector<8x256xf32>
    %146 = vector.extract_strided_slice %126 {offsets = [0, 512], sizes = [8, 256], strides = [1, 1]} : vector<8x768xf32> to vector<8x256xf32>
    %147 = arith.addf %145, %13 : vector<8x256xf32>
    %148 = arith.mulf %136, %147 : vector<8x256xf32>
    %149 = arith.addf %146, %148 : vector<8x256xf32>
    %150 = math.tanh %149 : vector<8x256xf32>
    %cst_41 = arith.constant 1.000000e+00 : f32
    %151 = vector.broadcast %cst_41 : f32 to vector<8x256xf32>
    %152 = arith.subf %151, %144 : vector<8x256xf32>
    %153 = arith.mulf %152, %150 : vector<8x256xf32>
    %154 = arith.mulf %144, %119 : vector<8x256xf32>
    %155 = arith.addf %153, %154 : vector<8x256xf32>
    %156 = arith.truncf %155 : vector<8x256xf32> to vector<8x256xbf16>
    %157 = arith.index_cast %124 : i32 to index
    %c0_42 = arith.constant 0 : index
    %158 = vector.load %arg14[%157, %c0_42] : memref<64x256xbf16, #tpu.memory_space<vmem>>, vector<8x256xbf16>
    tpu.vector_store %arg14[%157, %c0_42], %156 {strides = array<i32>} : memref<64x256xbf16, #tpu.memory_space<vmem>>, vector<8x256xbf16>,
    %c4_i32 = arith.constant 4 : i32
    %c8_i32_43 = arith.constant 8 : i32
    %159 = arith.muli %c4_i32, %c8_i32_43 : i32
    %160 = tpu.assume_multiple %159, 8 : i32
    %161 = arith.index_cast %160 : i32 to index
    %c0_44 = arith.constant 0 : index
    %162 = vector.load %arg13[%161, %c0_44] : memref<64x768xf32, #tpu.memory_space<vmem>>, vector<8x768xf32>
    %163 = arith.truncf %155 : vector<8x256xf32> to vector<8x256xbf16>
    %cst_45 = arith.constant dense<0.000000e+00> : vector<8x512xf32>
    %164 = tpu.matmul %163, %7, %cst_45 {dimension_numbers = #tpu.dot_dimension_numbers<[1], [0], [0], [1], [0, 0, 1, 1], [], []>} : vector<8x256xbf16>, vector<256x512xbf16>, vector<8x512xf32> -> vector<8x512xf32>
    %165 = vector.extract_strided_slice %162 {offsets = [0, 0], sizes = [8, 256], strides = [1, 1]} : vector<8x768xf32> to vector<8x256xf32>
    %166 = vector.extract_strided_slice %164 {offsets = [0, 0], sizes = [8, 256], strides = [1, 1]} : vector<8x512xf32> to vector<8x256xf32>
    %167 = arith.addf %165, %166 : vector<8x256xf32>
    %168 = arith.negf %167 : vector<8x256xf32>
    %169 = math.exp %168 : vector<8x256xf32>
    %cst_46 = arith.constant 1.000000e+00 : f32
    %170 = vector.broadcast %cst_46 : f32 to vector<8x256xf32>
    %171 = arith.addf %170, %169 : vector<8x256xf32>
    %172 = arith.divf %170, %171 : vector<8x256xf32>
    %173 = vector.extract_strided_slice %162 {offsets = [0, 256], sizes = [8, 256], strides = [1, 1]} : vector<8x768xf32> to vector<8x256xf32>
    %174 = vector.extract_strided_slice %164 {offsets = [0, 256], sizes = [8, 256], strides = [1, 1]} : vector<8x512xf32> to vector<8x256xf32>
    %175 = arith.addf %173, %174 : vector<8x256xf32>
    %176 = arith.negf %175 : vector<8x256xf32>
    %177 = math.exp %176 : vector<8x256xf32>
    %cst_47 = arith.constant 1.000000e+00 : f32
    %178 = vector.broadcast %cst_47 : f32 to vector<8x256xf32>
    %179 = arith.addf %178, %177 : vector<8x256xf32>
    %180 = arith.divf %178, %179 : vector<8x256xf32>
    %cst_48 = arith.constant dense<0.000000e+00> : vector<8x256xf32>
    %181 = tpu.matmul %163, %9, %cst_48 {dimension_numbers = #tpu.dot_dimension_numbers<[1], [0], [0], [1], [0, 0, 1, 1], [], []>} : vector<8x256xbf16>, vector<256x256xbf16>, vector<8x256xf32> -> vector<8x256xf32>
    %182 = vector.extract_strided_slice %162 {offsets = [0, 512], sizes = [8, 256], strides = [1, 1]} : vector<8x768xf32> to vector<8x256xf32>
    %183 = arith.addf %181, %13 : vector<8x256xf32>
    %184 = arith.mulf %172, %183 : vector<8x256xf32>
    %185 = arith.addf %182, %184 : vector<8x256xf32>
    %186 = math.tanh %185 : vector<8x256xf32>
    %cst_49 = arith.constant 1.000000e+00 : f32
    %187 = vector.broadcast %cst_49 : f32 to vector<8x256xf32>
    %188 = arith.subf %187, %180 : vector<8x256xf32>
    %189 = arith.mulf %188, %186 : vector<8x256xf32>
    %190 = arith.mulf %180, %155 : vector<8x256xf32>
    %191 = arith.addf %189, %190 : vector<8x256xf32>
    %192 = arith.truncf %191 : vector<8x256xf32> to vector<8x256xbf16>
    %193 = arith.index_cast %160 : i32 to index
    %c0_50 = arith.constant 0 : index
    %194 = vector.load %arg14[%193, %c0_50] : memref<64x256xbf16, #tpu.memory_space<vmem>>, vector<8x256xbf16>
    tpu.vector_store %arg14[%193, %c0_50], %192 {strides = array<i32>} : memref<64x256xbf16, #tpu.memory_space<vmem>>, vector<8x256xbf16>,
    %c5_i32 = arith.constant 5 : i32
    %c8_i32_51 = arith.constant 8 : i32
    %195 = arith.muli %c5_i32, %c8_i32_51 : i32
    %196 = tpu.assume_multiple %195, 8 : i32
    %197 = arith.index_cast %196 : i32 to index
    %c0_52 = arith.constant 0 : index
    %198 = vector.load %arg13[%197, %c0_52] : memref<64x768xf32, #tpu.memory_space<vmem>>, vector<8x768xf32>
    %199 = arith.truncf %191 : vector<8x256xf32> to vector<8x256xbf16>
    %cst_53 = arith.constant dense<0.000000e+00> : vector<8x512xf32>
    %200 = tpu.matmul %199, %7, %cst_53 {dimension_numbers = #tpu.dot_dimension_numbers<[1], [0], [0], [1], [0, 0, 1, 1], [], []>} : vector<8x256xbf16>, vector<256x512xbf16>, vector<8x512xf32> -> vector<8x512xf32>
    %201 = vector.extract_strided_slice %198 {offsets = [0, 0], sizes = [8, 256], strides = [1, 1]} : vector<8x768xf32> to vector<8x256xf32>
    %202 = vector.extract_strided_slice %200 {offsets = [0, 0], sizes = [8, 256], strides = [1, 1]} : vector<8x512xf32> to vector<8x256xf32>
    %203 = arith.addf %201, %202 : vector<8x256xf32>
    %204 = arith.negf %203 : vector<8x256xf32>
    %205 = math.exp %204 : vector<8x256xf32>
    %cst_54 = arith.constant 1.000000e+00 : f32
    %206 = vector.broadcast %cst_54 : f32 to vector<8x256xf32>
    %207 = arith.addf %206, %205 : vector<8x256xf32>
    %208 = arith.divf %206, %207 : vector<8x256xf32>
    %209 = vector.extract_strided_slice %198 {offsets = [0, 256], sizes = [8, 256], strides = [1, 1]} : vector<8x768xf32> to vector<8x256xf32>
    %210 = vector.extract_strided_slice %200 {offsets = [0, 256], sizes = [8, 256], strides = [1, 1]} : vector<8x512xf32> to vector<8x256xf32>
    %211 = arith.addf %209, %210 : vector<8x256xf32>
    %212 = arith.negf %211 : vector<8x256xf32>
    %213 = math.exp %212 : vector<8x256xf32>
    %cst_55 = arith.constant 1.000000e+00 : f32
    %214 = vector.broadcast %cst_55 : f32 to vector<8x256xf32>
    %215 = arith.addf %214, %213 : vector<8x256xf32>
    %216 = arith.divf %214, %215 : vector<8x256xf32>
    %cst_56 = arith.constant dense<0.000000e+00> : vector<8x256xf32>
    %217 = tpu.matmul %199, %9, %cst_56 {dimension_numbers = #tpu.dot_dimension_numbers<[1], [0], [0], [1], [0, 0, 1, 1], [], []>} : vector<8x256xbf16>, vector<256x256xbf16>, vector<8x256xf32> -> vector<8x256xf32>
    %218 = vector.extract_strided_slice %198 {offsets = [0, 512], sizes = [8, 256], strides = [1, 1]} : vector<8x768xf32> to vector<8x256xf32>
    %219 = arith.addf %217, %13 : vector<8x256xf32>
    %220 = arith.mulf %208, %219 : vector<8x256xf32>
    %221 = arith.addf %218, %220 : vector<8x256xf32>
    %222 = math.tanh %221 : vector<8x256xf32>
    %cst_57 = arith.constant 1.000000e+00 : f32
    %223 = vector.broadcast %cst_57 : f32 to vector<8x256xf32>
    %224 = arith.subf %223, %216 : vector<8x256xf32>
    %225 = arith.mulf %224, %222 : vector<8x256xf32>
    %226 = arith.mulf %216, %191 : vector<8x256xf32>
    %227 = arith.addf %225, %226 : vector<8x256xf32>
    %228 = arith.truncf %227 : vector<8x256xf32> to vector<8x256xbf16>
    %229 = arith.index_cast %196 : i32 to index
    %c0_58 = arith.constant 0 : index
    %230 = vector.load %arg14[%229, %c0_58] : memref<64x256xbf16, #tpu.memory_space<vmem>>, vector<8x256xbf16>
    tpu.vector_store %arg14[%229, %c0_58], %228 {strides = array<i32>} : memref<64x256xbf16, #tpu.memory_space<vmem>>, vector<8x256xbf16>,
    %c6_i32 = arith.constant 6 : i32
    %c8_i32_59 = arith.constant 8 : i32
    %231 = arith.muli %c6_i32, %c8_i32_59 : i32
    %232 = tpu.assume_multiple %231, 8 : i32
    %233 = arith.index_cast %232 : i32 to index
    %c0_60 = arith.constant 0 : index
    %234 = vector.load %arg13[%233, %c0_60] : memref<64x768xf32, #tpu.memory_space<vmem>>, vector<8x768xf32>
    %235 = arith.truncf %227 : vector<8x256xf32> to vector<8x256xbf16>
    %cst_61 = arith.constant dense<0.000000e+00> : vector<8x512xf32>
    %236 = tpu.matmul %235, %7, %cst_61 {dimension_numbers = #tpu.dot_dimension_numbers<[1], [0], [0], [1], [0, 0, 1, 1], [], []>} : vector<8x256xbf16>, vector<256x512xbf16>, vector<8x512xf32> -> vector<8x512xf32>
    %237 = vector.extract_strided_slice %234 {offsets = [0, 0], sizes = [8, 256], strides = [1, 1]} : vector<8x768xf32> to vector<8x256xf32>
    %238 = vector.extract_strided_slice %236 {offsets = [0, 0], sizes = [8, 256], strides = [1, 1]} : vector<8x512xf32> to vector<8x256xf32>
    %239 = arith.addf %237, %238 : vector<8x256xf32>
    %240 = arith.negf %239 : vector<8x256xf32>
    %241 = math.exp %240 : vector<8x256xf32>
    %cst_62 = arith.constant 1.000000e+00 : f32
    %242 = vector.broadcast %cst_62 : f32 to vector<8x256xf32>
    %243 = arith.addf %242, %241 : vector<8x256xf32>
    %244 = arith.divf %242, %243 : vector<8x256xf32>
    %245 = vector.extract_strided_slice %234 {offsets = [0, 256], sizes = [8, 256], strides = [1, 1]} : vector<8x768xf32> to vector<8x256xf32>
    %246 = vector.extract_strided_slice %236 {offsets = [0, 256], sizes = [8, 256], strides = [1, 1]} : vector<8x512xf32> to vector<8x256xf32>
    %247 = arith.addf %245, %246 : vector<8x256xf32>
    %248 = arith.negf %247 : vector<8x256xf32>
    %249 = math.exp %248 : vector<8x256xf32>
    %cst_63 = arith.constant 1.000000e+00 : f32
    %250 = vector.broadcast %cst_63 : f32 to vector<8x256xf32>
    %251 = arith.addf %250, %249 : vector<8x256xf32>
    %252 = arith.divf %250, %251 : vector<8x256xf32>
    %cst_64 = arith.constant dense<0.000000e+00> : vector<8x256xf32>
    %253 = tpu.matmul %235, %9, %cst_64 {dimension_numbers = #tpu.dot_dimension_numbers<[1], [0], [0], [1], [0, 0, 1, 1], [], []>} : vector<8x256xbf16>, vector<256x256xbf16>, vector<8x256xf32> -> vector<8x256xf32>
    %254 = vector.extract_strided_slice %234 {offsets = [0, 512], sizes = [8, 256], strides = [1, 1]} : vector<8x768xf32> to vector<8x256xf32>
    %255 = arith.addf %253, %13 : vector<8x256xf32>
    %256 = arith.mulf %244, %255 : vector<8x256xf32>
    %257 = arith.addf %254, %256 : vector<8x256xf32>
    %258 = math.tanh %257 : vector<8x256xf32>
    %cst_65 = arith.constant 1.000000e+00 : f32
    %259 = vector.broadcast %cst_65 : f32 to vector<8x256xf32>
    %260 = arith.subf %259, %252 : vector<8x256xf32>
    %261 = arith.mulf %260, %258 : vector<8x256xf32>
    %262 = arith.mulf %252, %227 : vector<8x256xf32>
    %263 = arith.addf %261, %262 : vector<8x256xf32>
    %264 = arith.truncf %263 : vector<8x256xf32> to vector<8x256xbf16>
    %265 = arith.index_cast %232 : i32 to index
    %c0_66 = arith.constant 0 : index
    %266 = vector.load %arg14[%265, %c0_66] : memref<64x256xbf16, #tpu.memory_space<vmem>>, vector<8x256xbf16>
    tpu.vector_store %arg14[%265, %c0_66], %264 {strides = array<i32>} : memref<64x256xbf16, #tpu.memory_space<vmem>>, vector<8x256xbf16>,
    %c7_i32 = arith.constant 7 : i32
    %c8_i32_67 = arith.constant 8 : i32
    %267 = arith.muli %c7_i32, %c8_i32_67 : i32
    %268 = tpu.assume_multiple %267, 8 : i32
    %269 = arith.index_cast %268 : i32 to index
    %c0_68 = arith.constant 0 : index
    %270 = vector.load %arg13[%269, %c0_68] : memref<64x768xf32, #tpu.memory_space<vmem>>, vector<8x768xf32>
    %271 = arith.truncf %263 : vector<8x256xf32> to vector<8x256xbf16>
    %cst_69 = arith.constant dense<0.000000e+00> : vector<8x512xf32>
    %272 = tpu.matmul %271, %7, %cst_69 {dimension_numbers = #tpu.dot_dimension_numbers<[1], [0], [0], [1], [0, 0, 1, 1], [], []>} : vector<8x256xbf16>, vector<256x512xbf16>, vector<8x512xf32> -> vector<8x512xf32>
    %273 = vector.extract_strided_slice %270 {offsets = [0, 0], sizes = [8, 256], strides = [1, 1]} : vector<8x768xf32> to vector<8x256xf32>
    %274 = vector.extract_strided_slice %272 {offsets = [0, 0], sizes = [8, 256], strides = [1, 1]} : vector<8x512xf32> to vector<8x256xf32>
    %275 = arith.addf %273, %274 : vector<8x256xf32>
    %276 = arith.negf %275 : vector<8x256xf32>
    %277 = math.exp %276 : vector<8x256xf32>
    %cst_70 = arith.constant 1.000000e+00 : f32
    %278 = vector.broadcast %cst_70 : f32 to vector<8x256xf32>
    %279 = arith.addf %278, %277 : vector<8x256xf32>
    %280 = arith.divf %278, %279 : vector<8x256xf32>
    %281 = vector.extract_strided_slice %270 {offsets = [0, 256], sizes = [8, 256], strides = [1, 1]} : vector<8x768xf32> to vector<8x256xf32>
    %282 = vector.extract_strided_slice %272 {offsets = [0, 256], sizes = [8, 256], strides = [1, 1]} : vector<8x512xf32> to vector<8x256xf32>
    %283 = arith.addf %281, %282 : vector<8x256xf32>
    %284 = arith.negf %283 : vector<8x256xf32>
    %285 = math.exp %284 : vector<8x256xf32>
    %cst_71 = arith.constant 1.000000e+00 : f32
    %286 = vector.broadcast %cst_71 : f32 to vector<8x256xf32>
    %287 = arith.addf %286, %285 : vector<8x256xf32>
    %288 = arith.divf %286, %287 : vector<8x256xf32>
    %cst_72 = arith.constant dense<0.000000e+00> : vector<8x256xf32>
    %289 = tpu.matmul %271, %9, %cst_72 {dimension_numbers = #tpu.dot_dimension_numbers<[1], [0], [0], [1], [0, 0, 1, 1], [], []>} : vector<8x256xbf16>, vector<256x256xbf16>, vector<8x256xf32> -> vector<8x256xf32>
    %290 = vector.extract_strided_slice %270 {offsets = [0, 512], sizes = [8, 256], strides = [1, 1]} : vector<8x768xf32> to vector<8x256xf32>
    %291 = arith.addf %289, %13 : vector<8x256xf32>
    %292 = arith.mulf %280, %291 : vector<8x256xf32>
    %293 = arith.addf %290, %292 : vector<8x256xf32>
    %294 = math.tanh %293 : vector<8x256xf32>
    %cst_73 = arith.constant 1.000000e+00 : f32
    %295 = vector.broadcast %cst_73 : f32 to vector<8x256xf32>
    %296 = arith.subf %295, %288 : vector<8x256xf32>
    %297 = arith.mulf %296, %294 : vector<8x256xf32>
    %298 = arith.mulf %288, %263 : vector<8x256xf32>
    %299 = arith.addf %297, %298 : vector<8x256xf32>
    %300 = arith.truncf %299 : vector<8x256xf32> to vector<8x256xbf16>
    %301 = arith.index_cast %268 : i32 to index
    %c0_74 = arith.constant 0 : index
    %302 = vector.load %arg14[%301, %c0_74] : memref<64x256xbf16, #tpu.memory_space<vmem>>, vector<8x256xbf16>
    tpu.vector_store %arg14[%301, %c0_74], %300 {strides = array<i32>} : memref<64x256xbf16, #tpu.memory_space<vmem>>, vector<8x256xbf16>,
    %c8_i32_75 = arith.constant 8 : i32
    %c0_76 = arith.constant 0 : index
    %c0_77 = arith.constant 0 : index
    %c0_78 = arith.constant 0 : index
    %303 = vector.load %arg12[%c0_76, %c0_77, %c0_78] : memref<1x8x256xf32, #tpu.memory_space<vmem>>, vector<1x8x256xf32>
    %304 = vector.shape_cast %303 : vector<1x8x256xf32> to vector<8x256xf32>
    %305 = vector.shape_cast %299 : vector<8x256xf32> to vector<1x8x256xf32>
    tpu.vector_store %arg12[%c0_76, %c0_77, %c0_78], %305 {strides = array<i32>} : memref<1x8x256xf32, #tpu.memory_space<vmem>>, vector<1x8x256xf32>,
    return
  }
  func.func @transform_0(%arg0: i32) -> (i32, i32) {
    %c0_i32 = arith.constant 0 : i32
    %c0_i32_0 = arith.constant 0 : i32
    %c0_i32_1 = arith.constant 0 : i32
    return %c0_i32, %c0_i32_0 : i32, i32
  }
  func.func @transform_1(%arg0: i32) -> (i32, i32) {
    %c0_i32 = arith.constant 0 : i32
    %c0_i32_0 = arith.constant 0 : i32
    %c0_i32_1 = arith.constant 0 : i32
    return %c0_i32, %c0_i32_0 : i32, i32
  }
  func.func @transform_2(%arg0: i32) -> (i32, i32) {
    %c0_i32 = arith.constant 0 : i32
    %c0_i32_0 = arith.constant 0 : i32
    %c0_i32_1 = arith.constant 0 : i32
    return %c0_i32, %c0_i32_0 : i32, i32
  }
  func.func @transform_3(%arg0: i32) -> (i32, i32) {
    %c0_i32 = arith.constant 0 : i32
    %c0_i32_0 = arith.constant 0 : i32
    %c0_i32_1 = arith.constant 0 : i32
    return %c0_i32, %c0_i32_0 : i32, i32
  }
  func.func @transform_4(%arg0: i32) -> (i32, i32) {
    %c0_i32 = arith.constant 0 : i32
    %c0_i32_0 = arith.constant 0 : i32
    %c0_i32_1 = arith.constant 0 : i32
    return %c0_i32, %c0_i32_0 : i32, i32
  }
  func.func @transform_5(%arg0: i32) -> (i32, i32, i32) {
    %c1_i32 = arith.constant 1 : i32
    %0 = arith.subi %arg0, %c1_i32 : i32
    %c0_i32 = arith.constant 0 : i32
    %1 = arith.maxsi %0, %c0_i32 : i32
    %c0_i32_0 = arith.constant 0 : i32
    %c0_i32_1 = arith.constant 0 : i32
    %c0_i32_2 = arith.constant 0 : i32
    return %1, %c0_i32_0, %c0_i32_1 : i32, i32, i32
  }
  func.func @transform_6(%arg0: i32) -> (i32, i32, i32) {
    %c0_i32 = arith.constant 0 : i32
    %c0_i32_0 = arith.constant 0 : i32
    %c0_i32_1 = arith.constant 0 : i32
    return %arg0, %c0_i32, %c0_i32_0 : i32, i32, i32
  }
  func.func @transform_7(%arg0: i32) -> (i32, i32, i32) {
    %c0_i32 = arith.constant 0 : i32
    %c0_i32_0 = arith.constant 0 : i32
    %c0_i32_1 = arith.constant 0 : i32
    return %arg0, %c0_i32, %c0_i32_0 : i32, i32, i32
  }
  func.func @transform_8(%arg0: i32) -> (i32, i32, i32) {
    %c0_i32 = arith.constant 0 : i32
    %c0_i32_0 = arith.constant 0 : i32
    %c0_i32_1 = arith.constant 0 : i32
    return %arg0, %c0_i32, %c0_i32_0 : i32, i32, i32
  }
  func.func @transform_9(%arg0: i32) -> (i32, i32, i32) {
    %c0_i32 = arith.constant 0 : i32
    %c0_i32_0 = arith.constant 0 : i32
    %c0_i32_1 = arith.constant 0 : i32
    return %arg0, %c0_i32, %c0_i32_0 : i32, i32, i32
  }
  func.func @transform_10(%arg0: i32) -> (i32, i32) {
    %c0_i32 = arith.constant 0 : i32
    %c0_i32_0 = arith.constant 0 : i32
    %c0_i32_1 = arith.constant 0 : i32
    return %c0_i32, %c0_i32_0 : i32, i32
  }
  func.func @transform_11(%arg0: i32) -> (i32, i32, i32) {
    %c0_i32 = arith.constant 0 : i32
    %c0_i32_0 = arith.constant 0 : i32
    %c0_i32_1 = arith.constant 0 : i32
    return %arg0, %c0_i32, %c0_i32_0 : i32, i32, i32
  }
}

</mosaic_0001>

<bundles_post_ra>
// kernel: image_caption_net_forward.1
= control target key start
LH: loop header
LB: loop body
LE: loop exit
PB: predicated region body
PF: predicated region fallthrough
CT: control target
= control target key end

     0   :  { %s9558_s0 = inlined_call_operand.vmem [shape: bf16[8,128], index: 0, kind: input, shape index: {}]   ;;  %s9559_s1 = inlined_call_operand.hbm [shape: bf16[128,256], index: 1, kind: input, shape index: {}]   ;;  %s9560_s2 = inlined_call_operand.hbm [shape: f32[1,256], index: 2, kind: input, shape index: {}]   ;;  %s9561_s3 = inlined_call_operand.vmem [shape: bf16[64,384], index: 3, kind: input, shape index: {}]   ;;  %s9562_s4 = inlined_call_operand.hbm [shape: bf16[384,768], index: 4, kind: input, shape index: {}]   ;;  %s9563_s5 = inlined_call_operand.hbm [shape: bf16[3,256,768], index: 5, kind: input, shape index: {}]   ;;  %s9564_s6 = inlined_call_operand.hbm [shape: bf16[4,256,512], index: 6, kind: input, shape index: {}]   ;;  %s9565_s7 = inlined_call_operand.hbm [shape: bf16[4,256,256], index: 7, kind: input, shape index: {}]   ;;  %s9566_s8 = inlined_call_operand.hbm [shape: f32[4,1,768], index: 8, kind: input, shape index: {}]   ;;  %s9567_s9 = inlined_call_operand.hbm [shape: f32[4,1,256], index: 9, kind: input, shape index: {}]   ;;  %s9568_s10 = inlined_call_operand.vmem [shape: f32[8,256], index: 10, kind: output, shape index: {0}]   ;;  %s9569_s11 = inlined_call_operand.vmem [shape: f32[4,8,256], index: 11, kind: output, shape index: {1}]  }
   0x1   :  { %9803 = sst [smem:[#allocation88_spill]] %s9558_s0 }
   0x2   :  { %9804 = sst [smem:[#allocation89_spill]] %s9559_s1 }
   0x3   :  { %9805 = sst [smem:[#allocation90_spill]] %s9560_s2 }
   0x4   :  { %9806 = sst [smem:[#allocation91_spill]] %s9561_s3 }
   0x5   :  { %9807 = sst [smem:[#allocation92_spill]] %s9562_s4 }
   0x6   :  { %9808 = sst [smem:[#allocation93_spill]] %s9563_s5 }
   0x7   :  { %9809 = sst [smem:[#allocation94_spill]] %s9568_s10 }
   0x8   :  { %9810 = sst [smem:[#allocation95_spill]] %s9569_s11 }
   0x9   :  { %17 = vsyncpa [#allocation5], 0 }
   0xa   :  { %18 = vsyncpa [#allocation7], 0 }
   0xb   :  { %19 = vsyncpa [#allocation10], 0 }
   0xc   :  { %21 = vsyncpa [#allocation10 + $0x1], 0 }
   0xd   :  { %22 = vsyncpa [#allocation13], 0 }
   0xe   :  { %24 = vsyncpa [#allocation13 + $0x1], 0 }
   0xf   :  { %25 = vsyncpa [#allocation16], 0 }
  0x10   :  { %27 = vsyncpa [#allocation16 + $0x1], 0  ;;  %s7314_s17 = smov 0   ;;  %s7316_s18 = smov 0  }
  0x11   :  { %s7318_s19 = smov 0   ;;  %s7320_s20 = smov 0  }
  0x12   :  { %s7322_s21 = smov 0   ;;  %s7324_s22 = smov 0  }
  0x13   :  { %s7326_s23 = smov 0  }
  0x14 LB: > { %9811 = sst [smem:[#allocation23_spill]] %s7232_s22  ;;  %s7346_s24 = sadd.s32 4294967295, %s7236_s23   ;;  %s7236_s23 = sphi %s7326_s23, %s10170_s23   ;;  %s7232_s22 = sphi %s7324_s22, %s10173_s22   ;;  %s7228_s21 = sphi %s7322_s21, %s10178_s21   ;;  %s7224_s20 = sphi %s7320_s20, %s10177_s20   ;;  %s7220_s19 = sphi %s7318_s19, %s10176_s19   ;;  %s7216_s18 = sphi %s7316_s18, %s10175_s18   ;;  %s7212_s17 = sphi %s7314_s17, %s10174_s17  }
  0x15   : > { %p164_p0 = scmp.ne.s32.totalorder %s7228_s21, %s7224_s20  ;;  %p9574_p1 = scmp.eq.s32.totalorder %s7346_s24, 0 }
  0x16   : > { %p190_p2 = scmp.ne.s32.totalorder %s7216_s18, %s7212_s17  ;;  %p5440_p3 = scmp.ge.s32.totalorder %s7236_s23, 1 }
  0x17   : > { %p326_p4 = scmp.lt.s32.totalorder %s7236_s23, 5  ;;  %p7355_p5 = por %p9574_p1, %p164_p0 }
  0x18   : > { %p7361_p6 = por %p190_p2, %p9574_p1  ;;  %s7238_s28 = smov [#allocation6]  }
  0x19   : > { %s9812_s25 = scalar_select %p7355_p5, 1, 0 }
  0x1a   : > { %s9813_s26 = scalar_select %p7361_p6, 1, 0 }
  0x1b   : > { %p7365_p7 = pnand %p5440_p3, %p326_p4  ;;  %s355_s29 = sshll.u32 %s7238_s28, 4  ;;  %s356_s29 = int_to_ptr.vmem [resolvable:$true] %s355_s29 }
  0x1c   : > { %s7379_s12 = sadd.s32 1, %s7236_s23   ;;  %p143_p11 = scmp.gt.s32.totalorder %s7346_s24, 0 }
  0x1d   : > { %s9814_s27 = scalar_select %p7365_p7, 1, 0 }
  0x1e   : > { %p5954_p9 = pneg %p7365_p7  ;;  %9816 = sst [smem:[#allocation24_spill]] %s7379_s12 }
  0x1f   : > { %s5439_s13 = sadd.s32 4294967295, %s7379_s12  ;;  %s6951_s14 = scalar_lea.vmem %s356_s29, 32 }
  0x20   : > { %p7374_p10 = pnand %p5954_p9, %p9574_p1  ;;  %p6952_p13 = scmp.ne.s32.totalorder %s356_s29, %s6951_s14 }
  0x21   : > { %p6959_p3 = scmp.lt.s32.totalorder %s356_s29, %s356_s29  ;;  %p6960_p4 = scmp.lt.s32.totalorder %s6951_s14, %s6951_s14 }
  0x22   : > { %s9815_s30 = scalar_select %p7374_p10, 1, 0 }
  0x23   : > { %p9575_p12 = pneg %p7374_p10  ;;  %p6961_p9 = por %p6960_p4, %p6959_p3 }
  0x25   : > { %p6954_p0 = pnand %p6952_p13, %p9575_p12 }
  0x27   : > { %p6955_p2 = pneg %p6954_p0 }
  0x29   : > { %p6962_p8 = pnand %p6961_p9, %p6955_p2 }
  0x2b   : > { %6965 = shalt.err (!%p6962_p8)
}
  0x2c   : > { %s9817_s2 = sld [smem:[#allocation90_spill]]  ;;  %p146_p8 = scmp.gt.s32.totalorder %s5439_s13, 0 }
  0x2d   : > { %s144_s17 = scalar_select %p143_p11, %s7346_s24, 0 }
  0x2e   : > { %s151_s20 = sadd.s32 1, %s7232_s22  ;;  %p158_p13 = scmp.ne.s32.totalorder %s7232_s22, %s7228_s21 }
  0x2f   : > { %p9577_p0 = scmp.eq.s32.totalorder %s7236_s23, 0  ;;  %s10180_s13 = smov (!%p146_p8, %s5439_s13), 0 }
  0x30   : > { %s174_s28 = ssub.s32 %s7236_s23, %s7379_s12  ;;  %s148_s14 = ssub.s32 %s144_s17, %s10180_s13 }
  0x31   : > { %p160_p2 = por %p9577_p0, %p158_p13  ;;  %p7402_p3 = scmp.eq.s32.totalorder %s174_s28, 0 }
  0x32   : > { %5960 = dma.hbm_to_vmem [thread:$0]  (!%p7374_p10), %s9817_s2, 32, %s356_s29, [#allocation7]  }
  0x33   : > { %s9818_s15 = scalar_select %p7402_p3, 1, 0 }
  0x34   : > { %p149_p4 = scmp.eq.s32.totalorder %s148_s14, 0  ;;  %p9576_p9 = scmp.lt.s32.totalorder %s7236_s23, 4 }
  0x35   : > { %s9580_s29 = sand.u32 1, %s7236_s23   ;;  %s384_s2 = sand.u32 1, %s7232_s22  }
  0x36   : > { %s7408_s16 = scalar_select %p149_p4, %s7232_s22, %s151_s20  }
  0x37   : > { %s5926_s10 = smul.u32 768, %s384_s2  ;;  %p7414_p11 = pnand %p9576_p9, %p160_p2 }
  0x38   : > { %9819 = sst [smem:[#allocation25_spill]] %s7408_s16  ;;  %s5927_s3 = smul.u32 12288, %s144_s17 }
  0x39   : > { %s9821_s5 = sld [smem:[#allocation93_spill]]  ;;  %s386_s20 = scalar_lea.vmem [#allocation9], %s5926_s10 }
  0x3a   : > { %s396_s28 = sshll.u32 %s386_s20, 4  ;;  %s7427_s2 = scalar_lea.sflag [#allocation10], %s9580_s29  ;;  %s7423_s28 = int_to_ptr.vmem [resolvable:$true] %s396_s28 }
  0x3b   : > { %p6968_p13 = pneg %p7414_p11 }
  0x3f   : > { %s7421_s13 = scalar_lea.hbm %s9821_s5, %s5927_s3  ;;  %s6971_s3 = scalar_lea.hbm %s9821_s5, 36864 }
  0x40   : > { %s6966_s17 = scalar_lea.hbm %s7421_s13, 12288  ;;  %p6972_p1 = scmp.lt.s32.totalorder %s7421_s13, %s9821_s5 }
  0x41   : > { %p6967_p8 = scmp.ne.s32.totalorder %s7421_s13, %s6966_s17  ;;  %p6973_p12 = scmp.lt.s32.totalorder %s6971_s3, %s6966_s17 }
  0x43   : > { %p6969_p2 = pnand %p6968_p13, %p6967_p8  ;;  %p6974_p9 = por %p6973_p12, %p6972_p1 }
  0x45   : > { %p6970_p4 = pneg %p6969_p2 }
  0x47   : > { %p6975_p0 = pnand %p6974_p9, %p6970_p4 }
  0x49   : > { %6978 = shalt.err (!%p6975_p0)
}
  0x4a   : > { %s6979_s10 = scalar_lea.vmem %s7423_s28, 12288  ;;  %s7239_s20 = smov [#allocation9]  }
  0x4b   : > { %p6980_p6 = scmp.ne.s32.totalorder %s7423_s28, %s6979_s10  ;;  %s6984_s29 = sshll.u32 %s7239_s20, 4  ;;  %s6985_s29 = int_to_ptr.vmem [resolvable:$false] %s6984_s29 }
  0x4c   : > { %s6986_s11 = scalar_lea.vmem %s6985_s29, 24576  ;;  %p6987_p2 = scmp.lt.s32.totalorder %s7423_s28, %s6985_s29 }
  0x4d   : > { %p6982_p5 = pnand %p6980_p6, %p6968_p13  ;;  %p6988_p7 = scmp.lt.s32.totalorder %s6986_s11, %s6979_s10 }
  0x4f   : > { %p6983_p8 = pneg %p6982_p5  ;;  %p6989_p10 = por %p6988_p7, %p6987_p2 }
  0x51   : > { %p6990_p3 = pnand %p6989_p10, %p6983_p8 }
  0x53   : > { %6993 = shalt.err (!%p6990_p3)
}
  0x54   : > { %s9584_s16 = smov 384   ;;  %s9585_s17 = smov 24  }
  0x55   : > { %5967 = dma.hbm_to_vmem [thread:$0]  (!%p7414_p11), %s7421_s13, 12288, %s7423_s28, %s7427_s2, %s9584_s16, %s9584_s16, %s9585_s17  }
  0x56   : > { %s177_s29 = sadd.s32 1, %s7220_s19  ;;  %p184_p1 = scmp.ne.s32.totalorder %s7220_s19, %s7216_s18 }
  0x57   : > { %p9822_p5 = scmp.ne.s32.totalorder %s9818_s15, 0  ;;  %p9824_p6 = scmp.eq.s32.totalorder %s7236_s23, 0 }
  0x58   : > { %s7462_s3 = sand.u32 1, %s7220_s19   ;;  %p9825_p10 = scmp.lt.s32.totalorder %s7236_s23, 4 }
  0x59   : > { %s7457_s12 = scalar_select %p9822_p5, %s7220_s19, %s177_s29  }
  0x5a   : > { %p186_p7 = por %p184_p1, %p9824_p6  ;;  %s5450_s0 = sshll.u32 %s7462_s3, 8 }
  0x5b   : > { %9823 = sst [smem:[#allocation26_spill]] %s7457_s12  ;;  %s5883_s10 = sshll.u32 %s7236_s23, 12 }
  0x5c   : > { %p7466_p12 = pnand %p9825_p10, %p186_p7  ;;  %s7475_s28 = scalar_lea.hbm %s9565_s7, %s5883_s10 }
  0x5d   : > { %s431_s15 = scalar_lea.vmem [#allocation12], %s5450_s0  ;;  %s7242_s29 = smov [#allocation4]  }
  0x5e   : > { %s438_s11 = sshll.u32 %s431_s15, 4  ;;  %s7479_s16 = sshll.u32 %s7242_s29, 4  ;;  %s7477_s11 = int_to_ptr.vmem [resolvable:$true] %s438_s11  ;;  %s342_s16 = int_to_ptr.vmem [resolvable:$true] %s7479_s16 }
  0x5f   : > { %s9827_s17 = sand.u32 1, %s7236_s23   ;;  %s6994_s22 = scalar_lea.hbm %s7475_s28, 4096 }
  0x60   : > { %s7483_s5 = scalar_lea.sflag [#allocation13], %s9827_s17  ;;  %p6995_p0 = scmp.ne.s32.totalorder %s7475_s28, %s6994_s22 }
  0x61   : > { %p7489_p3 = pneg %p7466_p12  ;;  %s6999_s13 = scalar_lea.hbm %s9565_s7, 16384 }
  0x62   : > { %p7000_p13 = scmp.lt.s32.totalorder %s7475_s28, %s9565_s7  ;;  %p7001_p4 = scmp.lt.s32.totalorder %s6999_s13, %s6994_s22 }
  0x63   : > { %p6997_p9 = pnand %p7489_p3, %p6995_p0 }
  0x64   : > { %p7002_p8 = por %p7001_p4, %p7000_p13 }
  0x65   : > { %p6998_p11 = pneg %p6997_p9 }
  0x67   : > { %p7003_p2 = pnand %p7002_p8, %p6998_p11 }
  0x69   : > { %7006 = shalt.err (!%p7003_p2)
}
  0x6a   : > { %s7007_s17 = scalar_lea.vmem %s7477_s11, 4096  ;;  %s7243_s12 = smov [#allocation12]  }
  0x6b   : > { %p7008_p1 = scmp.ne.s32.totalorder %s7477_s11, %s7007_s17  ;;  %s7012_s0 = sshll.u32 %s7243_s12, 4  ;;  %s7013_s0 = int_to_ptr.vmem [resolvable:$false] %s7012_s0 }
  0x6c   : > { %s7014_s10 = scalar_lea.vmem %s7013_s0, 8192  ;;  %p7015_p7 = scmp.lt.s32.totalorder %s7477_s11, %s7013_s0 }
  0x6d   : > { %p7010_p5 = pnand %p7008_p1, %p7489_p3  ;;  %p7016_p10 = scmp.lt.s32.totalorder %s7014_s10, %s7007_s17 }
  0x6f   : > { %p7011_p6 = pneg %p7010_p5  ;;  %p7017_p0 = por %p7016_p10, %p7015_p7 }
  0x71   : > { %p7018_p9 = pnand %p7017_p0, %p7011_p6 }
  0x73   : > { %7021 = shalt.err (!%p7018_p9)
}
  0x74   : > { %s7244_s22 = smov 128   ;;  %s7245_s13 = smov 8  }
  0x75   : > { %5973 = dma.hbm_to_vmem [thread:$0]  (!%p7466_p12), %s7475_s28, 4096, %s7477_s11, %s7483_s5, %s7244_s22, %s7244_s22, %s7245_s13  }
  0x76   : > { %s7033_s15 = scalar_lea.vmem %s342_s16, 2048  ;;  %p9829_p13 = scmp.ne.s32.totalorder %s9815_s30, 0 }
  0x77   : > { %p7034_p11 = scmp.ne.s32.totalorder %s342_s16, %s7033_s15  ;;  %p7041_p1 = scmp.lt.s32.totalorder %s342_s16, %s342_s16 }
  0x78   : > { %p9830_p4 = pneg %p9829_p13  ;;  %p7042_p5 = scmp.lt.s32.totalorder %s7033_s15, %s7033_s15 }
  0x7a   : > { %p7036_p8 = pnand %p7034_p11, %p9830_p4  ;;  %p7043_p6 = por %p7042_p5, %p7041_p1 }
  0x7c   : > { %p7037_p2 = pneg %p7036_p8 }
  0x7e   : > { %p7044_p7 = pnand %p7043_p6, %p7037_p2 }
  0x80   : > { %7047 = shalt.err (!%p7044_p7)
}
  0x81   : > { %s9831_s1 = sld [smem:[#allocation89_spill]]  ;;  %s7246_s28 = smov [#allocation8]  }
  0x82   : > { %s368_s11 = sshll.u32 %s7246_s28, 4  ;;  %s5447_s17 = sshll.u32 %s7462_s3, 9  ;;  %s369_s11 = int_to_ptr.vmem [resolvable:$true] %s368_s11 }
  0x83   : > { %s7059_s0 = scalar_lea.vmem %s369_s11, 18432  ;;  %p9832_p0 = pmov %p9830_p4 }
  0x84   : > { %p7060_p10 = scmp.ne.s32.totalorder %s369_s11, %s7059_s0  ;;  %p7067_p4 = scmp.lt.s32.totalorder %s369_s11, %s369_s11 }
  0x85   : > { %p7068_p8 = scmp.lt.s32.totalorder %s7059_s0, %s7059_s0 }
  0x86   : > { %p7062_p9 = pnand %p7060_p10, %p9832_p0 }
  0x87   : > { %5957 = dma.hbm_to_vmem [thread:$0]  (!%p9829_p13), %s9831_s1, 2048, %s342_s16, [#allocation5], %s7244_s22, %s7244_s22, %s7245_s13  }
  0x88   : > { %p7063_p11 = pneg %p7062_p9  ;;  %p7069_p2 = por %p7068_p8, %p7067_p4 }
  0x8a   : > { %p7070_p1 = pnand %p7069_p2, %p7063_p11 }
  0x8c   : > { %7073 = shalt.err (!%p7070_p1)
}
  0x8d   : > { %s9833_s10 = smov 24   ;;  %s9834_s15 = smov 384  }
  0x8e   : > { %s9835_s4 = sld [smem:[#allocation92_spill]]  ;;  %s5882_s13 = sshll.u32 %s7236_s23, 13 }
  0x8f   : > { %s410_s12 = scalar_lea.vmem [#allocation11], %s5447_s17  ;;  %s7537_s0 = scalar_lea.hbm %s9564_s6, %s5882_s13 }
  0x90   : > { %s417_s29 = sshll.u32 %s410_s12, 4  ;;  %s7074_s30 = scalar_lea.hbm %s7537_s0, 8192  ;;  %s7539_s29 = int_to_ptr.vmem [resolvable:$true] %s417_s29 }
  0x91   : > { %p7075_p5 = scmp.ne.s32.totalorder %s7537_s0, %s7074_s30  ;;  %s7079_s17 = scalar_lea.hbm %s9564_s6, 32768 }
  0x92   : > { %p7081_p10 = scmp.lt.s32.totalorder %s7079_s17, %s7074_s30 }
  0x93   : > { %p7077_p6 = pnand %p7075_p5, %p7489_p3 }
  0x94   : > { %5963 = dma.hbm_to_vmem [thread:$0]  (!%p9829_p13), %s9835_s4, 18432, %s369_s11, [#allocation7], %s9834_s15, %s9834_s15, %s9833_s10  }
  0x95   : > { %p7078_p7 = pneg %p7077_p6  ;;  %p7080_p13 = scmp.lt.s32.totalorder %s7537_s0, %s9564_s6 }
  0x97   : > { %p7082_p0 = por %p7081_p10, %p7080_p13 }
  0x99   : > { %p7083_p9 = pnand %p7082_p0, %p7078_p7 }
  0x9b   : > { %7086 = shalt.err (!%p7083_p9)
}
  0x9c   : > { %s7087_s1 = scalar_lea.vmem %s7539_s29, 8192  ;;  %s7247_s22 = smov [#allocation11]  }
  0x9d   : > { %p7088_p11 = scmp.ne.s32.totalorder %s7539_s29, %s7087_s1  ;;  %s7092_s13 = sshll.u32 %s7247_s22, 4  ;;  %s7093_s13 = int_to_ptr.vmem [resolvable:$false] %s7092_s13 }
  0x9e   : > { %s7094_s12 = scalar_lea.vmem %s7093_s13, 16384  ;;  %p7095_p2 = scmp.lt.s32.totalorder %s7539_s29, %s7093_s13 }
  0x9f   : > { %p7090_p4 = pnand %p7088_p11, %p7489_p3  ;;  %p7096_p1 = scmp.lt.s32.totalorder %s7094_s12, %s7087_s1 }
  0xa1   : > { %p7091_p8 = pneg %p7090_p4  ;;  %p7097_p5 = por %p7096_p1, %p7095_p2 }
  0xa3   : > { %p7098_p6 = pnand %p7097_p5, %p7091_p8 }
  0xa5   : > { %7101 = shalt.err (!%p7098_p6)
}
  0xa6   : > { %s7248_s28 = smov 256   ;;  %s7249_s30 = smov 16  }
  0xa7   : > { %5970 = dma.hbm_to_vmem [thread:$0]  (!%p7466_p12), %s7537_s0, 8192, %s7539_s29, %s7427_s2, %s7248_s28, %s7248_s28, %s7249_s30  }
  0xa8   : > { %s5928_s16 = smul.u32 6, %s7462_s3  ;;  %s5454_s17 = sshll.u32 %s7462_s3, 1 }
  0xa9   : > { %s5929_s11 = smul.u32 96, %s7236_s23  ;;  %s5884_s12 = sshll.u32 %s7236_s23, 5 }
  0xaa   : > { %s452_s22 = scalar_lea.vmem [#allocation14], %s5928_s16  ;;  %s7107_s0 = scalar_lea.hbm %s9566_s8, 384 }
  0xab   : > { %s7568_s1 = scalar_lea.hbm %s9566_s8, %s5929_s11  ;;  %s460_s13 = sshll.u32 %s452_s22, 4  ;;  %s461_s13 = int_to_ptr.vmem [resolvable:$true] %s460_s13 }
  0xac   : > { %s7102_s4 = scalar_lea.hbm %s7568_s1, 96  ;;  %p7108_p0 = scmp.lt.s32.totalorder %s7568_s1, %s9566_s8 }
  0xad   : > { %p7103_p7 = scmp.ne.s32.totalorder %s7568_s1, %s7102_s4  ;;  %p7109_p9 = scmp.lt.s32.totalorder %s7107_s0, %s7102_s4 }
  0xaf   : > { %p7105_p13 = pnand %p7103_p7, %p7489_p3  ;;  %p7110_p11 = por %p7109_p9, %p7108_p0 }
  0xb1   : > { %p7106_p10 = pneg %p7105_p13 }
  0xb3   : > { %p7111_p4 = pnand %p7110_p11, %p7106_p10 }
  0xb5   : > { %7114 = shalt.err (!%p7111_p4)
}
  0xb6   : > { %s7115_s16 = scalar_lea.vmem %s461_s13, 96  ;;  %s7250_s23 = smov [#allocation14]  }
  0xb7   : > { %p7116_p8 = scmp.ne.s32.totalorder %s461_s13, %s7115_s16  ;;  %s7120_s11 = sshll.u32 %s7250_s23, 4  ;;  %s7121_s11 = int_to_ptr.vmem [resolvable:$false] %s7120_s11 }
  0xb8   : > { %s7122_s10 = scalar_lea.vmem %s7121_s11, 192  ;;  %p7123_p5 = scmp.lt.s32.totalorder %s461_s13, %s7121_s11 }
  0xb9   : > { %p7118_p2 = pnand %p7116_p8, %p7489_p3  ;;  %p7124_p6 = scmp.lt.s32.totalorder %s7122_s10, %s7115_s16 }
  0xbb   : > { %p7119_p1 = pneg %p7118_p2  ;;  %p7125_p7 = por %p7124_p6, %p7123_p5 }
  0xbd   : > { %p7126_p13 = pnand %p7125_p7, %p7119_p1 }
  0xbf   : > { %7129 = shalt.err (!%p7126_p13)
}
  0xc0   : > { %5976 = dma.hbm_to_vmem [thread:$0]  (!%p7466_p12), %s7568_s1, 96, %s461_s13, %s7483_s5  }
  0xc1   : > { %s7591_s22 = scalar_lea.hbm %s9567_s9, %s5884_s12  ;;  %s471_s2 = scalar_lea.vmem [#allocation15], %s5454_s17 }
  0xc2   : > { %s479_s29 = sshll.u32 %s471_s2, 4  ;;  %s468_s0 = scalar_lea.sflag [#allocation16], %s7462_s3  ;;  %s480_s29 = int_to_ptr.vmem [resolvable:$true] %s479_s29 }
  0xc3   : > { %s7130_s28 = scalar_lea.hbm %s7591_s22, 32  ;;  %s7135_s1 = scalar_lea.hbm %s9567_s9, 128 }
  0xc4   : > { %p7131_p10 = scmp.ne.s32.totalorder %s7591_s22, %s7130_s28  ;;  %p7136_p11 = scmp.lt.s32.totalorder %s7591_s22, %s9567_s9 }
  0xc5   : > { %p7137_p4 = scmp.lt.s32.totalorder %s7135_s1, %s7130_s28 }
  0xc6   : > { %p7133_p0 = pnand %p7131_p10, %p7489_p3 }
  0xc7   : > { %p7138_p8 = por %p7137_p4, %p7136_p11 }
  0xc8   : > { %p7134_p9 = pneg %p7133_p0 }
  0xca   : > { %p7139_p2 = pnand %p7138_p8, %p7134_p9 }
  0xcc   : > { %7142 = shalt.err (!%p7139_p2)
}
  0xcd   : > { %s7143_s17 = scalar_lea.vmem %s480_s29, 32  ;;  %s7251_s3 = smov [#allocation15]  }
  0xce   : > { %p7144_p1 = scmp.ne.s32.totalorder %s480_s29, %s7143_s17  ;;  %s7148_s16 = sshll.u32 %s7251_s3, 4  ;;  %s7149_s16 = int_to_ptr.vmem [resolvable:$false] %s7148_s16 }
  0xcf   : > { %s7150_s23 = scalar_lea.vmem %s7149_s16, 64  ;;  %p7151_p7 = scmp.lt.s32.totalorder %s480_s29, %s7149_s16 }
  0xd0   : > { %p7146_p5 = pnand %p7144_p1, %p7489_p3  ;;  %p7152_p13 = scmp.lt.s32.totalorder %s7150_s23, %s7143_s17 }
  0xd2   : > { %p7147_p6 = pneg %p7146_p5  ;;  %p7153_p10 = por %p7152_p13, %p7151_p7 }
  0xd4   : > { %p7154_p0 = pnand %p7153_p10, %p7147_p6 }
  0xd6   : > { %7157 = shalt.err (!%p7154_p0)
}
  0xd7   : > { %5979 = dma.hbm_to_vmem [thread:$0]  (!%p7466_p12), %s7591_s22, 32, %s480_s29, %s468_s0  }
  0xd8   : > { %p9836_p9 = scmp.ne.s32.totalorder %s9814_s27, 0 }
  0xda   : > { %488 = sbr.rel (%p9836_p9) target bundleno = 3345 (0xd11), region = 60 }
  0xdf   : > { %p9837_p11 = scmp.eq.s32.totalorder %s7346_s24, 0 }
  0xe1   : > { %7187 = dma.done.wait (%p9837_p11), [#allocation5], 2048   ;;  %p9838_p3 = pmov %p9837_p11 }
  0xe3   : > { %7189 = vsyncadd (%p9838_p3), [#allocation5], 4294965248  ;;  %p9839_p4 = pmov %p9838_p3 }
  0xe4   : > { %p9840_p8 = pmov %p9838_p3 }
  0xe5   : > { %7191 = dma.done.wait (%p9839_p4), [#allocation7], 18464  }
  0xe6   : > { %7193 = vsyncadd (%p9840_p8), [#allocation7], 4294948832  ;;  %s502_s14 = sand.u32 1, %s7346_s24   ;;  %s504_s20 = sand.u32 1, %s7228_s21  }
  0xe7   : > { %s5930_s11 = smul.u32 768, %s504_s20  ;;  %s503_s27 = scalar_lea.sflag [#allocation10], %s502_s14 }
  0xe8   : > { %p9841_p12 = scmp.ne.s32.totalorder %s9812_s25, 0 }
  0xe9   : > { %s7624_s10 = scalar_lea.vmem [#allocation9], %s5930_s11 }
  0xea   : > { %7195 = dma.done.wait (%p9841_p12), %s503_s27, 12288  }
  0xeb   : > { %7197 = vsyncadd (%p9841_p12), %s503_s27, 4294955008  ;;  %s513_s4 = sand.u32 1, %s7216_s18   ;;  %p9842_p2 = scmp.ne.s32.totalorder %s9813_s26, 0 }
  0xec   : > { %s5461_s15 = sshll.u32 %s513_s4, 9 }
  0xed   : > { %s7631_s22 = scalar_lea.vmem [#allocation11], %s5461_s15 }
  0xee   : > { %7199 = dma.done.wait (%p9842_p2), %s503_s27, 8192  }
  0xef   : > { %7201 = vsyncadd (%p9842_p2), %s503_s27, 4294959104  ;;  %s5462_s2 = sshll.u32 %s513_s4, 8  ;;  %s521_s29 = scalar_lea.sflag [#allocation13], %s502_s14 }
  0xf0   : > { %s7637_s0 = scalar_lea.vmem [#allocation12], %s5462_s2 }
  0xf1   : > { %7203 = dma.done.wait (%p9842_p2), %s521_s29, 4192  }
  0xf2   : > { %7205 = vsyncadd (%p9842_p2), %s521_s29, 4294963104  ;;  %s5931_s25 = smul.u32 6, %s513_s4  ;;  %s5463_s28 = sshll.u32 %s513_s4, 1 }
  0xf3   : > { %s539_s5 = scalar_lea.sflag [#allocation16], %s513_s4  ;;  %s7645_s1 = scalar_lea.vmem [#allocation15], %s5463_s28 }
  0xf4   : > { %s7643_s30 = scalar_lea.vmem [#allocation14], %s5931_s25 }
  0xf5   : > { %7207 = dma.done.wait (%p9842_p2), %s539_s5, 32  }
  0xf6   : > { %7209 = vsyncadd (%p9842_p2), %s539_s5, 4294967264  ;;  %p604_p1 = scmp.lt.s32.totalorder %s7346_s24, 3  ;;  %s9843_s16 = sld [smem:[#allocation95_spill]] }
  0xf7   : > { %p9844_p5 = scmp.ne.s32.totalorder %s7346_s24, 0 }
  0xf8   : > { %s605_s13 = scalar_select %p604_p1, %s7346_s24, 3 }
  0xf9   : > { %613 = sbr.rel (%p9844_p5) target bundleno = 644 (0x284), region = 96  ;;  %s9845_s20 = sld [smem:[#allocation88_spill]] (!%p9844_p5) }
  0xfa   : > { %s5885_s12 = sshll.u32 %s605_s13, 4  ;;  %s9846_s4 = sld [smem:[#allocation91_spill]] (!%p9844_p5) }
  0xfb   : > { %s9847_s17 = sld [smem:[#allocation94_spill]] (!%p9844_p5) }
  0xfc   : > { %s7656_s23 = scalar_lea.vmem %s9843_s16, %s5885_s12 }
  0xfe   : > { %v6054_v0 = vld [vmem:[#allocation4 + $0x74] ss:$8 sps:$4 sm:$0xff]   ;;  %v7252_v2 = vmov 0   ;;  %v6058_v3 = vld [vmem:[#allocation4 + $0x70] ss:$8 sps:$4 sm:$0xff]  }
  0xff   : > { %v6056_v1 = vld [vmem:[#allocation8 + $0x154] ss:$24 sps:$4 sm:$0xff]   ;;  %755 = vmatprep.mubr.bf16.mxu0 %v7252_v2  ;;  %723 = vmatprep.subr.bf16.mxu0 %v6054_v0  ;;  %v6059_v4 = vld [vmem:[#allocation8 + $0x150] ss:$24 sps:$4 sm:$0xff]   ;;  %v6062_v6 = vld [vmem:[#allocation8 + $0x124] ss:$24 sps:$4 sm:$0xff]  }
 0x100   : > { %1742 = vmatprep.subr.bf16.mxu1 %v6056_v1  ;;  %v6060_v5 = vld [vmem:[#allocation4 + $0x64] ss:$8 sps:$4 sm:$0xff]   ;;  %724 = vmatpush1.bf16.msra.mxu0 %v6058_v3  ;;  %v6064_v7 = vld [vmem:[#allocation4 + $0x60] ss:$8 sps:$4 sm:$0xff]   ;;  %v6066_v9 = vld [vmem:[#allocation4 + $0x54] ss:$8 sps:$4 sm:$0xff]  }
 0x101   : > { %1743 = vmatpush1.bf16.msra.mxu1 %v6059_v4  ;;  %725 = vmatprep.subr.bf16.mxu0 %v6060_v5  ;;  %v6065_v8 = vld [vmem:[#allocation8 + $0x120] ss:$24 sps:$4 sm:$0xff]   ;;  %v6068_v10 = vld [vmem:[#allocation8 + $0xf4] ss:$24 sps:$4 sm:$0xff]   ;;  %v6071_v12 = vld [vmem:[#allocation8 + $0xf0] ss:$24 sps:$4 sm:$0xff]   ;;  %s9848_s3 = smov %s9847_s17 }
 0x102   : > { %1744 = vmatprep.subr.bf16.mxu1 %v6062_v6  ;;  %v6070_v11 = vld [vmem:[#allocation4 + $0x50] ss:$8 sps:$4 sm:$0xff]   ;;  %v6072_v13 = vld [vmem:[#allocation4 + $0x44] ss:$8 sps:$4 sm:$0xff]   ;;  %v6076_v15 = vld [vmem:[#allocation4 + $0x40] ss:$8 sps:$4 sm:$0xff]  }
 0x103   : > { %v6074_v14 = vld [vmem:[#allocation8 + $0xc4] ss:$24 sps:$4 sm:$0xff]   ;;  %v6077_v16 = vld [vmem:[#allocation8 + $0xc0] ss:$24 sps:$4 sm:$0xff]   ;;  %v6080_v18 = vld [vmem:[#allocation8 + $0x94] ss:$24 sps:$4 sm:$0xff]  }
 0x104   : > { %726 = vmatpush1.bf16.msra.mxu0 %v6064_v7  ;;  %v6078_v17 = vld [vmem:[#allocation4 + $0x34] ss:$8 sps:$4 sm:$0xff]   ;;  %v6082_v19 = vld [vmem:[#allocation4 + $0x30] ss:$8 sps:$4 sm:$0xff]   ;;  %v6084_v21 = vld [vmem:[#allocation4 + $0x24] ss:$8 sps:$4 sm:$0xff]  }
 0x105   : > { %1745 = vmatpush1.bf16.msra.mxu1 %v6065_v8  ;;  %727 = vmatprep.subr.bf16.mxu0 %v6066_v9  ;;  %v6083_v20 = vld [vmem:[#allocation8 + $0x90] ss:$24 sps:$4 sm:$0xff]   ;;  %v6086_v22 = vld [vmem:[#allocation8 + $0x64] ss:$24 sps:$4 sm:$0xff]   ;;  %v6089_v24 = vld [vmem:[#allocation8 + $0x60] ss:$24 sps:$4 sm:$0xff]  }
 0x106   : > { %1746 = vmatprep.subr.bf16.mxu1 %v6068_v10  ;;  %v6088_v23 = vld [vmem:[#allocation4 + $0x20] ss:$8 sps:$4 sm:$0xff]   ;;  %v6090_v25 = vld [vmem:[#allocation4 + $0x14] ss:$8 sps:$4 sm:$0xff]   ;;  %v6094_v27 = vld [vmem:[#allocation4 + $0x10] ss:$8 sps:$4 sm:$0xff]  }
 0x107   : > { %v6092_v26 = vld [vmem:[#allocation8 + $0x34] ss:$24 sps:$4 sm:$0xff]   ;;  %v6095_v28 = vld [vmem:[#allocation8 + $0x30] ss:$24 sps:$4 sm:$0xff]   ;;  %v6098_v30 = vld [vmem:[#allocation8 + $0x4] ss:$24 sps:$4 sm:$0xff]  }
 0x108   : > { %728 = vmatpush1.bf16.msra.mxu0 %v6070_v11  ;;  %v6096_v29 = vld [vmem:[#allocation4 + $0x4] ss:$8 sps:$4 sm:$0xff]   ;;  %v6100_v31 = vld [vmem:[#allocation4] ss:$8 sps:$4 sm:$0xff]   ;;  %v6154_v8 = vld [vmem:[#allocation8 + $0x158] ss:$24 sps:$4 sm:$0xff]  }
 0x109   : > { %1747 = vmatpush1.bf16.msra.mxu1 %v6071_v12  ;;  %729 = vmatprep.subr.bf16.mxu0 %v6072_v13  ;;  %v6101_v32 = vld [vmem:[#allocation8] ss:$24 sps:$4 sm:$0xff]   ;;  %v6102_v33 = vld [vmem:[#allocation8 + $0x2d4] ss:$24 sps:$4 sm:$0xff]   ;;  %v6104_v36 = vld [vmem:[#allocation8 + $0x450] ss:$24 sps:$4 sm:$0xff]  }
 0x10a   : > { %1748 = vmatprep.subr.bf16.mxu1 %v6074_v14  ;;  %v6106_v34 = vld [vmem:[#allocation8 + $0x454] ss:$24 sps:$4 sm:$0xff]   ;;  %v614_v35 = vld [vmem:[%s9845_s20] sm:$0xf]  ;;  %v6107_v37 = vld [vmem:[#allocation8 + $0x2d0] ss:$24 sps:$4 sm:$0xff]  }
 0x10b   : > { %v6108_v38 = vld [vmem:[#allocation8 + $0x2a4] ss:$24 sps:$4 sm:$0xff]   ;;  %v6110_v40 = vld [vmem:[#allocation8 + $0x420] ss:$24 sps:$4 sm:$0xff]   ;;  %v6114_v42 = vld [vmem:[#allocation8 + $0x274] ss:$24 sps:$4 sm:$0xff]  }
 0x10c   : > { %730 = vmatpush1.bf16.msra.mxu0 %v6076_v15  ;;  %v6112_v39 = vld [vmem:[#allocation8 + $0x424] ss:$24 sps:$4 sm:$0xff]   ;;  %v6113_v41 = vld [vmem:[#allocation8 + $0x2a0] ss:$24 sps:$4 sm:$0xff]   ;;  %v6118_v43 = vld [vmem:[#allocation8 + $0x3f4] ss:$24 sps:$4 sm:$0xff]  }
 0x10d   : > { %1749 = vmatpush1.bf16.msra.mxu1 %v6077_v16  ;;  %731 = vmatprep.subr.bf16.mxu0 %v6078_v17  ;;  %v6116_v44 = vld [vmem:[#allocation8 + $0x3f0] ss:$24 sps:$4 sm:$0xff]   ;;  %v6120_v46 = vld [vmem:[#allocation8 + $0x244] ss:$24 sps:$4 sm:$0xff]   ;;  %v6122_v48 = vld [vmem:[#allocation8 + $0x3c0] ss:$24 sps:$4 sm:$0xff]  }
 0x10e   : > { %1750 = vmatprep.subr.bf16.mxu1 %v6080_v18  ;;  %v6119_v45 = vld [vmem:[#allocation8 + $0x270] ss:$24 sps:$4 sm:$0xff]   ;;  %v6124_v47 = vld [vmem:[#allocation8 + $0x3c4] ss:$24 sps:$4 sm:$0xff]   ;;  %v6125_v49 = vld [vmem:[#allocation8 + $0x240] ss:$24 sps:$4 sm:$0xff]  }
 0x10f   : > { %v7668_v50 = vld [vmem:[%s9846_s4 + $0x4] ss:$12 sps:$4 sm:$0xff]   ;;  %v6156_v4 = vld [vmem:[#allocation8 + $0x15c] ss:$24 sps:$4 sm:$0xff]  }
 0x110   : > { %732 = vmatpush1.bf16.msra.mxu0 %v6082_v19  ;;  %v6126_v51 = vld [vmem:[#allocation8 + $0x214] ss:$24 sps:$4 sm:$0xff]   ;;  %1774 = vmatprep.mubr.bf16.mxu1 %v7668_v50  ;;  %v6128_v53 = vld [vmem:[#allocation8 + $0x390] ss:$24 sps:$4 sm:$0xff]   ;;  %v6132_v55 = vld [vmem:[#allocation8 + $0x1e4] ss:$24 sps:$4 sm:$0xff]  }
 0x111   : > { %1751 = vmatpush1.bf16.msra.mxu1 %v6083_v20  ;;  %733 = vmatprep.subr.bf16.mxu0 %v6084_v21  ;;  %v6130_v52 = vld [vmem:[#allocation8 + $0x394] ss:$24 sps:$4 sm:$0xff]   ;;  %v6131_v54 = vld [vmem:[#allocation8 + $0x210] ss:$24 sps:$4 sm:$0xff]   ;;  %v6136_v56 = vld [vmem:[#allocation8 + $0x364] ss:$24 sps:$4 sm:$0xff]  }
 0x112   : > { %1752 = vmatprep.subr.bf16.mxu1 %v6086_v22  ;;  %v6134_v57 = vld [vmem:[#allocation8 + $0x360] ss:$24 sps:$4 sm:$0xff]   ;;  %v6138_v59 = vld [vmem:[#allocation8 + $0x1b4] ss:$24 sps:$4 sm:$0xff]   ;;  %v6140_v61 = vld [vmem:[#allocation8 + $0x330] ss:$24 sps:$4 sm:$0xff]  }
 0x113   : > { %v6137_v58 = vld [vmem:[#allocation8 + $0x1e0] ss:$24 sps:$4 sm:$0xff]   ;;  %v6142_v60 = vld [vmem:[#allocation8 + $0x334] ss:$24 sps:$4 sm:$0xff]   ;;  %v6143_v62 = vld [vmem:[#allocation8 + $0x1b0] ss:$24 sps:$4 sm:$0xff]  }
 0x114   : > { %734 = vmatpush1.bf16.msra.mxu0 %v6088_v23  ;;  %v6144_v63 = vld [vmem:[#allocation8 + $0x184] ss:$24 sps:$4 sm:$0xff]   ;;  %v6146_v1 = vld [vmem:[#allocation8 + $0x300] ss:$24 sps:$4 sm:$0xff]  }
 0x115   : > { %1753 = vmatpush1.bf16.msra.mxu1 %v6089_v24  ;;  %735 = vmatprep.subr.bf16.mxu0 %v6090_v25  ;;  %v6148_v0 = vld [vmem:[#allocation8 + $0x304] ss:$24 sps:$4 sm:$0xff]   ;;  %v6149_v3 = vld [vmem:[#allocation8 + $0x180] ss:$24 sps:$4 sm:$0xff]  }
 0x116   : > { %1754 = vmatprep.subr.bf16.mxu1 %v6092_v26  ;;  %v6159_v5 = vld [vmem:[#allocation8 + $0x45c] ss:$24 sps:$4 sm:$0xff]   ;;  %v6157_v9 = vld [vmem:[#allocation8 + $0x458] ss:$24 sps:$4 sm:$0xff]   ;;  %v6162_v10 = vld [vmem:[#allocation8 + $0x12c] ss:$24 sps:$4 sm:$0xff]  }
 0x117   : > { %v7674_v6 = vld [vmem:[%s9846_s4] ss:$12 sps:$4 sm:$0xff]   ;;  %v7679_v7 = vld [vmem:[%s9846_s4 + $0x8] ss:$12 sps:$4 sm:$0xff]   ;;  %v7691_v15 = vld [vmem:[%s9846_s4 + $0x18] ss:$12 sps:$4 sm:$0xff]  }
 0x118   : > { %736 = vmatpush1.bf16.msra.mxu0 %v6094_v27  ;;  %v6165_v11 = vld [vmem:[#allocation8 + $0x42c] ss:$24 sps:$4 sm:$0xff]   ;;  %v6160_v13 = vld [vmem:[#allocation8 + $0x128] ss:$24 sps:$4 sm:$0xff]   ;;  %v6171_v16 = vld [vmem:[#allocation8 + $0xfc] ss:$24 sps:$4 sm:$0xff]  }
 0x119   : > { %1755 = vmatpush1.bf16.msra.mxu1 %v6095_v28  ;;  %737 = vmatprep.subr.bf16.mxu0 %v6096_v29  ;;  %v7684_v12 = vld [vmem:[%s9846_s4 + $0x1c] ss:$12 sps:$4 sm:$0xff]   ;;  %v7698_v19 = vld [vmem:[%s9846_s4 + $0x20] ss:$12 sps:$4 sm:$0xff]  }
 0x11a   : > { %1756 = vmatprep.subr.bf16.mxu1 %v6098_v30  ;;  %v6163_v14 = vld [vmem:[#allocation8 + $0x428] ss:$24 sps:$4 sm:$0xff]   ;;  %v6174_v17 = vld [vmem:[#allocation8 + $0x3fc] ss:$24 sps:$4 sm:$0xff]   ;;  %v6169_v18 = vld [vmem:[#allocation8 + $0xf8] ss:$24 sps:$4 sm:$0xff]  }
 0x11b   : > { %v6172_v20 = vld [vmem:[#allocation8 + $0x3f8] ss:$24 sps:$4 sm:$0xff]   ;;  %v6178_v21 = vld [vmem:[#allocation8 + $0xcc] ss:$24 sps:$4 sm:$0xff]   ;;  %v6176_v24 = vld [vmem:[#allocation8 + $0xc8] ss:$24 sps:$4 sm:$0xff]  }
 0x11c   : > { %738 = vmatpush1.bf16.msra.mxu0 %v6100_v31  ;;  %v6181_v22 = vld [vmem:[#allocation8 + $0x3cc] ss:$24 sps:$4 sm:$0xff]   ;;  %v7703_v23 = vld [vmem:[%s9846_s4 + $0x34] ss:$12 sps:$4 sm:$0xff]  }
 0x11d   : > { %1757 = vmatpush1.bf16.msra.mxu1 %v6101_v32  ;;  %1815 = vmatprep.subr.bf16.mxu0 %v6106_v34  ;;  %v6179_v25 = vld [vmem:[#allocation8 + $0x3c8] ss:$24 sps:$4 sm:$0xff]   ;;  %v6187_v26 = vld [vmem:[#allocation8 + $0x9c] ss:$24 sps:$4 sm:$0xff]   ;;  %v6185_v29 = vld [vmem:[#allocation8 + $0x98] ss:$24 sps:$4 sm:$0xff]  }
 0x11e   : > { %1758 = vmatprep.subr.bf16.mxu1 %v6102_v33  ;;  %v6190_v27 = vld [vmem:[#allocation8 + $0x39c] ss:$24 sps:$4 sm:$0xff]   ;;  %v6188_v31 = vld [vmem:[#allocation8 + $0x398] ss:$24 sps:$4 sm:$0xff]   ;;  %v6194_v32 = vld [vmem:[#allocation8 + $0x6c] ss:$24 sps:$4 sm:$0xff]  }
 0x11f   : > { %756 = vmatmul.mubr.bf16.vlgmr.msra.gmra.mxu0 %v614_v35  ;;  %v7711_v28 = vld [vmem:[%s9846_s4 + $0x30] ss:$12 sps:$4 sm:$0xff]   ;;  %v7717_v30 = vld [vmem:[%s9846_s4 + $0x38] ss:$12 sps:$4 sm:$0xff]  }
 0x120   : > { %1816 = vmatpush1.bf16.msra.mxu0 %v6104_v36  ;;  %1847 = vmatprep.mubr.bf16.mxu0 %v7252_v2  ;;  %v6197_v33 = vld [vmem:[#allocation8 + $0x36c] ss:$24 sps:$4 sm:$0xff]   ;;  %v6192_v35 = vld [vmem:[#allocation8 + $0x68] ss:$24 sps:$4 sm:$0xff]  }
 0x121   : > { %1759 = vmatpush2.bf16.msra.mxu1 %v6107_v37  ;;  %1817 = vmatprep.subr.bf16.mxu0 %v6112_v39  ;;  %v7722_v34 = vld [vmem:[%s9846_s4 + $0x4c] ss:$12 sps:$4 sm:$0xff]   ;;  %v7730_v39 = vld [vmem:[%s9846_s4 + $0x48] ss:$12 sps:$4 sm:$0xff]  }
 0x122   : > { %1760 = vmatprep.subr.bf16.mxu1 %v6108_v38  ;;  %v6195_v36 = vld [vmem:[#allocation8 + $0x368] ss:$24 sps:$4 sm:$0xff]   ;;  %v6203_v37 = vld [vmem:[#allocation8 + $0x3c] ss:$24 sps:$4 sm:$0xff]  }
 0x123   : > { %v6206_v38 = vld [vmem:[#allocation8 + $0x33c] ss:$24 sps:$4 sm:$0xff]  }
 0x124   : > { %1818 = vmatpush1.bf16.msra.mxu0 %v6110_v40  ;;  %v6201_v40 = vld [vmem:[#allocation8 + $0x38] ss:$24 sps:$4 sm:$0xff]  }
 0x125   : > { %1761 = vmatpush2.bf16.msra.mxu1 %v6113_v41  ;;  %1819 = vmatprep.subr.bf16.mxu0 %v6118_v43  ;;  %v7736_v41 = vld [vmem:[%s9846_s4 + $0x50] ss:$12 sps:$4 sm:$0xff]  }
 0x126   : > { %1762 = vmatprep.subr.bf16.mxu1 %v6114_v42  ;;  %v6204_v42 = vld [vmem:[#allocation8 + $0x338] ss:$24 sps:$4 sm:$0xff]   ;;  %v6210_v43 = vld [vmem:[#allocation8 + $0xc] ss:$24 sps:$4 sm:$0xff]  }
 0x128   : > { %1820 = vmatpush1.bf16.msra.mxu0 %v6116_v44  ;;  %v6213_v44 = vld [vmem:[#allocation8 + $0x30c] ss:$24 sps:$4 sm:$0xff]  }
 0x129   : > { %1763 = vmatpush2.bf16.msra.mxu1 %v6119_v45  ;;  %1821 = vmatprep.subr.bf16.mxu0 %v6124_v47  ;;  %v6208_v45 = vld [vmem:[#allocation8 + $0x8] ss:$24 sps:$4 sm:$0xff]   ;;  %v6216_v47 = vld [vmem:[#allocation8 + $0x2dc] ss:$24 sps:$4 sm:$0xff]  }
 0x12a   : > { %1764 = vmatprep.subr.bf16.mxu1 %v6120_v46  ;;  %v6211_v46 = vld [vmem:[#allocation8 + $0x308] ss:$24 sps:$4 sm:$0xff]  }
 0x12c   : > { %1822 = vmatpush1.bf16.msra.mxu0 %v6122_v48  ;;  %v6219_v48 = vld [vmem:[#allocation8 + $0x164] ss:$24 sps:$4 sm:$0xff]  }
 0x12d   : > { %1765 = vmatpush2.bf16.msra.mxu1 %v6125_v49  ;;  %1823 = vmatprep.subr.bf16.mxu0 %v6130_v52  ;;  %v6214_v49 = vld [vmem:[#allocation8 + $0x2d8] ss:$24 sps:$4 sm:$0xff]   ;;  %v6222_v52 = vld [vmem:[#allocation8 + $0x2ac] ss:$24 sps:$4 sm:$0xff]  }
 0x12e   : > { %1766 = vmatprep.subr.bf16.mxu1 %v6126_v51  ;;  %v6217_v51 = vld [vmem:[#allocation8 + $0x160] ss:$24 sps:$4 sm:$0xff]  }
 0x130   : > { %1824 = vmatpush1.bf16.msra.mxu0 %v6128_v53  ;;  %v6225_v53 = vld [vmem:[#allocation8 + $0x134] ss:$24 sps:$4 sm:$0xff]  }
 0x131   : > { %1767 = vmatpush2.bf16.msra.mxu1 %v6131_v54  ;;  %1825 = vmatprep.subr.bf16.mxu0 %v6136_v56  ;;  %v6220_v54 = vld [vmem:[#allocation8 + $0x2a8] ss:$24 sps:$4 sm:$0xff]   ;;  %v6228_v56 = vld [vmem:[#allocation8 + $0x27c] ss:$24 sps:$4 sm:$0xff]  }
 0x132   : > { %1768 = vmatprep.subr.bf16.mxu1 %v6132_v55  ;;  %v6223_v55 = vld [vmem:[#allocation8 + $0x130] ss:$24 sps:$4 sm:$0xff]  }
 0x134   : > { %1826 = vmatpush1.bf16.msra.mxu0 %v6134_v57  ;;  %v6231_v57 = vld [vmem:[#allocation8 + $0x104] ss:$24 sps:$4 sm:$0xff]  }
 0x135   : > { %1769 = vmatpush2.bf16.msra.mxu1 %v6137_v58  ;;  %1827 = vmatprep.subr.bf16.mxu0 %v6142_v60  ;;  %v6226_v58 = vld [vmem:[#allocation8 + $0x278] ss:$24 sps:$4 sm:$0xff]   ;;  %v6234_v60 = vld [vmem:[#allocation8 + $0x24c] ss:$24 sps:$4 sm:$0xff]  }
 0x136   : > { %1770 = vmatprep.subr.bf16.mxu1 %v6138_v59  ;;  %v6229_v59 = vld [vmem:[#allocation8 + $0x100] ss:$24 sps:$4 sm:$0xff]  }
 0x138   : > { %1828 = vmatpush1.bf16.msra.mxu0 %v6140_v61  ;;  %v6237_v61 = vld [vmem:[#allocation8 + $0xd4] ss:$24 sps:$4 sm:$0xff]  }
 0x139   : > { %1771 = vmatpush2.bf16.msra.mxu1 %v6143_v62  ;;  %1829 = vmatprep.subr.bf16.mxu0 %v6148_v0  ;;  %v6232_v62 = vld [vmem:[#allocation8 + $0x248] ss:$24 sps:$4 sm:$0xff]   ;;  %v6240_v0 = vld [vmem:[#allocation8 + $0x21c] ss:$24 sps:$4 sm:$0xff]  }
 0x13a   : > { %1772 = vmatprep.subr.bf16.mxu1 %v6144_v63  ;;  %v6235_v63 = vld [vmem:[#allocation8 + $0xd0] ss:$24 sps:$4 sm:$0xff]  }
 0x13c   : > { %1830 = vmatpush1.bf16.msra.mxu0 %v6146_v1  ;;  %v6243_v1 = vld [vmem:[#allocation8 + $0xa4] ss:$24 sps:$4 sm:$0xff]  }
 0x13d   : > { %1773 = vmatpush2.bf16.msra.mxu1 %v6149_v3  ;;  %1888 = vmatprep.subr.bf16.mxu0 %v6156_v4  ;;  %v6238_v3 = vld [vmem:[#allocation8 + $0x218] ss:$24 sps:$4 sm:$0xff]  }
 0x13e   : > { %1961 = vmatprep.subr.bf16.mxu1 %v6159_v5  ;;  %v6241_v4 = vld [vmem:[#allocation8 + $0xa0] ss:$24 sps:$4 sm:$0xff]   ;;  %v6246_v5 = vld [vmem:[#allocation8 + $0x1ec] ss:$24 sps:$4 sm:$0xff]  }
 0x13f   : > { %1848 = vmatmul.mubr.bf16.vlgmr.msra.gmra.mxu0 %v7679_v7 }
 0x140   : > { %1775 = vmatmul.mubr.bf16.vlgmr.msra.gmra.mxu1 %v7674_v6  ;;  %1889 = vmatpush1.bf16.msra.mxu0 %v6154_v8  ;;  %v6249_v8 = vld [vmem:[#allocation8 + $0x74] ss:$24 sps:$4 sm:$0xff]  }
 0x141   : > { %1962 = vmatpush1.bf16.msra.mxu1 %v6157_v9  ;;  %1890 = vmatprep.subr.bf16.mxu0 %v6162_v10  ;;  %v6244_v9 = vld [vmem:[#allocation8 + $0x1e8] ss:$24 sps:$4 sm:$0xff]  }
 0x142   : > { %1963 = vmatprep.subr.bf16.mxu1 %v6165_v11  ;;  %1784 = vmatprep.mubr.bf16.mxu1 %v7684_v12  ;;  %v6247_v10 = vld [vmem:[#allocation8 + $0x70] ss:$24 sps:$4 sm:$0xff]   ;;  %v6252_v11 = vld [vmem:[#allocation8 + $0x1bc] ss:$24 sps:$4 sm:$0xff]  }
 0x143   : > { %1857 = vmatprep.mubr.bf16.mxu0 %v7252_v2 }
 0x144   : > { %1891 = vmatpush1.bf16.msra.mxu0 %v6160_v13  ;;  %v6255_v13 = vld [vmem:[#allocation8 + $0x44] ss:$24 sps:$4 sm:$0xff]  }
 0x145   : > { %1964 = vmatpush1.bf16.msra.mxu1 %v6163_v14  ;;  %1892 = vmatprep.subr.bf16.mxu0 %v6171_v16  ;;  %v6250_v14 = vld [vmem:[#allocation8 + $0x1b8] ss:$24 sps:$4 sm:$0xff]  }
 0x146   : > { %1965 = vmatprep.subr.bf16.mxu1 %v6174_v17  ;;  %v6253_v16 = vld [vmem:[#allocation8 + $0x40] ss:$24 sps:$4 sm:$0xff]   ;;  %v6258_v17 = vld [vmem:[#allocation8 + $0x18c] ss:$24 sps:$4 sm:$0xff]  }
 0x147   : > { %1858 = vmatmul.mubr.bf16.gmra.mxu0 %v7698_v19 }
 0x148   : > { %1785 = vmatmul.mubr.bf16.gmra.mxu1 %v7691_v15  ;;  %1893 = vmatpush1.bf16.msra.mxu0 %v6169_v18  ;;  %v6261_v18 = vld [vmem:[#allocation8 + $0x14] ss:$24 sps:$4 sm:$0xff]  }
 0x149   : > { %1966 = vmatpush1.bf16.msra.mxu1 %v6172_v20  ;;  %1894 = vmatprep.subr.bf16.mxu0 %v6178_v21  ;;  %v6256_v20 = vld [vmem:[#allocation8 + $0x188] ss:$24 sps:$4 sm:$0xff]  }
 0x14a   : > { %1967 = vmatprep.subr.bf16.mxu1 %v6181_v22  ;;  %1794 = vmatprep.mubr.bf16.mxu1 %v7703_v23  ;;  %v6259_v21 = vld [vmem:[#allocation8 + $0x10] ss:$24 sps:$4 sm:$0xff]   ;;  %v6264_v22 = vld [vmem:[#allocation8 + $0x2e4] ss:$24 sps:$4 sm:$0xff]  }
 0x14b   : > { %1867 = vmatprep.mubr.bf16.mxu0 %v7252_v2 }
 0x14c   : > { %1895 = vmatpush1.bf16.msra.mxu0 %v6176_v24  ;;  %v6267_v24 = vld [vmem:[#allocation8 + $0x464] ss:$24 sps:$4 sm:$0xff]  }
 0x14d   : > { %1968 = vmatpush1.bf16.msra.mxu1 %v6179_v25  ;;  %1896 = vmatprep.subr.bf16.mxu0 %v6187_v26  ;;  %v6262_v25 = vld [vmem:[#allocation8 + $0x2e0] ss:$24 sps:$4 sm:$0xff]  }
 0x14e   : > { %1969 = vmatprep.subr.bf16.mxu1 %v6190_v27  ;;  %v6265_v26 = vld [vmem:[#allocation8 + $0x460] ss:$24 sps:$4 sm:$0xff]   ;;  %v6270_v27 = vld [vmem:[#allocation8 + $0x2b4] ss:$24 sps:$4 sm:$0xff]  }
 0x14f   : > { %1868 = vmatmul.mubr.bf16.gmra.mxu0 %v7717_v30 }
 0x150   : > { %1795 = vmatmul.mubr.bf16.gmra.mxu1 %v7711_v28  ;;  %1897 = vmatpush1.bf16.msra.mxu0 %v6185_v29  ;;  %v6273_v29 = vld [vmem:[#allocation8 + $0x434] ss:$24 sps:$4 sm:$0xff]  }
 0x151   : > { %1970 = vmatpush1.bf16.msra.mxu1 %v6188_v31  ;;  %1898 = vmatprep.subr.bf16.mxu0 %v6194_v32  ;;  %v6268_v31 = vld [vmem:[#allocation8 + $0x2b0] ss:$24 sps:$4 sm:$0xff]  }
 0x152   : > { %1971 = vmatprep.subr.bf16.mxu1 %v6197_v33  ;;  %1804 = vmatprep.mubr.bf16.mxu1 %v7722_v34  ;;  %v6271_v32 = vld [vmem:[#allocation8 + $0x430] ss:$24 sps:$4 sm:$0xff]   ;;  %v6276_v33 = vld [vmem:[#allocation8 + $0x284] ss:$24 sps:$4 sm:$0xff]  }
 0x153   : > { %1877 = vmatprep.mubr.bf16.mxu0 %v7252_v2 }
 0x154   : > { %1899 = vmatpush1.bf16.msra.mxu0 %v6192_v35  ;;  %v6279_v35 = vld [vmem:[#allocation8 + $0x404] ss:$24 sps:$4 sm:$0xff]  }
 0x155   : > { %1972 = vmatpush1.bf16.msra.mxu1 %v6195_v36  ;;  %1900 = vmatprep.subr.bf16.mxu0 %v6203_v37  ;;  %v6277_v36 = vld [vmem:[#allocation8 + $0x400] ss:$24 sps:$4 sm:$0xff]   ;;  %v6282_v37 = vld [vmem:[#allocation8 + $0x254] ss:$24 sps:$4 sm:$0xff]  }
 0x156   : > { %1973 = vmatprep.subr.bf16.mxu1 %v6206_v38  ;;  %v6285_v38 = vld [vmem:[#allocation8 + $0x3d4] ss:$24 sps:$4 sm:$0xff]  }
 0x157   : > { %1878 = vmatmul.mubr.bf16.gmra.mxu0 %v7736_v41 }
 0x158   : > { %1805 = vmatmul.mubr.bf16.gmra.mxu1 %v7730_v39  ;;  %1901 = vmatpush1.bf16.msra.mxu0 %v6201_v40  ;;  %v6280_v40 = vld [vmem:[#allocation8 + $0x250] ss:$24 sps:$4 sm:$0xff]  }
 0x159   : > { %1974 = vmatpush1.bf16.msra.mxu1 %v6204_v42  ;;  %1902 = vmatprep.subr.bf16.mxu0 %v6210_v43  ;;  %v6283_v42 = vld [vmem:[#allocation8 + $0x3d0] ss:$24 sps:$4 sm:$0xff]   ;;  %v6288_v43 = vld [vmem:[#allocation8 + $0x224] ss:$24 sps:$4 sm:$0xff]  }
 0x15a   : > { %1975 = vmatprep.subr.bf16.mxu1 %v6213_v44  ;;  %1993 = vmatprep.mubr.bf16.mxu1 %v7252_v2  ;;  %v6291_v44 = vld [vmem:[#allocation8 + $0x3a4] ss:$24 sps:$4 sm:$0xff]  }
 0x15b   : > { %1920 = vmatprep.mubr.bf16.mxu0 %v7668_v50 }
 0x15c   : > { %1903 = vmatpush1.bf16.msra.mxu0 %v6208_v45  ;;  %v6286_v45 = vld [vmem:[#allocation8 + $0x220] ss:$24 sps:$4 sm:$0xff]  }
 0x15d   : > { %1976 = vmatpush1.bf16.msra.mxu1 %v6211_v46  ;;  %1904 = vmatprep.subr.bf16.mxu0 %v6216_v47  ;;  %v6289_v46 = vld [vmem:[#allocation8 + $0x3a0] ss:$24 sps:$4 sm:$0xff]   ;;  %v6294_v47 = vld [vmem:[#allocation8 + $0x1f4] ss:$24 sps:$4 sm:$0xff]  }
 0x15e   : > { %2034 = vmatprep.subr.bf16.mxu1 %v6219_v48  ;;  %v6297_v48 = vld [vmem:[#allocation8 + $0x374] ss:$24 sps:$4 sm:$0xff]  }
 0x160   : > { %1994 = vmatmul.mubr.bf16.vlgmr.msra.gmra.mxu1 %v7679_v7  ;;  %1905 = vmatpush2.bf16.msra.mxu0 %v6214_v49  ;;  %v6292_v49 = vld [vmem:[#allocation8 + $0x1f0] ss:$24 sps:$4 sm:$0xff]  }
 0x161   : > { %2035 = vmatpush1.bf16.msra.mxu1 %v6217_v51  ;;  %1906 = vmatprep.subr.bf16.mxu0 %v6222_v52  ;;  %v6295_v51 = vld [vmem:[#allocation8 + $0x370] ss:$24 sps:$4 sm:$0xff]   ;;  %v6300_v52 = vld [vmem:[#allocation8 + $0x1c4] ss:$24 sps:$4 sm:$0xff]  }
 0x162   : > { %2036 = vmatprep.subr.bf16.mxu1 %v6225_v53  ;;  %2003 = vmatprep.mubr.bf16.mxu1 %v7252_v2  ;;  %v6303_v53 = vld [vmem:[#allocation8 + $0x344] ss:$24 sps:$4 sm:$0xff]  }
 0x164   : > { %1907 = vmatpush2.bf16.msra.mxu0 %v6220_v54  ;;  %v6298_v54 = vld [vmem:[#allocation8 + $0x1c0] ss:$24 sps:$4 sm:$0xff]  }
 0x165   : > { %2037 = vmatpush1.bf16.msra.mxu1 %v6223_v55  ;;  %1908 = vmatprep.subr.bf16.mxu0 %v6228_v56  ;;  %v6301_v55 = vld [vmem:[#allocation8 + $0x340] ss:$24 sps:$4 sm:$0xff]   ;;  %v6306_v56 = vld [vmem:[#allocation8 + $0x194] ss:$24 sps:$4 sm:$0xff]  }
 0x166   : > { %2038 = vmatprep.subr.bf16.mxu1 %v6231_v57  ;;  %v6309_v57 = vld [vmem:[#allocation8 + $0x314] ss:$24 sps:$4 sm:$0xff]  }
 0x168   : > { %2004 = vmatmul.mubr.bf16.gmra.mxu1 %v7698_v19  ;;  %1909 = vmatpush2.bf16.msra.mxu0 %v6226_v58  ;;  %v6304_v58 = vld [vmem:[#allocation8 + $0x190] ss:$24 sps:$4 sm:$0xff]  }
 0x169   : > { %2039 = vmatpush1.bf16.msra.mxu1 %v6229_v59  ;;  %1910 = vmatprep.subr.bf16.mxu0 %v6234_v60  ;;  %v6307_v59 = vld [vmem:[#allocation8 + $0x310] ss:$24 sps:$4 sm:$0xff]  }
 0x16a   : > { %2040 = vmatprep.subr.bf16.mxu1 %v6237_v61  ;;  %2013 = vmatprep.mubr.bf16.mxu1 %v7252_v2  ;;  %v7783_v61 = vld [vmem:[%s7643_s30] sm:$0x3f] }
 0x16c   : > { %1911 = vmatpush2.bf16.msra.mxu0 %v6232_v62 }
 0x16d   : > { %2041 = vmatpush1.bf16.msra.mxu1 %v6235_v63  ;;  %1912 = vmatprep.subr.bf16.mxu0 %v6240_v0 }
 0x16e   : > { %2042 = vmatprep.subr.bf16.mxu1 %v6243_v1 }
 0x170   : > { %2014 = vmatmul.mubr.bf16.gmra.mxu1 %v7717_v30  ;;  %1913 = vmatpush2.bf16.msra.mxu0 %v6238_v3 }
 0x171   : > { %2043 = vmatpush1.bf16.msra.mxu1 %v6241_v4  ;;  %1914 = vmatprep.subr.bf16.mxu0 %v6246_v5 }
 0x172   : > { %2044 = vmatprep.subr.bf16.mxu1 %v6249_v8  ;;  %2023 = vmatprep.mubr.bf16.mxu1 %v7252_v2 }
 0x174   : > { %1915 = vmatpush2.bf16.msra.mxu0 %v6244_v9 }
 0x175   : > { %2045 = vmatpush1.bf16.msra.mxu1 %v6247_v10  ;;  %1916 = vmatprep.subr.bf16.mxu0 %v6252_v11 }
 0x176   : > { %2046 = vmatprep.subr.bf16.mxu1 %v6255_v13 }
 0x178   : > { %2024 = vmatmul.mubr.bf16.gmra.mxu1 %v7736_v41  ;;  %1917 = vmatpush2.bf16.msra.mxu0 %v6250_v14 }
 0x179   : > { %2047 = vmatpush1.bf16.msra.mxu1 %v6253_v16  ;;  %1918 = vmatprep.subr.bf16.mxu0 %v6258_v17 }
 0x17a   : > { %2048 = vmatprep.subr.bf16.mxu1 %v6261_v18  ;;  %2066 = vmatprep.mubr.bf16.mxu1 %v7668_v50  ;;  %v6274_v50 = vld [vmem:[#allocation8 + $0x280] ss:$24 sps:$4 sm:$0xff]  }
 0x17c   : > { %1919 = vmatpush2.bf16.msra.mxu0 %v6256_v20 }
 0x17d   : > { %2049 = vmatpush1.bf16.msra.mxu1 %v6259_v21  ;;  %2107 = vmatprep.subr.bf16.mxu0 %v6267_v24 }
 0x17e   : > { %2050 = vmatprep.subr.bf16.mxu1 %v6264_v22 }
 0x17f   : > { %1921 = vmatmul.mubr.bf16.vlgmr.msra.gmra.mxu0 %v7674_v6 }
 0x180   : > { %2108 = vmatpush1.bf16.msra.mxu0 %v6265_v26  ;;  %1930 = vmatprep.mubr.bf16.mxu0 %v7684_v12 }
 0x181   : > { %2051 = vmatpush2.bf16.msra.mxu1 %v6262_v25  ;;  %2109 = vmatprep.subr.bf16.mxu0 %v6273_v29 }
 0x182   : > { %2052 = vmatprep.subr.bf16.mxu1 %v6270_v27 }
 0x184   : > { %2110 = vmatpush1.bf16.msra.mxu0 %v6271_v32 }
 0x185   : > { %2053 = vmatpush2.bf16.msra.mxu1 %v6268_v31  ;;  %2111 = vmatprep.subr.bf16.mxu0 %v6279_v35 }
 0x186   : > { %2054 = vmatprep.subr.bf16.mxu1 %v6276_v33 }
 0x187   : > { %1931 = vmatmul.mubr.bf16.gmra.mxu0 %v7691_v15 }
 0x188   : > { %2112 = vmatpush1.bf16.msra.mxu0 %v6277_v36  ;;  %1940 = vmatprep.mubr.bf16.mxu0 %v7703_v23 }
 0x189   : > { %2055 = vmatpush2.bf16.msra.mxu1 %v6274_v50  ;;  %2113 = vmatprep.subr.bf16.mxu0 %v6285_v38 }
 0x18a   : > { %2056 = vmatprep.subr.bf16.mxu1 %v6282_v37 }
 0x18c   : > { %2114 = vmatpush1.bf16.msra.mxu0 %v6283_v42 }
 0x18d   : > { %2057 = vmatpush2.bf16.msra.mxu1 %v6280_v40  ;;  %2115 = vmatprep.subr.bf16.mxu0 %v6291_v44 }
 0x18e   : > { %2058 = vmatprep.subr.bf16.mxu1 %v6288_v43 }
 0x18f   : > { %1941 = vmatmul.mubr.bf16.gmra.mxu0 %v7711_v28 }
 0x190   : > { %2116 = vmatpush1.bf16.msra.mxu0 %v6289_v46  ;;  %1950 = vmatprep.mubr.bf16.mxu0 %v7722_v34 }
 0x191   : > { %2059 = vmatpush2.bf16.msra.mxu1 %v6286_v45  ;;  %2117 = vmatprep.subr.bf16.mxu0 %v6297_v48 }
 0x192   : > { %2060 = vmatprep.subr.bf16.mxu1 %v6294_v47 }
 0x194   : > { %2118 = vmatpush1.bf16.msra.mxu0 %v6295_v51 }
 0x195   : > { %2061 = vmatpush2.bf16.msra.mxu1 %v6292_v49  ;;  %2119 = vmatprep.subr.bf16.mxu0 %v6303_v53 }
 0x196   : > { %2062 = vmatprep.subr.bf16.mxu1 %v6300_v52 }
 0x197   : > { %1951 = vmatmul.mubr.bf16.gmra.mxu0 %v7730_v39 }
 0x198   : > { %2120 = vmatpush1.bf16.msra.mxu0 %v6301_v55  ;;  %2139 = vmatprep.mubr.bf16.mxu0 %v7252_v2 }
 0x199   : > { %2063 = vmatpush2.bf16.msra.mxu1 %v6298_v54  ;;  %2121 = vmatprep.subr.bf16.mxu0 %v6309_v57 }
 0x19a   : > { %2064 = vmatprep.subr.bf16.mxu1 %v6306_v56 }
 0x19c   : > { %2122 = vmatpush1.bf16.msra.mxu0 %v6307_v59 }
 0x19d   : > { %2065 = vmatpush2.bf16.msra.mxu1 %v6304_v58 }
 0x19f   : > { %2140 = vmatmul.mubr.bf16.vlgmr.msra.gmra.mxu0 %v7679_v7 }
 0x1a0   : > { %2067 = vmatmul.mubr.bf16.vlgmr.msra.gmra.mxu1 %v7674_v6  ;;  %2149 = vmatprep.mubr.bf16.mxu0 %v7252_v2  ;;  %v633_v6 = vlaneseq }
 0x1a1   : > { %2076 = vmatprep.mubr.bf16.mxu1 %v7684_v12 }
 0x1a2   : > { %v7772_v7 = vshrl.u32 %v633_v6, 7 }
 0x1a4   : > { %v635_v12 = vsub.s32 0, %v7772_v7 }
 0x1a6   : > { %v7786_v62 = vrot.slane %v7783_v61, %v635_v12 }
 0x1a7   : > { %2150 = vmatmul.mubr.bf16.gmra.mxu0 %v7698_v19  ;;  %v639_v19 = vsub.s32 1, %v7772_v7 }
 0x1a8   : > { %2077 = vmatmul.mubr.bf16.gmra.mxu1 %v7691_v15  ;;  %2159 = vmatprep.mubr.bf16.mxu0 %v7252_v2  ;;  %v631_v15 = vld [vmem:[#allocation6] sm:$0x3] }
 0x1a9   : > { %2086 = vmatprep.mubr.bf16.mxu1 %v7703_v23  ;;  %v636_v23 = vrot.slane %v631_v15, %v635_v12  ;;  %v7789_v63 = vrot.slane %v7783_v61, %v639_v19 }
 0x1af   : > { %2160 = vmatmul.mubr.bf16.gmra.mxu0 %v7717_v30 }
 0x1b0   : > { %2087 = vmatmul.mubr.bf16.gmra.mxu1 %v7711_v28  ;;  %2169 = vmatprep.mubr.bf16.mxu0 %v7252_v2  ;;  %v640_v28 = vrot.slane %v631_v15, %v639_v19 }
 0x1b1   : > { %2096 = vmatprep.mubr.bf16.mxu1 %v7722_v34 }
 0x1b7   : > { %2170 = vmatmul.mubr.bf16.gmra.mxu0 %v7736_v41 }
 0x1b8   : > { %2097 = vmatmul.mubr.bf16.gmra.mxu1 %v7730_v39 }
 0x1df   : > { %v757_v30 = vpop.f32.mrf.mxu0 }
 0x1e0   : > { %v758_v60 = vadd.f32 %v757_v30, %v636_v23 }
 0x1e1   : > { %v759_v34 = vpop.f32.mrf.mxu0 }
 0x1e2   : > { %764 = vst [vmem:[%s9847_s17] sm:$0xff] %v758_v60  ;;  %v760_v2 = vadd.f32 %v759_v34, %v640_v28 }
 0x1e3   : > { %v761_v39 = vpop.f32.mrf.mxu0 }
 0x1e4   : > { %765 = vst [vmem:[%s9848_s3 + $0x8] sm:$0xff] %v760_v2 }
 0x1e5   : > { %v762_v41 = vpop.f32.mrf.mxu0 }
 0x1ff   : > { %v1849_v1 = vpop.f32.mrf.mxu0 }
 0x200   : > { %v1776_v0 = vpop.f32.mrf.mxu1 }
 0x201   : > { %v1777_v3 = vadd.f32 %v1776_v0, %v7786_v62  ;;  %v1851_v5 = vpop.f32.mrf.mxu0 }
 0x202   : > { %v1778_v4 = vpop.f32.mrf.mxu1 }
 0x203   : > { %v1850_v8 = vadd.f32 %v1849_v1, %v1777_v3  ;;  %v1779_v9 = vadd.f32 %v1778_v4, %v7789_v63  ;;  %v1853_v11 = vpop.f32.mrf.mxu0 }
 0x204   : > { %v1780_v10 = vpop.f32.mrf.mxu1 }
 0x205   : > { %2180 = vst [vmem:[#allocation2 + $0xb0] sm:$0xff] %v1850_v8  ;;  %v1852_v13 = vadd.f32 %v1851_v5, %v1779_v9  ;;  %v1781_v14 = vadd.f32 %v1780_v10, %v7786_v62  ;;  %v1855_v17 = vpop.f32.mrf.mxu0 }
 0x206   : > { %v1782_v16 = vpop.f32.mrf.mxu1 }
 0x207   : > { %2181 = vst [vmem:[#allocation2 + $0xd0] sm:$0xff] %v1852_v13  ;;  %v1854_v18 = vadd.f32 %v1853_v11, %v1781_v14  ;;  %v1783_v20 = vadd.f32 %v1782_v16, %v7789_v63  ;;  %v1859_v22 = vpop.f32.mrf.mxu0  ;;  %v938_v14 = vsub.s32 2, %v7772_v7 }
 0x208   : > { %v1786_v21 = vpop.f32.mrf.mxu1 }
 0x209   : > { %2186 = vst [vmem:[#allocation2 + $0x40] sm:$0xff] %v1854_v18  ;;  %v1856_v24 = vadd.f32 %v1855_v17, %v1783_v20  ;;  %v1787_v25 = vadd.f32 %v1786_v21, %v7786_v62  ;;  %v1861_v27 = vpop.f32.mrf.mxu0  ;;  %v7810_v17 = vrot.slane %v7783_v61, %v938_v14 }
 0x20a   : > { %v1788_v26 = vpop.f32.mrf.mxu1 }
 0x20b   : > { %2187 = vst [vmem:[#allocation2 + $0x178] sm:$0xff] %v1856_v24  ;;  %v1789_v29 = vadd.f32 %v1788_v26, %v7789_v63  ;;  %v1860_v31 = vadd.f32 %v1859_v22, %v1787_v25  ;;  %v1863_v33 = vpop.f32.mrf.mxu0 }
 0x20c   : > { %v1790_v32 = vpop.f32.mrf.mxu1 }
 0x20d   : > { %2192 = vst [vmem:[#allocation2 + $0x148] sm:$0xff] %v1860_v31  ;;  %v1791_v35 = vadd.f32 %v1790_v32, %v7786_v62  ;;  %v1862_v50 = vadd.f32 %v1861_v27, %v1789_v29  ;;  %v1865_v37 = vpop.f32.mrf.mxu0 }
 0x20e   : > { %v1792_v36 = vpop.f32.mrf.mxu1 }
 0x20f   : > { %2193 = vst [vmem:[#allocation2 + $0x100] sm:$0xff] %v1862_v50  ;;  %v1793_v38 = vadd.f32 %v1792_v36, %v7789_v63  ;;  %v1864_v40 = vadd.f32 %v1863_v33, %v1791_v35  ;;  %v1869_v43 = vpop.f32.mrf.mxu0 }
 0x210   : > { %v1796_v42 = vpop.f32.mrf.mxu1 }
 0x211   : > { %2198 = vst [vmem:[#allocation2 + $0x138] sm:$0xff] %v1864_v40  ;;  %v1797_v44 = vadd.f32 %v1796_v42, %v7786_v62  ;;  %v1866_v45 = vadd.f32 %v1865_v37, %v1793_v38  ;;  %v1871_v47 = vpop.f32.mrf.mxu0 }
 0x212   : > { %v1798_v46 = vpop.f32.mrf.mxu1 }
 0x213   : > { %2199 = vst [vmem:[#allocation2 + $0x120] sm:$0xff] %v1866_v45  ;;  %v1799_v48 = vadd.f32 %v1798_v46, %v7789_v63  ;;  %v1870_v49 = vadd.f32 %v1869_v43, %v1797_v44  ;;  %v1873_v52 = vpop.f32.mrf.mxu0 }
 0x214   : > { %v1800_v51 = vpop.f32.mrf.mxu1 }
 0x215   : > { %2204 = vst [vmem:[#allocation2 + $0xe8] sm:$0xff] %v1870_v49  ;;  %v1801_v53 = vadd.f32 %v1800_v51, %v7786_v62  ;;  %v1872_v54 = vadd.f32 %v1871_v47, %v1799_v48  ;;  %v1875_v56 = vpop.f32.mrf.mxu0 }
 0x216   : > { %v1802_v55 = vpop.f32.mrf.mxu1 }
 0x217   : > { %2205 = vst [vmem:[#allocation2 + $0xf8] sm:$0xff] %v1872_v54  ;;  %v1803_v57 = vadd.f32 %v1802_v55, %v7789_v63  ;;  %v1874_v58 = vadd.f32 %v1873_v52, %v1801_v53  ;;  %v1879_v6 = vpop.f32.mrf.mxu0 }
 0x218   : > { %v1806_v59 = vpop.f32.mrf.mxu1 }
 0x219   : > { %2210 = vst [vmem:[#allocation2 + $0xf0] sm:$0xff] %v1874_v58  ;;  %v1807_v12 = vadd.f32 %v1806_v59, %v7786_v62  ;;  %v1876_v15 = vadd.f32 %v1875_v56, %v1803_v57  ;;  %v1881_v23 = vpop.f32.mrf.mxu0 }
 0x21a   : > { %v1808_v19 = vpop.f32.mrf.mxu1 }
 0x21b   : > { %2211 = vst [vmem:[#allocation2 + $0x140] sm:$0xff] %v1876_v15  ;;  %v1809_v28 = vadd.f32 %v1808_v19, %v7789_v63  ;;  %v1880_v30 = vadd.f32 %v1879_v6, %v1807_v12  ;;  %v1883_v34 = vpop.f32.mrf.mxu0 }
 0x21c   : > { %v1810_v60 = vpop.f32.mrf.mxu1 }
 0x21d   : > { %2216 = vst [vmem:[#allocation2 + $0xc0] sm:$0xff] %v1880_v30  ;;  %v1811_v2 = vadd.f32 %v1810_v60, %v7786_v62  ;;  %v1882_v39 = vadd.f32 %v1881_v23, %v1809_v28  ;;  %v1885_v0 = vpop.f32.mrf.mxu0  ;;  %v942_v62 = vsub.s32 3, %v7772_v7 }
 0x21e   : > { %v1812_v41 = vpop.f32.mrf.mxu1 }
 0x21f   : > { %2217 = vst [vmem:[#allocation2 + $0x18] sm:$0xff] %v1882_v39  ;;  %v1813_v1 = vadd.f32 %v1812_v41, %v7789_v63  ;;  %v1884_v3 = vadd.f32 %v1883_v34, %v1811_v2  ;;  %v7813_v63 = vrot.slane %v7783_v61, %v942_v62  ;;  %v946_v39 = vsub.s32 4, %v7772_v7 }
 0x220   : > { %v1995_v5 = vpop.f32.mrf.mxu1 }
 0x221   : > { %2222 = vst [vmem:[#allocation2 + $0x50] sm:$0xff] %v1884_v3  ;;  %v1886_v4 = vadd.f32 %v1885_v0, %v1813_v1 }
 0x222   : > { %v1997_v8 = vpop.f32.mrf.mxu1 }
 0x223   : > { %2223 = vst [vmem:[#allocation2 + $0x68] sm:$0xff] %v1886_v4  ;;  %v950_v4 = vsub.s32 5, %v7772_v7 }
 0x224   : > { %v1999_v9 = vpop.f32.mrf.mxu1 }
 0x225   : > { %v7837_v62 = vrot.slane %v7783_v61, %v950_v4 }
 0x226   : > { %v2001_v10 = vpop.f32.mrf.mxu1 }
 0x228   : > { %v2005_v11 = vpop.f32.mrf.mxu1 }
 0x22a   : > { %v2007_v13 = vpop.f32.mrf.mxu1 }
 0x22c   : > { %v2009_v16 = vpop.f32.mrf.mxu1 }
 0x22e   : > { %v2011_v18 = vpop.f32.mrf.mxu1 }
 0x230   : > { %v2015_v24 = vpop.f32.mrf.mxu1 }
 0x232   : > { %v2017_v33 = vpop.f32.mrf.mxu1 }
 0x234   : > { %v2019_v42 = vpop.f32.mrf.mxu1 }
 0x236   : > { %v2021_v49 = vpop.f32.mrf.mxu1 }
 0x238   : > { %v2025_v57 = vpop.f32.mrf.mxu1 }
 0x23a   : > { %v2027_v19 = vpop.f32.mrf.mxu1 }
 0x23c   : > { %v2029_v41 = vpop.f32.mrf.mxu1 }
 0x23f   : > { %v1922_v20 = vpop.f32.mrf.mxu0 }
 0x240   : > { %v1923_v21 = vadd.f32 %v1922_v20, %v7810_v17 }
 0x241   : > { %v1924_v22 = vpop.f32.mrf.mxu0 }
 0x242   : > { %v1996_v25 = vadd.f32 %v1995_v5, %v1923_v21  ;;  %v1925_v26 = vadd.f32 %v1924_v22, %v7813_v63 }
 0x243   : > { %v1926_v27 = vpop.f32.mrf.mxu0 }
 0x244   : > { %2182 = vst [vmem:[#allocation2 + $0x10] sm:$0xff] %v1996_v25  ;;  %v1998_v29 = vadd.f32 %v1997_v8, %v1925_v26  ;;  %v1927_v31 = vadd.f32 %v1926_v27, %v7810_v17 }
 0x245   : > { %v1928_v32 = vpop.f32.mrf.mxu0 }
 0x246   : > { %2183 = vst [vmem:[#allocation2 + $0x48] sm:$0xff] %v1998_v29  ;;  %v2000_v35 = vadd.f32 %v1999_v9, %v1927_v31  ;;  %v1929_v50 = vadd.f32 %v1928_v32, %v7813_v63 }
 0x247   : > { %v1932_v36 = vpop.f32.mrf.mxu0 }
 0x248   : > { %2188 = vst [vmem:[#allocation2 + $0x108] sm:$0xff] %v2000_v35  ;;  %v2002_v37 = vadd.f32 %v2001_v10, %v1929_v50  ;;  %v1933_v38 = vadd.f32 %v1932_v36, %v7810_v17  ;;  %v7833_v10 = vrot.slane %v7783_v61, %v946_v39 }
 0x249   : > { %v1934_v40 = vpop.f32.mrf.mxu0 }
 0x24a   : > { %2189 = vst [vmem:[#allocation2 + $0x110] sm:$0xff] %v2002_v37  ;;  %v2006_v43 = vadd.f32 %v2005_v11, %v1933_v38  ;;  %v1935_v44 = vadd.f32 %v1934_v40, %v7813_v63  ;;  %v2031_v11 = vpop.f32.mrf.mxu1 }
 0x24b   : > { %v1936_v45 = vpop.f32.mrf.mxu0 }
 0x24c   : > { %2194 = vst [vmem:[#allocation2 + $0x58] sm:$0xff] %v2006_v43  ;;  %v2008_v46 = vadd.f32 %v2007_v13, %v1935_v44  ;;  %v1937_v47 = vadd.f32 %v1936_v45, %v7810_v17 }
 0x24d   : > { %v1938_v48 = vpop.f32.mrf.mxu0 }
 0x24e   : > { %2195 = vst [vmem:[#allocation2 + $0xd8] sm:$0xff] %v2008_v46  ;;  %v2010_v51 = vadd.f32 %v2009_v16, %v1937_v47  ;;  %v1939_v52 = vadd.f32 %v1938_v48, %v7813_v63 }
 0x24f   : > { %v1942_v53 = vpop.f32.mrf.mxu0 }
 0x250   : > { %2200 = vst [vmem:[#allocation2 + $0xe0] sm:$0xff] %v2010_v51  ;;  %v2012_v54 = vadd.f32 %v2011_v18, %v1939_v52  ;;  %v1943_v55 = vadd.f32 %v1942_v53, %v7810_v17 }
 0x251   : > { %v1944_v56 = vpop.f32.mrf.mxu0 }
 0x252   : > { %2201 = vst [vmem:[#allocation2 + $0xa8] sm:$0xff] %v2012_v54  ;;  %v2016_v58 = vadd.f32 %v2015_v24, %v1943_v55  ;;  %v1945_v59 = vadd.f32 %v1944_v56, %v7813_v63 }
 0x253   : > { %v1946_v6 = vpop.f32.mrf.mxu0 }
 0x254   : > { %2206 = vst [vmem:[#allocation2 + $0x20] sm:$0xff] %v2016_v58  ;;  %v2018_v12 = vadd.f32 %v2017_v33, %v1945_v59  ;;  %v1947_v15 = vadd.f32 %v1946_v6, %v7810_v17 }
 0x255   : > { %v1948_v23 = vpop.f32.mrf.mxu0 }
 0x256   : > { %2207 = vst [vmem:[#allocation2 + $0x88] sm:$0xff] %v2018_v12  ;;  %v2020_v28 = vadd.f32 %v2019_v42, %v1947_v15  ;;  %v1949_v30 = vadd.f32 %v1948_v23, %v7813_v63 }
 0x257   : > { %v1952_v60 = vpop.f32.mrf.mxu0 }
 0x258   : > { %2212 = vst [vmem:[#allocation2 + $0x60] sm:$0xff] %v2020_v28  ;;  %v2022_v34 = vadd.f32 %v2021_v49, %v1949_v30  ;;  %v1953_v2 = vadd.f32 %v1952_v60, %v7810_v17 }
 0x259   : > { %v1954_v0 = vpop.f32.mrf.mxu0 }
 0x25a   : > { %2213 = vst [vmem:[#allocation2 + $0xc8] sm:$0xff] %v2022_v34  ;;  %v2026_v1 = vadd.f32 %v2025_v57, %v1953_v2  ;;  %v1955_v3 = vadd.f32 %v1954_v0, %v7813_v63 }
 0x25b   : > { %v1956_v5 = vpop.f32.mrf.mxu0 }
 0x25c   : > { %2218 = vst [vmem:[#allocation2 + $0x98] sm:$0xff] %v2026_v1  ;;  %v2028_v8 = vadd.f32 %v2027_v19, %v1955_v3  ;;  %v1957_v9 = vadd.f32 %v1956_v5, %v7810_v17 }
 0x25d   : > { %v1958_v13 = vpop.f32.mrf.mxu0 }
 0x25e   : > { %2219 = vst [vmem:[#allocation2 + $0x8] sm:$0xff] %v2028_v8  ;;  %v2030_v14 = vadd.f32 %v2029_v41, %v1957_v9  ;;  %v1959_v16 = vadd.f32 %v1958_v13, %v7813_v63 }
 0x25f   : > { %v2141_v20 = vpop.f32.mrf.mxu0 }
 0x260   : > { %v2068_v18 = vpop.f32.mrf.mxu1  ;;  %2224 = vst [vmem:[#allocation2 + $0x70] sm:$0xff] %v2030_v14  ;;  %v2032_v7 = vadd.f32 %v2031_v11, %v1959_v16 }
 0x261   : > { %v2069_v21 = vadd.f32 %v2068_v18, %v7833_v10  ;;  %v2143_v17 = vpop.f32.mrf.mxu0 }
 0x262   : > { %v2070_v22 = vpop.f32.mrf.mxu1  ;;  %2225 = vst [vmem:[#allocation2 + $0x30] sm:$0xff] %v2032_v7 }
 0x263   : > { %v2142_v24 = vadd.f32 %v2141_v20, %v2069_v21  ;;  %v2071_v25 = vadd.f32 %v2070_v22, %v7837_v62  ;;  %v2145_v27 = vpop.f32.mrf.mxu0 }
 0x264   : > { %v2072_v26 = vpop.f32.mrf.mxu1 }
 0x265   : > { %2184 = vst [vmem:[#allocation2 + $0x160] sm:$0xff] %v2142_v24  ;;  %v2144_v29 = vadd.f32 %v2143_v17, %v2071_v25  ;;  %v2073_v63 = vadd.f32 %v2072_v26, %v7833_v10  ;;  %v2147_v31 = vpop.f32.mrf.mxu0 }
 0x266   : > { %v2074_v61 = vpop.f32.mrf.mxu1 }
 0x267   : > { %2185 = vst [vmem:[#allocation2 + $0x128] sm:$0xff] %v2144_v29  ;;  %v2146_v32 = vadd.f32 %v2145_v27, %v2073_v63  ;;  %v2075_v33 = vadd.f32 %v2074_v61, %v7837_v62  ;;  %v2151_v50 = vpop.f32.mrf.mxu0 }
 0x268   : > { %v2078_v35 = vpop.f32.mrf.mxu1 }
 0x269   : > { %2190 = vst [vmem:[#allocation2 + $0x90] sm:$0xff] %v2146_v32  ;;  %v2148_v36 = vadd.f32 %v2147_v31, %v2075_v33  ;;  %v2079_v37 = vadd.f32 %v2078_v35, %v7833_v10  ;;  %v2153_v40 = vpop.f32.mrf.mxu0 }
 0x26a   : > { %v2080_v38 = vpop.f32.mrf.mxu1 }
 0x26b   : > { %2191 = vst [vmem:[#allocation2 + $0x118] sm:$0xff] %v2148_v36  ;;  %v2152_v42 = vadd.f32 %v2151_v50, %v2079_v37  ;;  %v2081_v43 = vadd.f32 %v2080_v38, %v7837_v62  ;;  %v2155_v45 = vpop.f32.mrf.mxu0 }
 0x26c   : > { %v2082_v44 = vpop.f32.mrf.mxu1 }
 0x26d   : > { %2196 = vst [vmem:[#allocation2 + $0x80] sm:$0xff] %v2152_v42  ;;  %v2154_v46 = vadd.f32 %v2153_v40, %v2081_v43  ;;  %v2083_v47 = vadd.f32 %v2082_v44, %v7833_v10  ;;  %v2157_v49 = vpop.f32.mrf.mxu0 }
 0x26e   : > { %v2084_v48 = vpop.f32.mrf.mxu1 }
 0x26f   : > { %2197 = vst [vmem:[#allocation2 + $0x130] sm:$0xff] %v2154_v46  ;;  %v2156_v51 = vadd.f32 %v2155_v45, %v2083_v47  ;;  %v2085_v52 = vadd.f32 %v2084_v48, %v7837_v62  ;;  %v2161_v54 = vpop.f32.mrf.mxu0 }
 0x270   : > { %v2088_v53 = vpop.f32.mrf.mxu1 }
 0x271   : > { %2202 = vst [vmem:[#allocation2 + $0xb8] sm:$0xff] %v2156_v51  ;;  %v2158_v55 = vadd.f32 %v2157_v49, %v2085_v52  ;;  %v2089_v56 = vadd.f32 %v2088_v53, %v7833_v10  ;;  %v2163_v58 = vpop.f32.mrf.mxu0 }
 0x272   : > { %v2090_v57 = vpop.f32.mrf.mxu1 }
 0x273   : > { %2203 = vst [vmem:[#allocation2 + $0x168] sm:$0xff] %v2158_v55  ;;  %v2162_v59 = vadd.f32 %v2161_v54, %v2089_v56  ;;  %v2091_v6 = vadd.f32 %v2090_v57, %v7837_v62  ;;  %v2165_v15 = vpop.f32.mrf.mxu0 }
 0x274   : > { %v2092_v12 = vpop.f32.mrf.mxu1 }
 0x275   : > { %2208 = vst [vmem:[#allocation2 + $0xa0] sm:$0xff] %v2162_v59  ;;  %v2164_v19 = vadd.f32 %v2163_v58, %v2091_v6  ;;  %v2093_v23 = vadd.f32 %v2092_v12, %v7833_v10  ;;  %v2167_v30 = vpop.f32.mrf.mxu0 }
 0x276   : > { %v2094_v28 = vpop.f32.mrf.mxu1 }
 0x277   : > { %2209 = vst [vmem:[#allocation2 + $0x170] sm:$0xff] %v2164_v19  ;;  %v2166_v60 = vadd.f32 %v2165_v15, %v2093_v23  ;;  %v2095_v34 = vadd.f32 %v2094_v28, %v7837_v62  ;;  %v2171_v39 = vpop.f32.mrf.mxu0 }
 0x278   : > { %v2098_v2 = vpop.f32.mrf.mxu1 }
 0x279   : > { %2214 = vst [vmem:[#allocation2 + $0x28] sm:$0xff] %v2166_v60  ;;  %v2168_v41 = vadd.f32 %v2167_v30, %v2095_v34  ;;  %v2099_v0 = vadd.f32 %v2098_v2, %v7833_v10  ;;  %v2173_v3 = vpop.f32.mrf.mxu0 }
 0x27a   : > { %v2100_v1 = vpop.f32.mrf.mxu1 }
 0x27b   : > { %2215 = vst [vmem:[#allocation2 + $0x38] sm:$0xff] %v2168_v41  ;;  %v2172_v4 = vadd.f32 %v2171_v39, %v2099_v0  ;;  %v2101_v5 = vadd.f32 %v2100_v1, %v7837_v62  ;;  %v2175_v9 = vpop.f32.mrf.mxu0 }
 0x27c   : > { %v2102_v8 = vpop.f32.mrf.mxu1 }
 0x27d   : > { %2220 = vst [vmem:[#allocation2] sm:$0xff] %v2172_v4  ;;  %v2174_v11 = vadd.f32 %v2173_v3, %v2101_v5  ;;  %v2103_v13 = vadd.f32 %v2102_v8, %v7833_v10  ;;  %v2177_v20 = vpop.f32.mrf.mxu0 }
 0x27e   : > { %v2104_v14 = vpop.f32.mrf.mxu1 }
 0x27f   : > { %2221 = vst [vmem:[#allocation2 + $0x78] sm:$0xff] %v2174_v11  ;;  %v2176_v16 = vadd.f32 %v2175_v9, %v2103_v13  ;;  %v2105_v18 = vadd.f32 %v2104_v14, %v7837_v62 }
 0x281   : > { %2226 = vst [vmem:[#allocation2 + $0x158] sm:$0xff] %v2176_v16  ;;  %v2178_v7 = vadd.f32 %v2177_v20, %v2105_v18 }
 0x283   : > { %2227 = vst [vmem:[#allocation2 + $0x150] sm:$0xff] %v2178_v7 }
 0x284 PF: > { %p5639_p6 = scmp.le.s32.totalorder %s7346_s24, 0 }
 0x286   : > { %2231 = sbr.rel (%p5639_p6) target bundleno = 991 (0x3df), region = 100 }
 0x28b   : > { %v6310_v10 = vld [vmem:[%s7624_s10 + $0x154] ss:$24 sps:$4 sm:$0xff]   ;;  %v6314_v21 = vld [vmem:[%s7624_s10 + $0x150] ss:$24 sps:$4 sm:$0xff]   ;;  %v6316_v17 = vld [vmem:[%s7624_s10 + $0x124] ss:$24 sps:$4 sm:$0xff]  }
 0x28c   : > { %v6312_v62 = vld [vmem:[%s7624_s10 + $0x15c] ss:$24 sps:$4 sm:$0xff]   ;;  %2888 = vmatprep.subr.bf16.mxu0 %v6310_v10  ;;  %v6315_v22 = vld [vmem:[%s7624_s10 + $0x158] ss:$24 sps:$4 sm:$0xff]   ;;  %v6318_v24 = vld [vmem:[%s7624_s10 + $0x12c] ss:$24 sps:$4 sm:$0xff]  }
 0x28d   : > { %2961 = vmatprep.subr.bf16.mxu1 %v6312_v62  ;;  %2889 = vmatpush1.bf16.msra.mxu0 %v6314_v21  ;;  %v6320_v25 = vld [vmem:[%s7624_s10 + $0x120] ss:$24 sps:$4 sm:$0xff]   ;;  %v6322_v27 = vld [vmem:[%s7624_s10 + $0xf4] ss:$24 sps:$4 sm:$0xff]   ;;  %v6326_v63 = vld [vmem:[%s7624_s10 + $0xf0] ss:$24 sps:$4 sm:$0xff]  }
 0x28e   : > { %2962 = vmatpush1.bf16.msra.mxu1 %v6315_v22  ;;  %2890 = vmatprep.subr.bf16.mxu0 %v6316_v17  ;;  %v6321_v26 = vld [vmem:[%s7624_s10 + $0x128] ss:$24 sps:$4 sm:$0xff]   ;;  %v6324_v29 = vld [vmem:[%s7624_s10 + $0xfc] ss:$24 sps:$4 sm:$0xff]   ;;  %v6327_v61 = vld [vmem:[%s7624_s10 + $0xf8] ss:$24 sps:$4 sm:$0xff]  }
 0x28f   : > { %2963 = vmatprep.subr.bf16.mxu1 %v6318_v24  ;;  %v6328_v31 = vld [vmem:[%s7624_s10 + $0xc4] ss:$24 sps:$4 sm:$0xff]   ;;  %v6332_v33 = vld [vmem:[%s7624_s10 + $0xc0] ss:$24 sps:$4 sm:$0xff]   ;;  %v6334_v50 = vld [vmem:[%s7624_s10 + $0x94] ss:$24 sps:$4 sm:$0xff]  }
 0x290   : > { %v6330_v32 = vld [vmem:[%s7624_s10 + $0xcc] ss:$24 sps:$4 sm:$0xff]   ;;  %v6333_v35 = vld [vmem:[%s7624_s10 + $0xc8] ss:$24 sps:$4 sm:$0xff]   ;;  %v6336_v36 = vld [vmem:[%s7624_s10 + $0x9c] ss:$24 sps:$4 sm:$0xff]  }
 0x291   : > { %2891 = vmatpush1.bf16.msra.mxu0 %v6320_v25  ;;  %v6338_v37 = vld [vmem:[%s7624_s10 + $0x90] ss:$24 sps:$4 sm:$0xff]   ;;  %v6340_v40 = vld [vmem:[%s7624_s10 + $0x64] ss:$24 sps:$4 sm:$0xff]   ;;  %v6344_v43 = vld [vmem:[%s7624_s10 + $0x60] ss:$24 sps:$4 sm:$0xff]  }
 0x292   : > { %2964 = vmatpush1.bf16.msra.mxu1 %v6321_v26  ;;  %2892 = vmatprep.subr.bf16.mxu0 %v6322_v27  ;;  %v6339_v38 = vld [vmem:[%s7624_s10 + $0x98] ss:$24 sps:$4 sm:$0xff]   ;;  %v6342_v42 = vld [vmem:[%s7624_s10 + $0x6c] ss:$24 sps:$4 sm:$0xff]   ;;  %v6345_v44 = vld [vmem:[%s7624_s10 + $0x68] ss:$24 sps:$4 sm:$0xff]  }
 0x293   : > { %2965 = vmatprep.subr.bf16.mxu1 %v6324_v29  ;;  %v6346_v45 = vld [vmem:[%s7624_s10 + $0x34] ss:$24 sps:$4 sm:$0xff]   ;;  %v6350_v47 = vld [vmem:[%s7624_s10 + $0x30] ss:$24 sps:$4 sm:$0xff]   ;;  %v6352_v49 = vld [vmem:[%s7624_s10 + $0x4] ss:$24 sps:$4 sm:$0xff]  }
 0x294   : > { %v6348_v46 = vld [vmem:[%s7624_s10 + $0x3c] ss:$24 sps:$4 sm:$0xff]   ;;  %v6351_v48 = vld [vmem:[%s7624_s10 + $0x38] ss:$24 sps:$4 sm:$0xff]   ;;  %v6354_v51 = vld [vmem:[%s7624_s10 + $0xc] ss:$24 sps:$4 sm:$0xff]  }
 0x295   : > { %2893 = vmatpush1.bf16.msra.mxu0 %v6326_v63  ;;  %v6356_v52 = vld [vmem:[%s7624_s10] ss:$24 sps:$4 sm:$0xff]   ;;  %v6358_v54 = vld [vmem:[%s7624_s10 + $0x2d4] ss:$24 sps:$4 sm:$0xff]   ;;  %v6362_v56 = vld [vmem:[%s7624_s10 + $0x2d0] ss:$24 sps:$4 sm:$0xff]  }
 0x296   : > { %2966 = vmatpush1.bf16.msra.mxu1 %v6327_v61  ;;  %2894 = vmatprep.subr.bf16.mxu0 %v6328_v31  ;;  %v6357_v53 = vld [vmem:[%s7624_s10 + $0x8] ss:$24 sps:$4 sm:$0xff]   ;;  %v6360_v55 = vld [vmem:[%s7624_s10 + $0x2dc] ss:$24 sps:$4 sm:$0xff]   ;;  %v6363_v57 = vld [vmem:[%s7624_s10 + $0x2d8] ss:$24 sps:$4 sm:$0xff]  }
 0x297   : > { %2967 = vmatprep.subr.bf16.mxu1 %v6330_v32  ;;  %v6364_v58 = vld [vmem:[%s7624_s10 + $0x2a4] ss:$24 sps:$4 sm:$0xff]   ;;  %v6368_v6 = vld [vmem:[%s7624_s10 + $0x2a0] ss:$24 sps:$4 sm:$0xff]   ;;  %v6370_v15 = vld [vmem:[%s7624_s10 + $0x274] ss:$24 sps:$4 sm:$0xff]  }
 0x298   : > { %v6366_v59 = vld [vmem:[%s7624_s10 + $0x2ac] ss:$24 sps:$4 sm:$0xff]   ;;  %v6369_v12 = vld [vmem:[%s7624_s10 + $0x2a8] ss:$24 sps:$4 sm:$0xff]   ;;  %v6372_v19 = vld [vmem:[%s7624_s10 + $0x27c] ss:$24 sps:$4 sm:$0xff]  }
 0x299   : > { %2895 = vmatpush1.bf16.msra.mxu0 %v6332_v33  ;;  %v6374_v23 = vld [vmem:[%s7624_s10 + $0x270] ss:$24 sps:$4 sm:$0xff]   ;;  %v6376_v30 = vld [vmem:[%s7624_s10 + $0x244] ss:$24 sps:$4 sm:$0xff]   ;;  %v6380_v39 = vld [vmem:[%s7624_s10 + $0x240] ss:$24 sps:$4 sm:$0xff]  }
 0x29a   : > { %2968 = vmatpush1.bf16.msra.mxu1 %v6333_v35  ;;  %2896 = vmatprep.subr.bf16.mxu0 %v6334_v50  ;;  %v6375_v28 = vld [vmem:[%s7624_s10 + $0x278] ss:$24 sps:$4 sm:$0xff]   ;;  %v6378_v60 = vld [vmem:[%s7624_s10 + $0x24c] ss:$24 sps:$4 sm:$0xff]   ;;  %v6381_v41 = vld [vmem:[%s7624_s10 + $0x248] ss:$24 sps:$4 sm:$0xff]  }
 0x29b   : > { %2969 = vmatprep.subr.bf16.mxu1 %v6336_v36  ;;  %v2232_v34 = vld [vmem:[#allocation3 + $0x18] sm:$0xff]  ;;  %v6386_v4 = vld [vmem:[%s7624_s10 + $0x210] ss:$24 sps:$4 sm:$0xff]   ;;  %v6390_v9 = vld [vmem:[%s7624_s10 + $0x1ec] ss:$24 sps:$4 sm:$0xff]  }
 0x29c   : > { %v2233_v2 = vld [vmem:[#allocation3 + $0x38] sm:$0xff]  ;;  %v6393_v13 = vld [vmem:[%s7624_s10 + $0x1e8] ss:$24 sps:$4 sm:$0xff]   ;;  %v6402_v10 = vld [vmem:[%s7624_s10 + $0x18c] ss:$24 sps:$4 sm:$0xff]  }
 0x29d   : > { %2897 = vmatpush1.bf16.msra.mxu0 %v6338_v37  ;;  %v7904_v0 = vcombine.high %v2232_v34, %v2233_v2  ;;  %v6382_v1 = vld [vmem:[%s7624_s10 + $0x214] ss:$24 sps:$4 sm:$0xff]   ;;  %v6387_v5 = vld [vmem:[%s7624_s10 + $0x218] ss:$24 sps:$4 sm:$0xff]   ;;  %v6388_v8 = vld [vmem:[%s7624_s10 + $0x1e4] ss:$24 sps:$4 sm:$0xff]   ;;  %v7925_v17 = vcombine.low %v2232_v34, %v2233_v2 }
 0x29e   : > { %2970 = vmatpush1.bf16.msra.mxu1 %v6339_v38  ;;  %2898 = vmatprep.subr.bf16.mxu0 %v6340_v40  ;;  %v6384_v3 = vld [vmem:[%s7624_s10 + $0x21c] ss:$24 sps:$4 sm:$0xff]   ;;  %v6392_v11 = vld [vmem:[%s7624_s10 + $0x1e0] ss:$24 sps:$4 sm:$0xff]   ;;  %v6398_v18 = vld [vmem:[%s7624_s10 + $0x1b0] ss:$24 sps:$4 sm:$0xff]  }
 0x29f   : > { %2971 = vmatprep.subr.bf16.mxu1 %v6342_v42  ;;  %2920 = vmatprep.mubr.bf16.mxu0 %v7904_v0  ;;  %v6394_v14 = vld [vmem:[%s7624_s10 + $0x1b4] ss:$24 sps:$4 sm:$0xff]   ;;  %v6399_v20 = vld [vmem:[%s7624_s10 + $0x1b8] ss:$24 sps:$4 sm:$0xff]   ;;  %v6400_v7 = vld [vmem:[%s7624_s10 + $0x184] ss:$24 sps:$4 sm:$0xff]  }
 0x2a0   : > { %2993 = vmatprep.mubr.bf16.mxu1 %v7904_v0  ;;  %v6396_v16 = vld [vmem:[%s7624_s10 + $0x1bc] ss:$24 sps:$4 sm:$0xff]   ;;  %v6404_v62 = vld [vmem:[%s7624_s10 + $0x180] ss:$24 sps:$4 sm:$0xff]   ;;  %v6409_v27 = vld [vmem:[%s7624_s10 + $0x130] ss:$24 sps:$4 sm:$0xff]  }
 0x2a1   : > { %2899 = vmatpush1.bf16.msra.mxu0 %v6344_v43  ;;  %v6405_v21 = vld [vmem:[%s7624_s10 + $0x188] ss:$24 sps:$4 sm:$0xff]   ;;  %v6408_v22 = vld [vmem:[%s7624_s10 + $0x164] ss:$24 sps:$4 sm:$0xff]   ;;  %v6411_v25 = vld [vmem:[%s7624_s10 + $0x134] ss:$24 sps:$4 sm:$0xff]  }
 0x2a2   : > { %2972 = vmatpush1.bf16.msra.mxu1 %v6345_v44  ;;  %2900 = vmatprep.subr.bf16.mxu0 %v6346_v45  ;;  %v6406_v24 = vld [vmem:[%s7624_s10 + $0x160] ss:$24 sps:$4 sm:$0xff]   ;;  %v6414_v29 = vld [vmem:[%s7624_s10 + $0x104] ss:$24 sps:$4 sm:$0xff]   ;;  %v6417_v31 = vld [vmem:[%s7624_s10 + $0xd4] ss:$24 sps:$4 sm:$0xff]  }
 0x2a3   : > { %2973 = vmatprep.subr.bf16.mxu1 %v6348_v46  ;;  %v7929_v26 = vld [vmem:[#allocation3 + $0xc] ss:$24 sps:$4 sm:$0xff]   ;;  %v7937_v63 = vld [vmem:[#allocation3 + $0x8] ss:$24 sps:$4 sm:$0xff]  }
 0x2a4   : > { %v6412_v61 = vld [vmem:[%s7624_s10 + $0x100] ss:$24 sps:$4 sm:$0xff]   ;;  %v6442_v32 = vld [vmem:[#allocation3 + $0x2c] ss:$8 sps:$4 sm:$0xff]   ;;  %v6420_v35 = vld [vmem:[%s7624_s10 + $0xa4] ss:$24 sps:$4 sm:$0xff]  }
 0x2a5   : > { %2901 = vmatpush1.bf16.msra.mxu0 %v6350_v47  ;;  %v6415_v33 = vld [vmem:[%s7624_s10 + $0xd0] ss:$24 sps:$4 sm:$0xff]   ;;  %v6418_v36 = vld [vmem:[%s7624_s10 + $0xa0] ss:$24 sps:$4 sm:$0xff]   ;;  %v6423_v37 = vld [vmem:[%s7624_s10 + $0x74] ss:$24 sps:$4 sm:$0xff]  }
 0x2a6   : > { %2974 = vmatpush1.bf16.msra.mxu1 %v6351_v48  ;;  %2902 = vmatprep.subr.bf16.mxu0 %v6352_v49  ;;  %v7945_v50 = vld [vmem:[#allocation3 + $0x28] ss:$8 sps:$4 sm:$0xff]   ;;  %v7949_v38 = vld [vmem:[#allocation3 + $0x14] ss:$-16 sps:$4 sm:$0xff]  }
 0x2a7   : > { %2975 = vmatprep.subr.bf16.mxu1 %v6354_v51  ;;  %v6421_v40 = vld [vmem:[%s7624_s10 + $0x70] ss:$24 sps:$4 sm:$0xff]   ;;  %v6426_v42 = vld [vmem:[%s7624_s10 + $0x44] ss:$24 sps:$4 sm:$0xff]   ;;  %v6424_v44 = vld [vmem:[%s7624_s10 + $0x40] ss:$24 sps:$4 sm:$0xff]  }
 0x2a8   : > { %v7957_v43 = vld [vmem:[#allocation3 + $0x10] ss:$-16 sps:$4 sm:$0xff]  }
 0x2a9   : > { %2903 = vmatpush1.bf16.msra.mxu0 %v6356_v52  ;;  %v6429_v45 = vld [vmem:[%s7624_s10 + $0x14] ss:$24 sps:$4 sm:$0xff]   ;;  %v6427_v46 = vld [vmem:[%s7624_s10 + $0x10] ss:$24 sps:$4 sm:$0xff]   ;;  %v6432_v47 = vld [vmem:[%s7624_s10 + $0x2e4] ss:$24 sps:$4 sm:$0xff]  }
 0x2aa   : > { %2976 = vmatpush1.bf16.msra.mxu1 %v6357_v53  ;;  %2904 = vmatprep.subr.bf16.mxu0 %v6358_v54  ;;  %v6430_v48 = vld [vmem:[%s7624_s10 + $0x2e0] ss:$24 sps:$4 sm:$0xff]   ;;  %v6438_v49 = vld [vmem:[%s7624_s10 + $0x2b4] ss:$24 sps:$4 sm:$0xff]   ;;  %v6436_v51 = vld [vmem:[%s7624_s10 + $0x2b0] ss:$24 sps:$4 sm:$0xff]  }
 0x2ab   : > { %2977 = vmatprep.subr.bf16.mxu1 %v6360_v55  ;;  %v6441_v52 = vld [vmem:[%s7624_s10 + $0x284] ss:$24 sps:$4 sm:$0xff]   ;;  %v6439_v53 = vld [vmem:[%s7624_s10 + $0x280] ss:$24 sps:$4 sm:$0xff]   ;;  %v6447_v54 = vld [vmem:[%s7624_s10 + $0x254] ss:$24 sps:$4 sm:$0xff]  }
 0x2ac   : > { %v6445_v55 = vld [vmem:[%s7624_s10 + $0x250] ss:$24 sps:$4 sm:$0xff]  }
 0x2ad   : > { %2905 = vmatpush2.bf16.msra.mxu0 %v6362_v56  ;;  %v6450_v56 = vld [vmem:[%s7624_s10 + $0x224] ss:$24 sps:$4 sm:$0xff]  }
 0x2ae   : > { %2978 = vmatpush2.bf16.msra.mxu1 %v6363_v57  ;;  %2906 = vmatprep.subr.bf16.mxu0 %v6364_v58  ;;  %v6448_v57 = vld [vmem:[%s7624_s10 + $0x220] ss:$24 sps:$4 sm:$0xff]   ;;  %v6456_v58 = vld [vmem:[%s7624_s10 + $0x1f4] ss:$24 sps:$4 sm:$0xff]  }
 0x2af   : > { %2979 = vmatprep.subr.bf16.mxu1 %v6366_v59  ;;  %v6454_v59 = vld [vmem:[%s7624_s10 + $0x1f0] ss:$24 sps:$4 sm:$0xff]  }
 0x2b0   : > { %v7992_v34 = vld [vmem:[%s7643_s30] sm:$0x3f] }
 0x2b1   : > { %2907 = vmatpush2.bf16.msra.mxu0 %v6368_v6  ;;  %v6459_v6 = vld [vmem:[%s7624_s10 + $0x1c4] ss:$24 sps:$4 sm:$0xff]  }
 0x2b2   : > { %2980 = vmatpush2.bf16.msra.mxu1 %v6369_v12  ;;  %2908 = vmatprep.subr.bf16.mxu0 %v6370_v15  ;;  %v6457_v12 = vld [vmem:[%s7624_s10 + $0x1c0] ss:$24 sps:$4 sm:$0xff]   ;;  %v6462_v15 = vld [vmem:[%s7624_s10 + $0x194] ss:$24 sps:$4 sm:$0xff]  }
 0x2b3   : > { %2981 = vmatprep.subr.bf16.mxu1 %v6372_v19  ;;  %v6460_v19 = vld [vmem:[%s7624_s10 + $0x190] ss:$24 sps:$4 sm:$0xff]  }
 0x2b5   : > { %2909 = vmatpush2.bf16.msra.mxu0 %v6374_v23  ;;  %v2338_v23 = vlaneseq }
 0x2b6   : > { %2982 = vmatpush2.bf16.msra.mxu1 %v6375_v28  ;;  %2910 = vmatprep.subr.bf16.mxu0 %v6376_v30 }
 0x2b7   : > { %2983 = vmatprep.subr.bf16.mxu1 %v6378_v60  ;;  %v7987_v28 = vshrl.u32 %v2338_v23, 7 }
 0x2b9   : > { %2911 = vmatpush2.bf16.msra.mxu0 %v6380_v39  ;;  %v2340_v30 = vsub.s32 0, %v7987_v28  ;;  %v2348_v60 = vsub.s32 2, %v7987_v28  ;;  %v2344_v2 = vsub.s32 1, %v7987_v28  ;;  %v2352_v39 = vsub.s32 3, %v7987_v28 }
 0x2ba   : > { %2984 = vmatpush2.bf16.msra.mxu1 %v6381_v41  ;;  %2912 = vmatprep.subr.bf16.mxu0 %v6382_v1 }
 0x2bb   : > { %2985 = vmatprep.subr.bf16.mxu1 %v6384_v3  ;;  %v7997_v41 = vrot.slane %v7992_v34, %v2340_v30  ;;  %v8003_v1 = vrot.slane %v7992_v34, %v2344_v2  ;;  %v8006_v3 = vrot.slane %v7992_v34, %v2352_v39 }
 0x2bd   : > { %2913 = vmatpush2.bf16.msra.mxu0 %v6386_v4 }
 0x2be   : > { %2986 = vmatpush2.bf16.msra.mxu1 %v6387_v5  ;;  %2914 = vmatprep.subr.bf16.mxu0 %v6388_v8 }
 0x2bf   : > { %2987 = vmatprep.subr.bf16.mxu1 %v6390_v9 }
 0x2c1   : > { %2915 = vmatpush2.bf16.msra.mxu0 %v6392_v11 }
 0x2c2   : > { %2988 = vmatpush2.bf16.msra.mxu1 %v6393_v13  ;;  %2916 = vmatprep.subr.bf16.mxu0 %v6394_v14 }
 0x2c3   : > { %2989 = vmatprep.subr.bf16.mxu1 %v6396_v16 }
 0x2c5   : > { %2917 = vmatpush2.bf16.msra.mxu0 %v6398_v18 }
 0x2c6   : > { %2990 = vmatpush2.bf16.msra.mxu1 %v6399_v20  ;;  %2918 = vmatprep.subr.bf16.mxu0 %v6400_v7 }
 0x2c7   : > { %2991 = vmatprep.subr.bf16.mxu1 %v6402_v10 }
 0x2c9   : > { %2919 = vmatpush2.bf16.msra.mxu0 %v6404_v62 }
 0x2ca   : > { %2992 = vmatpush2.bf16.msra.mxu1 %v6405_v21  ;;  %3034 = vmatprep.subr.bf16.mxu0 %v6408_v22 }
 0x2cb   : > { %5894 = vmatprep.subr.bf16.mxu1 %v6408_v22 }
 0x2cc   : > { %2921 = vmatmul.mubr.bf16.vlgmr.msra.gmra.mxu0 %v7925_v17 }
 0x2cd   : > { %2994 = vmatmul.mubr.bf16.vlgmr.msra.gmra.mxu1 %v7925_v17  ;;  %3035 = vmatpush1.bf16.msra.mxu0 %v6406_v24 }
 0x2ce   : > { %5910 = vmatpush1.bf16.msra.mxu1 %v6406_v24  ;;  %3036 = vmatprep.subr.bf16.mxu0 %v6411_v25 }
 0x2cf   : > { %5895 = vmatprep.subr.bf16.mxu1 %v6411_v25  ;;  %2930 = vmatprep.mubr.bf16.mxu0 %v7929_v26 }
 0x2d0   : > { %3003 = vmatprep.mubr.bf16.mxu1 %v7929_v26 }
 0x2d1   : > { %3037 = vmatpush1.bf16.msra.mxu0 %v6409_v27 }
 0x2d2   : > { %5911 = vmatpush1.bf16.msra.mxu1 %v6409_v27  ;;  %3038 = vmatprep.subr.bf16.mxu0 %v6414_v29 }
 0x2d3   : > { %5896 = vmatprep.subr.bf16.mxu1 %v6414_v29 }
 0x2d4   : > { %2931 = vmatmul.mubr.bf16.gmra.mxu0 %v7937_v63 }
 0x2d5   : > { %3004 = vmatmul.mubr.bf16.gmra.mxu1 %v7937_v63  ;;  %3039 = vmatpush1.bf16.msra.mxu0 %v6412_v61 }
 0x2d6   : > { %5912 = vmatpush1.bf16.msra.mxu1 %v6412_v61  ;;  %3040 = vmatprep.subr.bf16.mxu0 %v6417_v31 }
 0x2d7   : > { %5897 = vmatprep.subr.bf16.mxu1 %v6417_v31  ;;  %2940 = vmatprep.mubr.bf16.mxu0 %v6442_v32 }
 0x2d8   : > { %3013 = vmatprep.mubr.bf16.mxu1 %v6442_v32 }
 0x2d9   : > { %3041 = vmatpush1.bf16.msra.mxu0 %v6415_v33 }
 0x2da   : > { %5913 = vmatpush1.bf16.msra.mxu1 %v6415_v33  ;;  %3042 = vmatprep.subr.bf16.mxu0 %v6420_v35 }
 0x2db   : > { %5898 = vmatprep.subr.bf16.mxu1 %v6420_v35 }
 0x2dc   : > { %2941 = vmatmul.mubr.bf16.gmra.mxu0 %v7945_v50 }
 0x2dd   : > { %3014 = vmatmul.mubr.bf16.gmra.mxu1 %v7945_v50  ;;  %3043 = vmatpush1.bf16.msra.mxu0 %v6418_v36 }
 0x2de   : > { %5914 = vmatpush1.bf16.msra.mxu1 %v6418_v36  ;;  %3044 = vmatprep.subr.bf16.mxu0 %v6423_v37 }
 0x2df   : > { %5899 = vmatprep.subr.bf16.mxu1 %v6423_v37  ;;  %2950 = vmatprep.mubr.bf16.mxu0 %v7949_v38 }
 0x2e0   : > { %3023 = vmatprep.mubr.bf16.mxu1 %v7949_v38 }
 0x2e1   : > { %3045 = vmatpush1.bf16.msra.mxu0 %v6421_v40 }
 0x2e2   : > { %5915 = vmatpush1.bf16.msra.mxu1 %v6421_v40  ;;  %3046 = vmatprep.subr.bf16.mxu0 %v6426_v42 }
 0x2e3   : > { %5900 = vmatprep.subr.bf16.mxu1 %v6426_v42 }
 0x2e4   : > { %2951 = vmatmul.mubr.bf16.gmra.mxu0 %v7957_v43 }
 0x2e5   : > { %3024 = vmatmul.mubr.bf16.gmra.mxu1 %v7957_v43  ;;  %3047 = vmatpush1.bf16.msra.mxu0 %v6424_v44 }
 0x2e6   : > { %5916 = vmatpush1.bf16.msra.mxu1 %v6424_v44  ;;  %3048 = vmatprep.subr.bf16.mxu0 %v6429_v45 }
 0x2e7   : > { %5901 = vmatprep.subr.bf16.mxu1 %v6429_v45  ;;  %3066 = vmatprep.mubr.bf16.mxu0 %v7904_v0  ;;  %v8000_v0 = vrot.slane %v7992_v34, %v2348_v60 }
 0x2e8   : > { %3086 = vmatprep.mubr.bf16.mxu1 %v6442_v32 }
 0x2e9   : > { %3049 = vmatpush1.bf16.msra.mxu0 %v6427_v46 }
 0x2ea   : > { %5917 = vmatpush1.bf16.msra.mxu1 %v6427_v46  ;;  %3050 = vmatprep.subr.bf16.mxu0 %v6432_v47 }
 0x2eb   : > { %5902 = vmatprep.subr.bf16.mxu1 %v6432_v47 }
 0x2ed   : > { %3051 = vmatpush2.bf16.msra.mxu0 %v6430_v48 }
 0x2ee   : > { %5918 = vmatpush2.bf16.msra.mxu1 %v6430_v48  ;;  %3052 = vmatprep.subr.bf16.mxu0 %v6438_v49 }
 0x2ef   : > { %5903 = vmatprep.subr.bf16.mxu1 %v6438_v49 }
 0x2f1   : > { %3053 = vmatpush2.bf16.msra.mxu0 %v6436_v51 }
 0x2f2   : > { %5919 = vmatpush2.bf16.msra.mxu1 %v6436_v51  ;;  %3054 = vmatprep.subr.bf16.mxu0 %v6441_v52 }
 0x2f3   : > { %5904 = vmatprep.subr.bf16.mxu1 %v6441_v52 }
 0x2f5   : > { %3055 = vmatpush2.bf16.msra.mxu0 %v6439_v53 }
 0x2f6   : > { %5920 = vmatpush2.bf16.msra.mxu1 %v6439_v53  ;;  %3056 = vmatprep.subr.bf16.mxu0 %v6447_v54 }
 0x2f7   : > { %5905 = vmatprep.subr.bf16.mxu1 %v6447_v54 }
 0x2f9   : > { %3057 = vmatpush2.bf16.msra.mxu0 %v6445_v55 }
 0x2fa   : > { %5921 = vmatpush2.bf16.msra.mxu1 %v6445_v55  ;;  %3058 = vmatprep.subr.bf16.mxu0 %v6450_v56 }
 0x2fb   : > { %5906 = vmatprep.subr.bf16.mxu1 %v6450_v56 }
 0x2fd   : > { %3059 = vmatpush2.bf16.msra.mxu0 %v6448_v57 }
 0x2fe   : > { %5922 = vmatpush2.bf16.msra.mxu1 %v6448_v57  ;;  %3060 = vmatprep.subr.bf16.mxu0 %v6456_v58 }
 0x2ff   : > { %5907 = vmatprep.subr.bf16.mxu1 %v6456_v58 }
 0x301   : > { %3061 = vmatpush2.bf16.msra.mxu0 %v6454_v59 }
 0x302   : > { %5923 = vmatpush2.bf16.msra.mxu1 %v6454_v59  ;;  %3062 = vmatprep.subr.bf16.mxu0 %v6459_v6 }
 0x303   : > { %5908 = vmatprep.subr.bf16.mxu1 %v6459_v6 }
 0x305   : > { %3063 = vmatpush2.bf16.msra.mxu0 %v6457_v12 }
 0x306   : > { %5924 = vmatpush2.bf16.msra.mxu1 %v6457_v12  ;;  %3064 = vmatprep.subr.bf16.mxu0 %v6462_v15 }
 0x307   : > { %5909 = vmatprep.subr.bf16.mxu1 %v6462_v15 }
 0x309   : > { %3065 = vmatpush2.bf16.msra.mxu0 %v6460_v19 }
 0x30a   : > { %5925 = vmatpush2.bf16.msra.mxu1 %v6460_v19 }
 0x30c   : > { %3067 = vmatmul.mubr.bf16.vlgmr.msra.gmra.mxu0 %v7925_v17 }
 0x30d   : > { %3087 = vmatmul.mubr.bf16.vlgmr.msra.gmra.mxu1 %v7945_v50  ;;  %3076 = vmatprep.mubr.bf16.mxu0 %v7929_v26 }
 0x30e   : > { %3096 = vmatprep.mubr.bf16.mxu1 %v7949_v38 }
 0x314   : > { %3077 = vmatmul.mubr.bf16.gmra.mxu0 %v7937_v63 }
 0x315   : > { %3097 = vmatmul.mubr.bf16.gmra.mxu1 %v7957_v43 }
 0x38c   : > { %v2922_v4 = vpop.f32.mrf.mxu0 }
 0x38d   : > { %v2995_v5 = vpop.f32.mrf.mxu1  ;;  %v2923_v8 = vadd.f32 %v2922_v4, %v7997_v41 }
 0x38e   : > { %v2996_v9 = vadd.f32 %v2995_v5, %v8000_v0  ;;  %v2924_v11 = vpop.f32.mrf.mxu0 }
 0x38f   : > { %v2997_v13 = vpop.f32.mrf.mxu1  ;;  %3107 = vst [vmem:[#allocation2 + $0xb0] sm:$0xff] %v2923_v8  ;;  %v2925_v14 = vadd.f32 %v2924_v11, %v8003_v1 }
 0x390   : > { %3109 = vst [vmem:[#allocation2 + $0x10] sm:$0xff] %v2996_v9  ;;  %v2998_v16 = vadd.f32 %v2997_v13, %v8006_v3  ;;  %v2926_v18 = vpop.f32.mrf.mxu0 }
 0x391   : > { %v2999_v20 = vpop.f32.mrf.mxu1  ;;  %3108 = vst [vmem:[#allocation2 + $0xd0] sm:$0xff] %v2925_v14  ;;  %v2927_v7 = vadd.f32 %v2926_v18, %v7997_v41  ;;  %v2356_v14 = vsub.s32 4, %v7987_v28 }
 0x392   : > { %3110 = vst [vmem:[#allocation2 + $0x48] sm:$0xff] %v2998_v16  ;;  %v3000_v10 = vadd.f32 %v2999_v20, %v8000_v0  ;;  %v2928_v62 = vpop.f32.mrf.mxu0  ;;  %v2360_v16 = vsub.s32 5, %v7987_v28 }
 0x393   : > { %v3001_v21 = vpop.f32.mrf.mxu1  ;;  %3113 = vst [vmem:[#allocation2 + $0x40] sm:$0xff] %v2927_v7  ;;  %v2929_v22 = vadd.f32 %v2928_v62, %v8003_v1  ;;  %v2357_v18 = vrot.slane %v7992_v34, %v2356_v14 }
 0x394   : > { %3115 = vst [vmem:[#allocation2 + $0x108] sm:$0xff] %v3000_v10  ;;  %v3002_v17 = vadd.f32 %v3001_v21, %v8006_v3  ;;  %v2932_v24 = vpop.f32.mrf.mxu0 }
 0x395   : > { %v3005_v25 = vpop.f32.mrf.mxu1  ;;  %3114 = vst [vmem:[#allocation2 + $0x178] sm:$0xff] %v2929_v22  ;;  %v2933_v26 = vadd.f32 %v2932_v24, %v7997_v41 }
 0x396   : > { %3116 = vst [vmem:[#allocation2 + $0x110] sm:$0xff] %v3002_v17  ;;  %v3006_v27 = vadd.f32 %v3005_v25, %v8000_v0  ;;  %v2934_v29 = vpop.f32.mrf.mxu0 }
 0x397   : > { %v3007_v63 = vpop.f32.mrf.mxu1  ;;  %3119 = vst [vmem:[#allocation2 + $0x148] sm:$0xff] %v2933_v26  ;;  %v2935_v61 = vadd.f32 %v2934_v29, %v8003_v1 }
 0x398   : > { %3121 = vst [vmem:[#allocation2 + $0x58] sm:$0xff] %v3006_v27  ;;  %v3008_v31 = vadd.f32 %v3007_v63, %v8006_v3  ;;  %v2936_v32 = vpop.f32.mrf.mxu0 }
 0x399   : > { %v3009_v33 = vpop.f32.mrf.mxu1  ;;  %3120 = vst [vmem:[#allocation2 + $0x100] sm:$0xff] %v2935_v61  ;;  %v2937_v35 = vadd.f32 %v2936_v32, %v7997_v41 }
 0x39a   : > { %3122 = vst [vmem:[#allocation2 + $0xd8] sm:$0xff] %v3008_v31  ;;  %v3010_v50 = vadd.f32 %v3009_v33, %v8000_v0  ;;  %v2938_v36 = vpop.f32.mrf.mxu0 }
 0x39b   : > { %v3011_v37 = vpop.f32.mrf.mxu1  ;;  %3125 = vst [vmem:[#allocation2 + $0x138] sm:$0xff] %v2937_v35  ;;  %v2939_v38 = vadd.f32 %v2938_v36, %v8003_v1 }
 0x39c   : > { %3127 = vst [vmem:[#allocation2 + $0xe0] sm:$0xff] %v3010_v50  ;;  %v3012_v40 = vadd.f32 %v3011_v37, %v8006_v3  ;;  %v2942_v42 = vpop.f32.mrf.mxu0 }
 0x39d   : > { %v3015_v43 = vpop.f32.mrf.mxu1  ;;  %3126 = vst [vmem:[#allocation2 + $0x120] sm:$0xff] %v2939_v38  ;;  %v2943_v44 = vadd.f32 %v2942_v42, %v7997_v41 }
 0x39e   : > { %3128 = vst [vmem:[#allocation2 + $0xa8] sm:$0xff] %v3012_v40  ;;  %v3016_v45 = vadd.f32 %v3015_v43, %v8000_v0  ;;  %v2944_v46 = vpop.f32.mrf.mxu0 }
 0x39f   : > { %v3017_v47 = vpop.f32.mrf.mxu1  ;;  %3131 = vst [vmem:[#allocation2 + $0xe8] sm:$0xff] %v2943_v44  ;;  %v2945_v48 = vadd.f32 %v2944_v46, %v8003_v1 }
 0x3a0   : > { %3133 = vst [vmem:[#allocation2 + $0x20] sm:$0xff] %v3016_v45  ;;  %v3018_v49 = vadd.f32 %v3017_v47, %v8006_v3  ;;  %v2946_v51 = vpop.f32.mrf.mxu0 }
 0x3a1   : > { %v3019_v52 = vpop.f32.mrf.mxu1  ;;  %3132 = vst [vmem:[#allocation2 + $0xf8] sm:$0xff] %v2945_v48  ;;  %v2947_v53 = vadd.f32 %v2946_v51, %v7997_v41 }
 0x3a2   : > { %3134 = vst [vmem:[#allocation2 + $0x88] sm:$0xff] %v3018_v49  ;;  %v3020_v54 = vadd.f32 %v3019_v52, %v8000_v0  ;;  %v2948_v55 = vpop.f32.mrf.mxu0 }
 0x3a3   : > { %v3021_v56 = vpop.f32.mrf.mxu1  ;;  %3137 = vst [vmem:[#allocation2 + $0xf0] sm:$0xff] %v2947_v53  ;;  %v2949_v57 = vadd.f32 %v2948_v55, %v8003_v1 }
 0x3a4   : > { %3139 = vst [vmem:[#allocation2 + $0x60] sm:$0xff] %v3020_v54  ;;  %v3022_v58 = vadd.f32 %v3021_v56, %v8006_v3  ;;  %v2952_v59 = vpop.f32.mrf.mxu0 }
 0x3a5   : > { %v3025_v6 = vpop.f32.mrf.mxu1  ;;  %3138 = vst [vmem:[#allocation2 + $0x140] sm:$0xff] %v2949_v57  ;;  %v2953_v12 = vadd.f32 %v2952_v59, %v7997_v41 }
 0x3a6   : > { %3140 = vst [vmem:[#allocation2 + $0xc8] sm:$0xff] %v3022_v58  ;;  %v3026_v15 = vadd.f32 %v3025_v6, %v8000_v0  ;;  %v2954_v19 = vpop.f32.mrf.mxu0 }
 0x3a7   : > { %v3027_v23 = vpop.f32.mrf.mxu1  ;;  %3143 = vst [vmem:[#allocation2 + $0xc0] sm:$0xff] %v2953_v12  ;;  %v2955_v30 = vadd.f32 %v2954_v19, %v8003_v1 }
 0x3a8   : > { %3145 = vst [vmem:[#allocation2 + $0x98] sm:$0xff] %v3026_v15  ;;  %v3028_v60 = vadd.f32 %v3027_v23, %v8006_v3  ;;  %v2956_v2 = vpop.f32.mrf.mxu0 }
 0x3a9   : > { %v3029_v39 = vpop.f32.mrf.mxu1  ;;  %3144 = vst [vmem:[#allocation2 + $0x18] sm:$0xff] %v2955_v30  ;;  %v2957_v4 = vadd.f32 %v2956_v2, %v7997_v41  ;;  %v2361_v41 = vrot.slane %v7992_v34, %v2360_v16 }
 0x3aa   : > { %3146 = vst [vmem:[#allocation2 + $0x8] sm:$0xff] %v3028_v60  ;;  %v3030_v5 = vadd.f32 %v3029_v39, %v8000_v0  ;;  %v2958_v8 = vpop.f32.mrf.mxu0 }
 0x3ab   : > { %v3031_v9 = vpop.f32.mrf.mxu1  ;;  %3149 = vst [vmem:[#allocation2 + $0x50] sm:$0xff] %v2957_v4  ;;  %v2959_v11 = vadd.f32 %v2958_v8, %v8003_v1 }
 0x3ac   : > { %3151 = vst [vmem:[#allocation2 + $0x70] sm:$0xff] %v3030_v5  ;;  %v3032_v13 = vadd.f32 %v3031_v9, %v8006_v3 }
 0x3ad   : > { %3150 = vst [vmem:[#allocation2 + $0x68] sm:$0xff] %v2959_v11 }
 0x3ae   : > { %3152 = vst [vmem:[#allocation2 + $0x30] sm:$0xff] %v3032_v13 }
 0x3cc   : > { %v3068_v20 = vpop.f32.mrf.mxu0 }
 0x3cd   : > { %v3088_v0 = vpop.f32.mrf.mxu1  ;;  %v3069_v7 = vadd.f32 %v3068_v20, %v2357_v18 }
 0x3ce   : > { %v3089_v10 = vadd.f32 %v3088_v0, %v2357_v18  ;;  %v3070_v62 = vpop.f32.mrf.mxu0 }
 0x3cf   : > { %v3090_v21 = vpop.f32.mrf.mxu1  ;;  %3111 = vst [vmem:[#allocation2 + $0x160] sm:$0xff] %v3069_v7  ;;  %v3071_v1 = vadd.f32 %v3070_v62, %v2361_v41 }
 0x3d0   : > { %3135 = vst [vmem:[#allocation2 + $0xa0] sm:$0xff] %v3089_v10  ;;  %v3091_v3 = vadd.f32 %v3090_v21, %v2361_v41  ;;  %v3072_v22 = vpop.f32.mrf.mxu0 }
 0x3d1   : > { %v3092_v17 = vpop.f32.mrf.mxu1  ;;  %3112 = vst [vmem:[#allocation2 + $0x128] sm:$0xff] %v3071_v1  ;;  %v3073_v24 = vadd.f32 %v3072_v22, %v2357_v18 }
 0x3d2   : > { %3136 = vst [vmem:[#allocation2 + $0x170] sm:$0xff] %v3091_v3  ;;  %v3093_v28 = vadd.f32 %v3092_v17, %v2357_v18  ;;  %v3074_v25 = vpop.f32.mrf.mxu0 }
 0x3d3   : > { %v3094_v26 = vpop.f32.mrf.mxu1  ;;  %3117 = vst [vmem:[#allocation2 + $0x90] sm:$0xff] %v3073_v24  ;;  %v3075_v34 = vadd.f32 %v3074_v25, %v2361_v41 }
 0x3d4   : > { %3141 = vst [vmem:[#allocation2 + $0x28] sm:$0xff] %v3093_v28  ;;  %v3095_v27 = vadd.f32 %v3094_v26, %v2361_v41  ;;  %v3078_v29 = vpop.f32.mrf.mxu0 }
 0x3d5   : > { %v3098_v63 = vpop.f32.mrf.mxu1  ;;  %3118 = vst [vmem:[#allocation2 + $0x118] sm:$0xff] %v3075_v34  ;;  %v3079_v61 = vadd.f32 %v3078_v29, %v2357_v18 }
 0x3d6   : > { %3142 = vst [vmem:[#allocation2 + $0x38] sm:$0xff] %v3095_v27  ;;  %v3099_v31 = vadd.f32 %v3098_v63, %v2357_v18  ;;  %v3080_v32 = vpop.f32.mrf.mxu0 }
 0x3d7   : > { %v3100_v33 = vpop.f32.mrf.mxu1  ;;  %3123 = vst [vmem:[#allocation2 + $0x80] sm:$0xff] %v3079_v61  ;;  %v3081_v35 = vadd.f32 %v3080_v32, %v2361_v41 }
 0x3d8   : > { %3147 = vst [vmem:[#allocation2] sm:$0xff] %v3099_v31  ;;  %v3101_v50 = vadd.f32 %v3100_v33, %v2361_v41  ;;  %v3082_v36 = vpop.f32.mrf.mxu0 }
 0x3d9   : > { %v3102_v37 = vpop.f32.mrf.mxu1  ;;  %3124 = vst [vmem:[#allocation2 + $0x130] sm:$0xff] %v3081_v35  ;;  %v3083_v38 = vadd.f32 %v3082_v36, %v2357_v18 }
 0x3da   : > { %3148 = vst [vmem:[#allocation2 + $0x78] sm:$0xff] %v3101_v50  ;;  %v3103_v40 = vadd.f32 %v3102_v37, %v2357_v18  ;;  %v3084_v42 = vpop.f32.mrf.mxu0 }
 0x3db   : > { %v3104_v43 = vpop.f32.mrf.mxu1  ;;  %3129 = vst [vmem:[#allocation2 + $0xb8] sm:$0xff] %v3083_v38  ;;  %v3085_v44 = vadd.f32 %v3084_v42, %v2361_v41 }
 0x3dc   : > { %3153 = vst [vmem:[#allocation2 + $0x158] sm:$0xff] %v3103_v40  ;;  %v3105_v45 = vadd.f32 %v3104_v43, %v2361_v41 }
 0x3dd   : > { %3130 = vst [vmem:[#allocation2 + $0x168] sm:$0xff] %v3085_v44 }
 0x3de   : > { %3154 = vst [vmem:[#allocation2 + $0x150] sm:$0xff] %v3105_v45 }
 0x3df PF: > { %v8045_v46 = vld [vmem:[%s7631_s22 + $0xe4] ss:$16 sps:$4 sm:$0xff]   ;;  %v8048_v47 = vld [vmem:[%s7631_s22 + $0xe0] ss:$16 sps:$4 sm:$0xff]   ;;  %v9601_v48 = vmov 0  }
 0x3e0   : > { %3624 = vmatprep.mubr.bf16.mxu0 %v9601_v48  ;;  %3665 = vmatprep.mubr.bf16.mxu1 %v9601_v48  ;;  %v8054_v49 = vld [vmem:[%s7631_s22 + $0xc4] ss:$16 sps:$4 sm:$0xff]   ;;  %v8058_v51 = vld [vmem:[%s7631_s22 + $0xc0] ss:$16 sps:$4 sm:$0xff]   ;;  %v8085_v58 = vld [vmem:[%s7631_s22 + $0xec] ss:$16 sps:$4 sm:$0xff]  }
 0x3e1   : > { %3592 = vmatprep.subr.bf16.mxu0 %v8045_v46  ;;  %v8062_v52 = vld [vmem:[%s7631_s22 + $0xa4] ss:$16 sps:$4 sm:$0xff]   ;;  %v8066_v53 = vld [vmem:[%s7631_s22 + $0xa0] ss:$16 sps:$4 sm:$0xff]   ;;  %v8088_v59 = vld [vmem:[%s7631_s22 + $0xe8] ss:$16 sps:$4 sm:$0xff]   ;;  %3633 = vmatprep.subr.bf16.mxu1 %v8085_v58 }
 0x3e2   : > { %3593 = vmatpush1.bf16.msra.mxu0 %v8048_v47  ;;  %v8070_v54 = vld [vmem:[%s7631_s22 + $0x84] ss:$16 sps:$4 sm:$0xff]   ;;  %v8074_v55 = vld [vmem:[%s7631_s22 + $0x80] ss:$16 sps:$4 sm:$0xff]   ;;  %3634 = vmatpush1.bf16.msra.mxu1 %v8088_v59  ;;  %v8097_v12 = vld [vmem:[%s7631_s22 + $0xcc] ss:$16 sps:$4 sm:$0xff]  }
 0x3e3   : > { %3594 = vmatprep.subr.bf16.mxu0 %v8054_v49  ;;  %v8078_v56 = vld [vmem:[%s7631_s22 + $0x64] ss:$16 sps:$4 sm:$0xff]   ;;  %v8081_v57 = vld [vmem:[%s7631_s22 + $0x60] ss:$16 sps:$4 sm:$0xff]   ;;  %v8100_v15 = vld [vmem:[%s7631_s22 + $0xc8] ss:$16 sps:$4 sm:$0xff]   ;;  %3635 = vmatprep.subr.bf16.mxu1 %v8097_v12 }
 0x3e4   : > { %v8092_v6 = vld [vmem:[%s7631_s22 + $0x44] ss:$16 sps:$4 sm:$0xff]   ;;  %v8104_v19 = vld [vmem:[%s7631_s22 + $0x40] ss:$16 sps:$4 sm:$0xff]   ;;  %v8112_v30 = vld [vmem:[%s7631_s22 + $0xac] ss:$16 sps:$4 sm:$0xff]  }
 0x3e5   : > { %v8107_v23 = vld [vmem:[%s7631_s22 + $0x24] ss:$16 sps:$4 sm:$0xff]   ;;  %v8116_v60 = vld [vmem:[%s7631_s22 + $0xa8] ss:$16 sps:$4 sm:$0xff]   ;;  %v8120_v2 = vld [vmem:[%s7631_s22 + $0x20] ss:$16 sps:$4 sm:$0xff]  }
 0x3e6   : > { %3595 = vmatpush1.bf16.msra.mxu0 %v8058_v51  ;;  %3636 = vmatpush1.bf16.msra.mxu1 %v8100_v15  ;;  %9849 = vst [vmem:[#allocation27_spill] sm:$0xff] %v8116_v60  ;;  %v8124_v39 = vld [vmem:[%s7631_s22 + $0x8c] ss:$16 sps:$4 sm:$0xff]   ;;  %v8128_v4 = vld [vmem:[%s7631_s22 + $0x4] ss:$16 sps:$4 sm:$0xff]  }
 0x3e7   : > { %3596 = vmatprep.subr.bf16.mxu0 %v8062_v52  ;;  %3637 = vmatprep.subr.bf16.mxu1 %v8112_v30  ;;  %9850 = vst [vmem:[#allocation28_spill] sm:$0xff] %v8124_v39  ;;  %v8132_v5 = vld [vmem:[%s7631_s22 + $0x88] ss:$16 sps:$4 sm:$0xff]   ;;  %v8136_v8 = vld [vmem:[%s7631_s22] ss:$16 sps:$4 sm:$0xff]  }
 0x3e8   : > { %9851 = vst [vmem:[#allocation29_spill] sm:$0xff] %v8132_v5  ;;  %v8140_v9 = vld [vmem:[%s7631_s22 + $0x6c] ss:$16 sps:$4 sm:$0xff]   ;;  %v8144_v11 = vld [vmem:[%s7631_s22 + $0x1e4] ss:$16 sps:$4 sm:$0xff]  }
 0x3e9   : > { %9852 = vst [vmem:[#allocation30_spill] sm:$0xff] %v8140_v9  ;;  %v8148_v13 = vld [vmem:[%s7631_s22 + $0x68] ss:$16 sps:$4 sm:$0xff]   ;;  %v8152_v14 = vld [vmem:[%s7631_s22 + $0x1e0] ss:$16 sps:$4 sm:$0xff]  }
 0x3ea   : > { %3597 = vmatpush1.bf16.msra.mxu0 %v8066_v53  ;;  %3638 = vmatpush1.bf16.msra.mxu1 %v8116_v60  ;;  %9853 = vst [vmem:[#allocation31_spill] sm:$0xff] %v8148_v13  ;;  %9854 = vst [vmem:[#allocation32_spill] sm:$0xff] %v8152_v14  ;;  %v8156_v16 = vld [vmem:[%s7631_s22 + $0x4c] ss:$16 sps:$4 sm:$0xff]   ;;  %v8160_v18 = vld [vmem:[%s7631_s22 + $0x1c4] ss:$16 sps:$4 sm:$0xff]  }
 0x3eb   : > { %3598 = vmatprep.subr.bf16.mxu0 %v8070_v54  ;;  %3639 = vmatprep.subr.bf16.mxu1 %v8124_v39  ;;  %9855 = vst [vmem:[#allocation33_spill] sm:$0xff] %v8156_v16  ;;  %v8164_v41 = vld [vmem:[%s7631_s22 + $0x48] ss:$16 sps:$4 sm:$0xff]   ;;  %v8168_v20 = vld [vmem:[%s7631_s22 + $0x1c0] ss:$16 sps:$4 sm:$0xff]  }
 0x3ec   : > { %9856 = vst [vmem:[#allocation34_spill] sm:$0xff] %v8164_v41  ;;  %v8172_v0 = vld [vmem:[%s7631_s22 + $0x2c] ss:$16 sps:$4 sm:$0xff]   ;;  %v8176_v7 = vld [vmem:[%s7631_s22 + $0x1a4] ss:$16 sps:$4 sm:$0xff]  }
 0x3ed   : > { %9857 = vst [vmem:[#allocation35_spill] sm:$0xff] %v8172_v0  ;;  %v8180_v10 = vld [vmem:[%s7631_s22 + $0x28] ss:$16 sps:$4 sm:$0xff]   ;;  %v8184_v62 = vld [vmem:[%s7631_s22 + $0x1a0] ss:$16 sps:$4 sm:$0xff]  }
 0x3ee   : > { %3599 = vmatpush1.bf16.msra.mxu0 %v8074_v55  ;;  %3640 = vmatpush1.bf16.msra.mxu1 %v8132_v5  ;;  %9858 = vst [vmem:[#allocation36_spill] sm:$0xff] %v8180_v10  ;;  %v8188_v21 = vld [vmem:[%s7631_s22 + $0xc] ss:$16 sps:$4 sm:$0xff]   ;;  %v8192_v1 = vld [vmem:[%s7631_s22 + $0x184] ss:$16 sps:$4 sm:$0xff]  }
 0x3ef   : > { %3600 = vmatprep.subr.bf16.mxu0 %v8078_v56  ;;  %3641 = vmatprep.subr.bf16.mxu1 %v8140_v9  ;;  %9859 = vst [vmem:[#allocation37_spill] sm:$0xff] %v8188_v21  ;;  %v8196_v3 = vld [vmem:[%s7631_s22 + $0x8] ss:$16 sps:$4 sm:$0xff]   ;;  %v8200_v22 = vld [vmem:[%s7631_s22 + $0x180] ss:$16 sps:$4 sm:$0xff]  }
 0x3f0   : > { %9860 = vst [vmem:[#allocation38_spill] sm:$0xff] %v8196_v3  ;;  %v8204_v17 = vld [vmem:[%s7631_s22 + $0x1ec] ss:$16 sps:$4 sm:$0xff]   ;;  %v8208_v24 = vld [vmem:[%s7631_s22 + $0x164] ss:$16 sps:$4 sm:$0xff]  }
 0x3f1   : > { %9861 = vst [vmem:[#allocation39_spill] sm:$0xff] %v8204_v17  ;;  %v8212_v28 = vld [vmem:[%s7631_s22 + $0x1e8] ss:$16 sps:$4 sm:$0xff]   ;;  %v8216_v25 = vld [vmem:[%s7631_s22 + $0x160] ss:$16 sps:$4 sm:$0xff]  }
 0x3f2   : > { %3601 = vmatpush1.bf16.msra.mxu0 %v8081_v57  ;;  %3642 = vmatpush1.bf16.msra.mxu1 %v8148_v13  ;;  %9862 = vst [vmem:[#allocation40_spill] sm:$0xff] %v8212_v28  ;;  %v8220_v26 = vld [vmem:[%s7631_s22 + $0x1cc] ss:$16 sps:$4 sm:$0xff]   ;;  %v8224_v34 = vld [vmem:[%s7631_s22 + $0x144] ss:$16 sps:$4 sm:$0xff]  }
 0x3f3   : > { %3602 = vmatprep.subr.bf16.mxu0 %v8092_v6  ;;  %3643 = vmatprep.subr.bf16.mxu1 %v8156_v16  ;;  %9863 = vst [vmem:[#allocation41_spill] sm:$0xff] %v8220_v26  ;;  %v8228_v27 = vld [vmem:[%s7631_s22 + $0x1c8] ss:$16 sps:$4 sm:$0xff]   ;;  %v8232_v29 = vld [vmem:[%s7631_s22 + $0x140] ss:$16 sps:$4 sm:$0xff]  }
 0x3f4   : > { %9864 = vst [vmem:[#allocation42_spill] sm:$0xff] %v8228_v27  ;;  %v8236_v63 = vld [vmem:[%s7631_s22 + $0x1ac] ss:$16 sps:$4 sm:$0xff]   ;;  %v8240_v61 = vld [vmem:[%s7631_s22 + $0x124] ss:$16 sps:$4 sm:$0xff]  }
 0x3f5   : > { %9865 = vst [vmem:[#allocation43_spill] sm:$0xff] %v8236_v63  ;;  %v8244_v31 = vld [vmem:[%s7631_s22 + $0x1a8] ss:$16 sps:$4 sm:$0xff]   ;;  %v8248_v32 = vld [vmem:[%s7631_s22 + $0x120] ss:$16 sps:$4 sm:$0xff]  }
 0x3f6   : > { %3603 = vmatpush1.bf16.msra.mxu0 %v8104_v19  ;;  %3644 = vmatpush1.bf16.msra.mxu1 %v8164_v41  ;;  %9866 = vst [vmem:[#allocation44_spill] sm:$0xff] %v8244_v31  ;;  %v8252_v33 = vld [vmem:[%s7631_s22 + $0x18c] ss:$16 sps:$4 sm:$0xff]   ;;  %v8256_v35 = vld [vmem:[%s7631_s22 + $0x104] ss:$16 sps:$4 sm:$0xff]  }
 0x3f7   : > { %3604 = vmatprep.subr.bf16.mxu0 %v8107_v23  ;;  %3645 = vmatprep.subr.bf16.mxu1 %v8172_v0  ;;  %9867 = vst [vmem:[#allocation45_spill] sm:$0xff] %v8252_v33  ;;  %v8260_v50 = vld [vmem:[%s7631_s22 + $0x188] ss:$16 sps:$4 sm:$0xff]   ;;  %v8264_v36 = vld [vmem:[%s7631_s22 + $0x100] ss:$16 sps:$4 sm:$0xff]  }
 0x3f8   : > { %9868 = vst [vmem:[#allocation46_spill] sm:$0xff] %v8260_v50  ;;  %v8268_v37 = vld [vmem:[%s7631_s22 + $0x16c] ss:$16 sps:$4 sm:$0xff]   ;;  %v8276_v40 = vld [vmem:[%s7631_s22 + $0x168] ss:$16 sps:$4 sm:$0xff]  }
 0x3f9   : > { %9869 = vst [vmem:[#allocation47_spill] sm:$0xff] %v8268_v37  ;;  %v8272_v38 = vld [vmem:[%s7637_s0 + $0x74] ss:$8 sps:$4 sm:$0xff]   ;;  %9870 = vst [vmem:[#allocation48_spill] sm:$0xff] %v8276_v40  ;;  %v8280_v42 = vld [vmem:[%s7637_s0 + $0x70] ss:$8 sps:$4 sm:$0xff]  }
 0x3fa   : > { %3605 = vmatpush1.bf16.msra.mxu0 %v8120_v2  ;;  %3646 = vmatpush1.bf16.msra.mxu1 %v8180_v10  ;;  %9871 = vst [vmem:[#allocation49_spill] sm:$0xff] %v8280_v42  ;;  %v8284_v43 = vld [vmem:[%s7631_s22 + $0x14c] ss:$16 sps:$4 sm:$0xff]   ;;  %v8293_v45 = vld [vmem:[%s7631_s22 + $0x148] ss:$16 sps:$4 sm:$0xff]  }
 0x3fb   : > { %3606 = vmatprep.subr.bf16.mxu0 %v8128_v4  ;;  %3647 = vmatprep.subr.bf16.mxu1 %v8188_v21  ;;  %9872 = vst [vmem:[#allocation50_spill] sm:$0xff] %v8284_v43  ;;  %v8288_v44 = vld [vmem:[%s7637_s0 + $0x64] ss:$8 sps:$4 sm:$0xff]   ;;  %9874 = vst [vmem:[#allocation52_spill] sm:$0xff] %v8293_v45 }
 0x3fc   : > { %9873 = vst [vmem:[#allocation51_spill] sm:$0xff] %v8288_v44 }
 0x3fe   : > { %3607 = vmatpush1.bf16.msra.mxu0 %v8136_v8  ;;  %3648 = vmatpush1.bf16.msra.mxu1 %v8196_v3 }
 0x3ff   : > { %3608 = vmatprep.subr.bf16.mxu0 %v8144_v11  ;;  %3649 = vmatprep.subr.bf16.mxu1 %v8204_v17 }
 0x402   : > { %3609 = vmatpush2.bf16.msra.mxu0 %v8152_v14  ;;  %3650 = vmatpush2.bf16.msra.mxu1 %v8212_v28 }
 0x403   : > { %3610 = vmatprep.subr.bf16.mxu0 %v8160_v18  ;;  %3651 = vmatprep.subr.bf16.mxu1 %v8220_v26 }
 0x406   : > { %3611 = vmatpush2.bf16.msra.mxu0 %v8168_v20  ;;  %3652 = vmatpush2.bf16.msra.mxu1 %v8228_v27 }
 0x407   : > { %3612 = vmatprep.subr.bf16.mxu0 %v8176_v7  ;;  %3653 = vmatprep.subr.bf16.mxu1 %v8236_v63 }
 0x40a   : > { %3613 = vmatpush2.bf16.msra.mxu0 %v8184_v62  ;;  %3654 = vmatpush2.bf16.msra.mxu1 %v8244_v31 }
 0x40b   : > { %3614 = vmatprep.subr.bf16.mxu0 %v8192_v1  ;;  %3655 = vmatprep.subr.bf16.mxu1 %v8252_v33  ;;  %v8305_v33 = vld [vmem:[%s7637_s0 + $0x54] ss:$8 sps:$4 sm:$0xff]  }
 0x40c   : > { %9877 = vst [vmem:[#allocation55_spill] sm:$0xff] %v8305_v33 }
 0x40e   : > { %3615 = vmatpush2.bf16.msra.mxu0 %v8200_v22  ;;  %3656 = vmatpush2.bf16.msra.mxu1 %v8260_v50  ;;  %v8297_v50 = vld [vmem:[%s7637_s0 + $0x60] ss:$8 sps:$4 sm:$0xff]  }
 0x40f   : > { %3616 = vmatprep.subr.bf16.mxu0 %v8208_v24  ;;  %3657 = vmatprep.subr.bf16.mxu1 %v8268_v37  ;;  %9875 = vst [vmem:[#allocation53_spill] sm:$0xff] %v8297_v50  ;;  %v8301_v37 = vld [vmem:[%s7631_s22 + $0x12c] ss:$16 sps:$4 sm:$0xff]  }
 0x410   : > { %9876 = vst [vmem:[#allocation54_spill] sm:$0xff] %v8301_v37 }
 0x412   : > { %3617 = vmatpush2.bf16.msra.mxu0 %v8216_v25  ;;  %3658 = vmatpush2.bf16.msra.mxu1 %v8276_v40  ;;  %v8310_v40 = vld [vmem:[%s7631_s22 + $0x128] ss:$16 sps:$4 sm:$0xff]  }
 0x413   : > { %3618 = vmatprep.subr.bf16.mxu0 %v8224_v34  ;;  %3659 = vmatprep.subr.bf16.mxu1 %v8284_v43  ;;  %9878 = vst [vmem:[#allocation56_spill] sm:$0xff] %v8310_v40  ;;  %v8318_v43 = vld [vmem:[%s7631_s22 + $0x10c] ss:$16 sps:$4 sm:$0xff]  }
 0x414   : > { %9880 = vst [vmem:[#allocation58_spill] sm:$0xff] %v8318_v43 }
 0x416   : > { %3619 = vmatpush2.bf16.msra.mxu0 %v8232_v29  ;;  %3660 = vmatpush2.bf16.msra.mxu1 %v8293_v45  ;;  %v8330_v45 = vld [vmem:[%s7637_s0 + $0x40] ss:$8 sps:$4 sm:$0xff]  }
 0x417   : > { %3620 = vmatprep.subr.bf16.mxu0 %v8240_v61  ;;  %3661 = vmatprep.subr.bf16.mxu1 %v8301_v37  ;;  %9883 = vst [vmem:[#allocation61_spill] sm:$0xff] %v8330_v45 }
 0x41a   : > { %3621 = vmatpush2.bf16.msra.mxu0 %v8248_v32  ;;  %3662 = vmatpush2.bf16.msra.mxu1 %v8310_v40  ;;  %v9887_v40 = vmov 0  }
 0x41b   : > { %3622 = vmatprep.subr.bf16.mxu0 %v8256_v35  ;;  %3663 = vmatprep.subr.bf16.mxu1 %v8318_v43 }
 0x41e   : > { %3623 = vmatpush2.bf16.msra.mxu0 %v8264_v36 }
 0x41f   : > { %3862 = vmatprep.subr.bf16.mxu0 %v8272_v38 }
 0x421   : > { %3625 = vmatmul.mubr.bf16.vlgmr.msra.gmra.mxu0 %v9601_v48 }
 0x422   : > { %3863 = vmatpush1.bf16.msra.mxu0 %v8280_v42  ;;  %3894 = vmatprep.mubr.bf16.mxu0 %v9601_v48  ;;  %v8314_v42 = vld [vmem:[%s7637_s0 + $0x50] ss:$8 sps:$4 sm:$0xff]  }
 0x423   : > { %3864 = vmatprep.subr.bf16.mxu0 %v8288_v44  ;;  %9879 = vst [vmem:[#allocation57_spill] sm:$0xff] %v8314_v42  ;;  %v8322_v44 = vld [vmem:[%s7637_s0 + $0x44] ss:$8 sps:$4 sm:$0xff]   ;;  %v8326_v48 = vld [vmem:[%s7631_s22 + $0x108] ss:$16 sps:$4 sm:$0xff]  }
 0x424   : > { %9881 = vst [vmem:[#allocation59_spill] sm:$0xff] %v8322_v44  ;;  %9882 = vst [vmem:[#allocation60_spill] sm:$0xff] %v8326_v48  ;;  %3664 = vmatpush2.bf16.msra.mxu1 %v8326_v48 }
 0x425   : > { %3938 = vmatprep.subr.bf16.mxu1 %v8045_v46 }
 0x426   : > { %3865 = vmatpush1.bf16.msra.mxu0 %v8297_v50  ;;  %v8335_v50 = vld [vmem:[%s7637_s0 + $0x34] ss:$8 sps:$4 sm:$0xff]  }
 0x427   : > { %3866 = vmatprep.subr.bf16.mxu0 %v8305_v33  ;;  %9884 = vst [vmem:[#allocation62_spill] sm:$0xff] %v8335_v50  ;;  %v8340_v33 = vld [vmem:[%s7637_s0 + $0x30] ss:$8 sps:$4 sm:$0xff]   ;;  %3666 = vmatmul.mubr.bf16.vlgmr.msra.gmra.mxu1 %v9887_v40 }
 0x428   : > { %9885 = vst [vmem:[#allocation63_spill] sm:$0xff] %v8340_v33  ;;  %3939 = vmatpush1.bf16.msra.mxu1 %v8048_v47 }
 0x429   : > { %3940 = vmatprep.subr.bf16.mxu1 %v8054_v49 }
 0x42a   : > { %3867 = vmatpush1.bf16.msra.mxu0 %v8314_v42  ;;  %v8345_v42 = vld [vmem:[%s7637_s0 + $0x24] ss:$8 sps:$4 sm:$0xff]  }
 0x42b   : > { %3868 = vmatprep.subr.bf16.mxu0 %v8322_v44  ;;  %9886 = vst [vmem:[#allocation64_spill] sm:$0xff] %v8345_v42  ;;  %v8351_v44 = vld [vmem:[%s7637_s0 + $0x20] ss:$8 sps:$4 sm:$0xff]  }
 0x42c   : > { %9888 = vst [vmem:[#allocation65_spill] sm:$0xff] %v8351_v44  ;;  %3941 = vmatpush1.bf16.msra.mxu1 %v8058_v51 }
 0x42d   : > { %3942 = vmatprep.subr.bf16.mxu1 %v8062_v52 }
 0x42e   : > { %3869 = vmatpush1.bf16.msra.mxu0 %v8330_v45  ;;  %v8356_v45 = vld [vmem:[%s7637_s0 + $0x14] ss:$8 sps:$4 sm:$0xff]  }
 0x42f   : > { %3870 = vmatprep.subr.bf16.mxu0 %v8335_v50  ;;  %9889 = vst [vmem:[#allocation66_spill] sm:$0xff] %v8356_v45  ;;  %v8361_v50 = vld [vmem:[%s7637_s0 + $0x10] ss:$8 sps:$4 sm:$0xff]  }
 0x430   : > { %9890 = vst [vmem:[#allocation67_spill] sm:$0xff] %v8361_v50  ;;  %3943 = vmatpush1.bf16.msra.mxu1 %v8066_v53 }
 0x431   : > { %3944 = vmatprep.subr.bf16.mxu1 %v8070_v54 }
 0x432   : > { %3871 = vmatpush1.bf16.msra.mxu0 %v8340_v33  ;;  %v8366_v33 = vld [vmem:[%s7637_s0 + $0x4] ss:$8 sps:$4 sm:$0xff]  }
 0x433   : > { %3872 = vmatprep.subr.bf16.mxu0 %v8345_v42  ;;  %9891 = vst [vmem:[#allocation68_spill] sm:$0xff] %v8366_v33  ;;  %v8371_v42 = vld [vmem:[%s7637_s0] ss:$8 sps:$4 sm:$0xff]  }
 0x434   : > { %9892 = vst [vmem:[#allocation69_spill] sm:$0xff] %v8371_v42  ;;  %3945 = vmatpush1.bf16.msra.mxu1 %v8074_v55 }
 0x435   : > { %3946 = vmatprep.subr.bf16.mxu1 %v8078_v56 }
 0x436   : > { %3873 = vmatpush1.bf16.msra.mxu0 %v8351_v44  ;;  %v8376_v44 = vld [vmem:[%s7637_s0 + $0xf4] ss:$8 sps:$4 sm:$0xff]  }
 0x437   : > { %3874 = vmatprep.subr.bf16.mxu0 %v8356_v45  ;;  %9893 = vst [vmem:[#allocation70_spill] sm:$0xff] %v8376_v44  ;;  %v8381_v45 = vld [vmem:[%s7637_s0 + $0xf0] ss:$8 sps:$4 sm:$0xff]  }
 0x438   : > { %9894 = vst [vmem:[#allocation71_spill] sm:$0xff] %v8381_v45  ;;  %3947 = vmatpush1.bf16.msra.mxu1 %v8081_v57 }
 0x439   : > { %3948 = vmatprep.subr.bf16.mxu1 %v8092_v6 }
 0x43a   : > { %3875 = vmatpush1.bf16.msra.mxu0 %v8361_v50  ;;  %v8386_v50 = vld [vmem:[%s7637_s0 + $0xe4] ss:$8 sps:$4 sm:$0xff]  }
 0x43b   : > { %3876 = vmatprep.subr.bf16.mxu0 %v8366_v33  ;;  %9895 = vst [vmem:[#allocation72_spill] sm:$0xff] %v8386_v50  ;;  %v8391_v33 = vld [vmem:[%s7637_s0 + $0xe0] ss:$8 sps:$4 sm:$0xff]  }
 0x43c   : > { %9896 = vst [vmem:[#allocation73_spill] sm:$0xff] %v8391_v33  ;;  %3949 = vmatpush1.bf16.msra.mxu1 %v8104_v19 }
 0x43d   : > { %3950 = vmatprep.subr.bf16.mxu1 %v8107_v23 }
 0x43e   : > { %3877 = vmatpush1.bf16.msra.mxu0 %v8371_v42  ;;  %v8396_v42 = vld [vmem:[%s7637_s0 + $0xd4] ss:$8 sps:$4 sm:$0xff]  }
 0x43f   : > { %3878 = vmatprep.subr.bf16.mxu0 %v8376_v44  ;;  %9897 = vst [vmem:[#allocation74_spill] sm:$0xff] %v8396_v42  ;;  %v8401_v44 = vld [vmem:[%s7637_s0 + $0xd0] ss:$8 sps:$4 sm:$0xff]  }
 0x440   : > { %9898 = vst [vmem:[#allocation75_spill] sm:$0xff] %v8401_v44  ;;  %3951 = vmatpush1.bf16.msra.mxu1 %v8120_v2 }
 0x441   : > { %3952 = vmatprep.subr.bf16.mxu1 %v8128_v4 }
 0x442   : > { %3879 = vmatpush2.bf16.msra.mxu0 %v8381_v45  ;;  %v8406_v45 = vld [vmem:[%s7637_s0 + $0xc4] ss:$8 sps:$4 sm:$0xff]  }
 0x443   : > { %3880 = vmatprep.subr.bf16.mxu0 %v8386_v50  ;;  %9899 = vst [vmem:[#allocation76_spill] sm:$0xff] %v8406_v45  ;;  %v8411_v50 = vld [vmem:[%s7637_s0 + $0xc0] ss:$8 sps:$4 sm:$0xff]  }
 0x444   : > { %9900 = vst [vmem:[#allocation77_spill] sm:$0xff] %v8411_v50  ;;  %3953 = vmatpush1.bf16.msra.mxu1 %v8136_v8 }
 0x445   : > { %3954 = vmatprep.subr.bf16.mxu1 %v8144_v11 }
 0x446   : > { %3881 = vmatpush2.bf16.msra.mxu0 %v8391_v33  ;;  %v8416_v33 = vld [vmem:[%s7637_s0 + $0xb4] ss:$8 sps:$4 sm:$0xff]  }
 0x447   : > { %3882 = vmatprep.subr.bf16.mxu0 %v8396_v42  ;;  %9901 = vst [vmem:[#allocation78_spill] sm:$0xff] %v8416_v33  ;;  %v8421_v42 = vld [vmem:[%s7637_s0 + $0xb0] ss:$8 sps:$4 sm:$0xff]  }
 0x448   : > { %9902 = vst [vmem:[#allocation79_spill] sm:$0xff] %v8421_v42  ;;  %3955 = vmatpush2.bf16.msra.mxu1 %v8152_v14  ;;  %v8446_v14 = vld [vmem:[%s7637_s0 + $0x84] ss:$8 sps:$4 sm:$0xff]  }
 0x449   : > { %3956 = vmatprep.subr.bf16.mxu1 %v8160_v18 }
 0x44a   : > { %3883 = vmatpush2.bf16.msra.mxu0 %v8401_v44  ;;  %v8426_v44 = vld [vmem:[%s7637_s0 + $0xa4] ss:$8 sps:$4 sm:$0xff]  }
 0x44b   : > { %3884 = vmatprep.subr.bf16.mxu0 %v8406_v45  ;;  %v8431_v45 = vld [vmem:[%s7637_s0 + $0xa0] ss:$8 sps:$4 sm:$0xff]  }
 0x44c   : > { %3957 = vmatpush2.bf16.msra.mxu1 %v8168_v20 }
 0x44d   : > { %3958 = vmatprep.subr.bf16.mxu1 %v8176_v7 }
 0x44e   : > { %3885 = vmatpush2.bf16.msra.mxu0 %v8411_v50  ;;  %v8436_v50 = vld [vmem:[%s7637_s0 + $0x94] ss:$8 sps:$4 sm:$0xff]  }
 0x44f   : > { %3886 = vmatprep.subr.bf16.mxu0 %v8416_v33  ;;  %v8441_v33 = vld [vmem:[%s7637_s0 + $0x90] ss:$8 sps:$4 sm:$0xff]  }
 0x450   : > { %3959 = vmatpush2.bf16.msra.mxu1 %v8184_v62 }
 0x451   : > { %3960 = vmatprep.subr.bf16.mxu1 %v8192_v1 }
 0x452   : > { %3887 = vmatpush2.bf16.msra.mxu0 %v8421_v42  ;;  %v8451_v42 = vld [vmem:[%s7637_s0 + $0x80] ss:$8 sps:$4 sm:$0xff]  }
 0x453   : > { %3888 = vmatprep.subr.bf16.mxu0 %v8426_v44 }
 0x454   : > { %3961 = vmatpush2.bf16.msra.mxu1 %v8200_v22 }
 0x455   : > { %3962 = vmatprep.subr.bf16.mxu1 %v8208_v24 }
 0x456   : > { %3889 = vmatpush2.bf16.msra.mxu0 %v8431_v45 }
 0x457   : > { %3890 = vmatprep.subr.bf16.mxu0 %v8436_v50 }
 0x458   : > { %3963 = vmatpush2.bf16.msra.mxu1 %v8216_v25 }
 0x459   : > { %3964 = vmatprep.subr.bf16.mxu1 %v8224_v34 }
 0x45a   : > { %3891 = vmatpush2.bf16.msra.mxu0 %v8441_v33 }
 0x45b   : > { %3892 = vmatprep.subr.bf16.mxu0 %v8446_v14 }
 0x45c   : > { %3965 = vmatpush2.bf16.msra.mxu1 %v8232_v29 }
 0x45d   : > { %3966 = vmatprep.subr.bf16.mxu1 %v8240_v61 }
 0x45e   : > { %3893 = vmatpush2.bf16.msra.mxu0 %v8451_v42 }
 0x45f   : > { %3979 = vmatprep.subr.bf16.mxu0 %v8085_v58 }
 0x460   : > { %3967 = vmatpush2.bf16.msra.mxu1 %v8248_v32 }
 0x461   : > { %3895 = vmatmul.mubr.bf16.vlgmr.msra.gmra.mxu0 %v9887_v40  ;;  %3968 = vmatprep.subr.bf16.mxu1 %v8256_v35  ;;  %v9903_v40 = vld [vmem:[#allocation45_spill] sm:$0xff] }
 0x462   : > { %3980 = vmatpush1.bf16.msra.mxu0 %v8088_v59 }
 0x463   : > { %3981 = vmatprep.subr.bf16.mxu0 %v8097_v12 }
 0x464   : > { %3969 = vmatpush2.bf16.msra.mxu1 %v8264_v36 }
 0x465   : > { %4048 = vmatprep.subr.bf16.mxu1 %v8272_v38 }
 0x466   : > { %3982 = vmatpush1.bf16.msra.mxu0 %v8100_v15 }
 0x467   : > { %3983 = vmatprep.subr.bf16.mxu0 %v8112_v30 }
 0x46a   : > { %3984 = vmatpush1.bf16.msra.mxu0 %v8116_v60 }
 0x46b   : > { %3985 = vmatprep.subr.bf16.mxu0 %v8124_v39 }
 0x46e   : > { %3986 = vmatpush1.bf16.msra.mxu0 %v8132_v5 }
 0x46f   : > { %3987 = vmatprep.subr.bf16.mxu0 %v8140_v9 }
 0x472   : > { %3988 = vmatpush1.bf16.msra.mxu0 %v8148_v13  ;;  %v3269_v13 = vld [vmem:[#allocation2 + $0x48] sm:$0xff] }
 0x473   : > { %3989 = vmatprep.subr.bf16.mxu0 %v8156_v16 }
 0x476   : > { %3990 = vmatpush1.bf16.msra.mxu0 %v8164_v41 }
 0x477   : > { %3991 = vmatprep.subr.bf16.mxu0 %v8172_v0  ;;  %v9904_v0 = vld [vmem:[#allocation46_spill] sm:$0xff] }
 0x47a   : > { %3992 = vmatpush1.bf16.msra.mxu0 %v8180_v10  ;;  %v9905_v10 = vld [vmem:[#allocation47_spill] sm:$0xff] }
 0x47b   : > { %3993 = vmatprep.subr.bf16.mxu0 %v8188_v21  ;;  %v9906_v21 = vld [vmem:[#allocation48_spill] sm:$0xff] }
 0x47e   : > { %3994 = vmatpush1.bf16.msra.mxu0 %v8196_v3  ;;  %v9907_v3 = vld [vmem:[#allocation50_spill] sm:$0xff] }
 0x47f   : > { %3995 = vmatprep.subr.bf16.mxu0 %v8204_v17  ;;  %v9908_v17 = vld [vmem:[#allocation52_spill] sm:$0xff] }
 0x482   : > { %3996 = vmatpush2.bf16.msra.mxu0 %v8212_v28  ;;  %v3266_v28 = vld [vmem:[#allocation2 + $0xb0] sm:$0xff] }
 0x483   : > { %3997 = vmatprep.subr.bf16.mxu0 %v8220_v26  ;;  %v9909_v26 = vld [vmem:[#allocation56_spill] sm:$0xff] }
 0x486   : > { %3998 = vmatpush2.bf16.msra.mxu0 %v8228_v27 }
 0x487   : > { %3999 = vmatprep.subr.bf16.mxu0 %v8236_v63 }
 0x48a   : > { %4000 = vmatpush2.bf16.msra.mxu0 %v8244_v31 }
 0x48b   : > { %4001 = vmatprep.subr.bf16.mxu0 %v9903_v40 }
 0x48e   : > { %4002 = vmatpush2.bf16.msra.mxu0 %v9904_v0 }
 0x48f   : > { %4003 = vmatprep.subr.bf16.mxu0 %v9905_v10 }
 0x492   : > { %4004 = vmatpush2.bf16.msra.mxu0 %v9906_v21 }
 0x493   : > { %4005 = vmatprep.subr.bf16.mxu0 %v9907_v3 }
 0x496   : > { %4006 = vmatpush2.bf16.msra.mxu0 %v9908_v17  ;;  %v3267_v17 = vld [vmem:[#allocation2 + $0xd0] sm:$0xff] }
 0x497   : > { %4007 = vmatprep.subr.bf16.mxu0 %v8301_v37 }
 0x49a   : > { %4008 = vmatpush2.bf16.msra.mxu0 %v9909_v26 }
 0x49b   : > { %4009 = vmatprep.subr.bf16.mxu0 %v8318_v43  ;;  %v3268_v43 = vld [vmem:[#allocation2 + $0x10] sm:$0xff] }
 0x49e   : > { %4010 = vmatpush2.bf16.msra.mxu0 %v8326_v48 }
 0x49f   : > { %4124 = vmatprep.subr.bf16.mxu0 %v8045_v46 }
 0x4e1   : > { %v3626_v40 = vpop.f32.mrf.mxu0 }
 0x4e2   : > { %v3674_v41 = vadd.f32 %v3626_v40, %v3266_v28 }
 0x4e3   : > { %v3628_v0 = vpop.f32.mrf.mxu0 }
 0x4e4   : > { %v3675_v37 = vadd.f32 %v3628_v0, %v3267_v17  ;;  %v5808_v16 = vmul.f32 -1.442695, %v3674_v41  ;;  %v3251_v17 = vld [vmem:[%s7645_s1] sm:$0x3] }
 0x4e5   : > { %v3630_v31 = vpop.f32.mrf.mxu0 }
 0x4e6   : > { %v5809_v26 = vmul.f32 -1.442695, %v3675_v37  ;;  %6607 = vpow2.f32 %v5808_v16 }
 0x4e7   : > { %v3631_v10 = vpop.f32.mrf.mxu0  ;;  %v3667_v63 = vpop.f32.mrf.mxu1 }
 0x4e8   : > { %6609 = vpow2.f32 %v5809_v26  ;;  %v3688_v48 = vadd.f32 %v3667_v63, %v3268_v43 }
 0x4e9   : > { %v3669_v21 = vpop.f32.mrf.mxu1 }
 0x4ea   : > { %v5810_v46 = vmul.f32 -1.442695, %v3688_v48  ;;  %v3689_v9 = vadd.f32 %v3669_v21, %v3269_v13 }
 0x4eb   : > { %v3671_v27 = vpop.f32.mrf.mxu1 }
 0x4ec   : > { %6611 = vpow2.f32 %v5810_v46  ;;  %v5811_v10 = vmul.f32 -1.442695, %v3689_v9 }
 0x4ed   : > { %v3672_v3 = vpop.f32.mrf.mxu1 }
 0x4ee   : > { %6613 = vpow2.f32 %v5811_v10  ;;  %v3253_v3 = vlaneseq }
 0x4f0   : > { %v3254_v0 = vshrl.u32 %v3253_v3, 7 }
 0x4f2   : > { %v3255_v41 = vsub.s32 0, %v3254_v0  ;;  %v3259_v28 = vsub.s32 1, %v3254_v0 }
 0x4f3   : > { %v6608_v31 = vpop.eup %6607 }
 0x4f4   : > { %v3682_v27 = vadd.f32 1.0, %v6608_v31  ;;  %v8501_v63 = vrot.slane %v3251_v17, %v3255_v41  ;;  %v8503_v13 = vrot.slane %v3251_v17, %v3259_v28  ;;  %v3271_v31 = vld [vmem:[#allocation2 + $0x128] sm:$0xff] }
 0x4f5   : > { %v6610_v5 = vpop.eup %6609 }
 0x4f6   : > { %v3683_v39 = vadd.f32 1.0, %v6610_v5  ;;  %6615 = vrcp.f32 %v3682_v27  ;;  %9910 = vst [vmem:[#allocation80_spill] sm:$0xff] %v8501_v63  ;;  %9911 = vst [vmem:[#allocation81_spill] sm:$0xff] %v8503_v13  ;;  %v3270_v5 = vld [vmem:[#allocation2 + $0x160] sm:$0xff] }
 0x4f8   : > { %6617 = vrcp.f32 %v3683_v39 }
 0x4f9   : > { %v6612_v16 = vpop.eup %6611 }
 0x4fa   : > { %v3696_v26 = vadd.f32 1.0, %v6612_v16 }
 0x4fb   : > { %v6614_v48 = vpop.eup %6613 }
 0x4fc   : > { %6619 = vrcp.f32 %v3696_v26  ;;  %v3697_v21 = vadd.f32 1.0, %v6614_v48 }
 0x4fe   : > { %6621 = vrcp.f32 %v3697_v21 }
 0x503   : > { %v6616_v43 = vpop.eup %6615 }
 0x505   : > { %v6618_v10 = vpop.eup %6617 }
 0x509   : > { %v6620_v17 = vpop.eup %6619 }
 0x50a   : > { %v3909_v28 = vsub.f32 1.0, %v6620_v17 }
 0x50b   : > { %v6622_v26 = vpop.eup %6621 }
 0x521   : > { %v3896_v9 = vpop.f32.mrf.mxu0 }
 0x522   : > { %v3897_v37 = vadd.f32 %v3896_v9, %v8501_v63  ;;  %v3910_v9 = vsub.f32 1.0, %v6622_v26 }
 0x523   : > { %v3898_v40 = vpop.f32.mrf.mxu0 }
 0x524   : > { %v3903_v46 = vmul.f32 %v6616_v43, %v3897_v37  ;;  %v3899_v39 = vadd.f32 %v3898_v40, %v8503_v13  ;;  %v3913_v37 = vmul.f32 0.0, %v6620_v17  ;;  %v3914_v40 = vmul.f32 0.0, %v6622_v26  ;;  %v9944_v17 = vld [vmem:[#allocation34_spill] sm:$0xff]  ;;  %v9950_v26 = vld [vmem:[#allocation40_spill] sm:$0xff] }
 0x525   : > { %v3900_v27 = vpop.f32.mrf.mxu0 }
 0x526   : > { %v3905_v3 = vadd.f32 %v3903_v46, %v3270_v5  ;;  %v3904_v0 = vmul.f32 %v6618_v10, %v3899_v39  ;;  %v9914_v39 = vld [vmem:[#allocation53_spill] sm:$0xff]  ;;  %v9915_v10 = vld [vmem:[#allocation55_spill] sm:$0xff] }
 0x527   : > { %v3901_v41 = vpop.f32.mrf.mxu0 }
 0x528   : > { %6623 = vtanh.f32 %v3905_v3  ;;  %v3906_v16 = vadd.f32 %v3904_v0, %v3271_v31  ;;  %v9916_v31 = vld [vmem:[#allocation57_spill] sm:$0xff]  ;;  %v9917_v3 = vld [vmem:[#allocation59_spill] sm:$0xff] }
 0x529   : > { %v9918_v0 = vld [vmem:[#allocation61_spill] sm:$0xff] }
 0x52a   : > { %6625 = vtanh.f32 %v3906_v16  ;;  %v9931_v41 = vld [vmem:[#allocation73_spill] sm:$0xff]  ;;  %v9936_v16 = vld [vmem:[#allocation78_spill] sm:$0xff] }
 0x535   : > { %v6624_v48 = vpop.eup %6623 }
 0x536   : > { %v3911_v63 = vmul.f32 %v6624_v48, %v3909_v28  ;;  %v9949_v28 = vld [vmem:[#allocation39_spill] sm:$0xff]  ;;  %v9951_v48 = vld [vmem:[#allocation41_spill] sm:$0xff] }
 0x537   : > { %v6626_v60 = vpop.eup %6625 }
 0x538   : > { %v3912_v43 = vmul.f32 %v6626_v60, %v3910_v9  ;;  %v8507_v13 = vadd.f32 %v3913_v37, %v3911_v63  ;;  %v9912_v60 = vld [vmem:[#allocation49_spill] sm:$0xff]  ;;  %v9913_v63 = vld [vmem:[#allocation51_spill] sm:$0xff]  ;;  %v9952_v9 = vld [vmem:[#allocation42_spill] sm:$0xff] }
 0x539   : > { %v9953_v37 = vld [vmem:[#allocation43_spill] sm:$0xff] }
 0x53a   : > { %v8509_v27 = vadd.f32 %v3914_v40, %v3912_v43  ;;  %v8517_v46 = vpack.c.bf16 %v8507_v13, %v8507_v13  ;;  %v9954_v43 = vld [vmem:[#allocation44_spill] sm:$0xff]  ;;  %v9955_v40 = vld [vmem:[#allocation45_spill] sm:$0xff] }
 0x53c   : > { %v3918_v21 = vpack.c.bf16 %v8509_v27, %v8509_v27  ;;  %v5886_v5 = vpack.c.bf16 %v8509_v27, %v8507_v13 }
 0x53e   : > { %3970 = vmatprep.mubr.bf16.mxu1 %v3918_v21  ;;  %4011 = vmatprep.mubr.bf16.mxu0 %v3918_v21  ;;  %3928 = vst [vmem:[#allocation3 + $0x18] sm:$0xff] %v5886_v5  ;;  %v9957_v5 = vld [vmem:[#allocation47_spill] sm:$0xff] }
 0x53f   : > { %3971 = vmatmul.mubr.bf16.vlgmr.msra.gmra.mxu1 %v8517_v46  ;;  %4012 = vmatmul.mubr.bf16.vlgmr.msra.gmra.mxu0 %v8517_v46 }
 0x540   : > { %4049 = vmatpush1.bf16.msra.mxu1 %v9912_v60  ;;  %4080 = vmatprep.mubr.bf16.mxu1 %v3918_v21  ;;  %v9956_v21 = vld [vmem:[#allocation46_spill] sm:$0xff] }
 0x541   : > { %4050 = vmatprep.subr.bf16.mxu1 %v9913_v63  ;;  %4125 = vmatpush1.bf16.msra.mxu0 %v8048_v47  ;;  %v9919_v47 = vld [vmem:[#allocation62_spill] sm:$0xff] }
 0x542   : > { %4126 = vmatprep.subr.bf16.mxu0 %v8054_v49  ;;  %v9920_v49 = vld [vmem:[#allocation63_spill] sm:$0xff] }
 0x544   : > { %4051 = vmatpush1.bf16.msra.mxu1 %v9914_v39 }
 0x545   : > { %4052 = vmatprep.subr.bf16.mxu1 %v9915_v10  ;;  %4127 = vmatpush1.bf16.msra.mxu0 %v8058_v51  ;;  %v9921_v51 = vld [vmem:[#allocation64_spill] sm:$0xff] }
 0x546   : > { %4128 = vmatprep.subr.bf16.mxu0 %v8062_v52  ;;  %v9922_v52 = vld [vmem:[#allocation65_spill] sm:$0xff] }
 0x548   : > { %4053 = vmatpush1.bf16.msra.mxu1 %v9916_v31 }
 0x549   : > { %4054 = vmatprep.subr.bf16.mxu1 %v9917_v3  ;;  %4129 = vmatpush1.bf16.msra.mxu0 %v8066_v53  ;;  %v9923_v53 = vld [vmem:[#allocation66_spill] sm:$0xff] }
 0x54a   : > { %4130 = vmatprep.subr.bf16.mxu0 %v8070_v54  ;;  %v9924_v54 = vld [vmem:[#allocation67_spill] sm:$0xff] }
 0x54c   : > { %4055 = vmatpush1.bf16.msra.mxu1 %v9918_v0 }
 0x54d   : > { %4056 = vmatprep.subr.bf16.mxu1 %v9919_v47  ;;  %4131 = vmatpush1.bf16.msra.mxu0 %v8074_v55  ;;  %v9925_v55 = vld [vmem:[#allocation68_spill] sm:$0xff] }
 0x54e   : > { %4132 = vmatprep.subr.bf16.mxu0 %v8078_v56  ;;  %v9926_v56 = vld [vmem:[#allocation69_spill] sm:$0xff] }
 0x550   : > { %4057 = vmatpush1.bf16.msra.mxu1 %v9920_v49 }
 0x551   : > { %4058 = vmatprep.subr.bf16.mxu1 %v9921_v51  ;;  %4133 = vmatpush1.bf16.msra.mxu0 %v8081_v57  ;;  %v9927_v57 = vld [vmem:[#allocation70_spill] sm:$0xff] }
 0x552   : > { %4134 = vmatprep.subr.bf16.mxu0 %v8092_v6  ;;  %v9928_v6 = vld [vmem:[#allocation71_spill] sm:$0xff] }
 0x554   : > { %4059 = vmatpush1.bf16.msra.mxu1 %v9922_v52 }
 0x555   : > { %4060 = vmatprep.subr.bf16.mxu1 %v9923_v53  ;;  %4135 = vmatpush1.bf16.msra.mxu0 %v8104_v19  ;;  %v9929_v19 = vld [vmem:[#allocation72_spill] sm:$0xff] }
 0x556   : > { %4136 = vmatprep.subr.bf16.mxu0 %v8107_v23  ;;  %v9930_v23 = vld [vmem:[#allocation32_spill] sm:$0xff] }
 0x558   : > { %4061 = vmatpush1.bf16.msra.mxu1 %v9924_v54 }
 0x559   : > { %4062 = vmatprep.subr.bf16.mxu1 %v9925_v55  ;;  %4137 = vmatpush1.bf16.msra.mxu0 %v8120_v2  ;;  %v9932_v2 = vld [vmem:[#allocation74_spill] sm:$0xff] }
 0x55a   : > { %4138 = vmatprep.subr.bf16.mxu0 %v8128_v4  ;;  %v9933_v4 = vld [vmem:[#allocation75_spill] sm:$0xff] }
 0x55c   : > { %4063 = vmatpush1.bf16.msra.mxu1 %v9926_v56 }
 0x55d   : > { %4064 = vmatprep.subr.bf16.mxu1 %v9927_v57  ;;  %4139 = vmatpush1.bf16.msra.mxu0 %v8136_v8  ;;  %v9934_v8 = vld [vmem:[#allocation76_spill] sm:$0xff] }
 0x55e   : > { %4140 = vmatprep.subr.bf16.mxu0 %v8144_v11  ;;  %v9935_v11 = vld [vmem:[#allocation77_spill] sm:$0xff] }
 0x560   : > { %4065 = vmatpush2.bf16.msra.mxu1 %v9928_v6 }
 0x561   : > { %4066 = vmatprep.subr.bf16.mxu1 %v9929_v19  ;;  %4141 = vmatpush2.bf16.msra.mxu0 %v9930_v23  ;;  %v9959_v23 = vld [vmem:[#allocation50_spill] sm:$0xff] }
 0x562   : > { %4142 = vmatprep.subr.bf16.mxu0 %v8160_v18  ;;  %v9937_v18 = vld [vmem:[#allocation79_spill] sm:$0xff] }
 0x564   : > { %4067 = vmatpush2.bf16.msra.mxu1 %v9931_v41 }
 0x565   : > { %4068 = vmatprep.subr.bf16.mxu1 %v9932_v2  ;;  %4143 = vmatpush2.bf16.msra.mxu0 %v8168_v20  ;;  %v9938_v20 = vld [vmem:[#allocation27_spill] sm:$0xff] }
 0x566   : > { %4144 = vmatprep.subr.bf16.mxu0 %v8176_v7  ;;  %v9939_v7 = vld [vmem:[#allocation28_spill] sm:$0xff] }
 0x568   : > { %4069 = vmatpush2.bf16.msra.mxu1 %v9933_v4 }
 0x569   : > { %4070 = vmatprep.subr.bf16.mxu1 %v9934_v8  ;;  %4145 = vmatpush2.bf16.msra.mxu0 %v8184_v62  ;;  %v9940_v62 = vld [vmem:[#allocation29_spill] sm:$0xff] }
 0x56a   : > { %4146 = vmatprep.subr.bf16.mxu0 %v8192_v1  ;;  %v9942_v1 = vld [vmem:[#allocation31_spill] sm:$0xff] }
 0x56c   : > { %4071 = vmatpush2.bf16.msra.mxu1 %v9935_v11 }
 0x56d   : > { %4072 = vmatprep.subr.bf16.mxu1 %v9936_v16  ;;  %4147 = vmatpush2.bf16.msra.mxu0 %v8200_v22  ;;  %v9943_v22 = vld [vmem:[#allocation33_spill] sm:$0xff] }
 0x56e   : > { %4148 = vmatprep.subr.bf16.mxu0 %v8208_v24 }
 0x570   : > { %4073 = vmatpush2.bf16.msra.mxu1 %v9937_v18 }
 0x571   : > { %4074 = vmatprep.subr.bf16.mxu1 %v8426_v44  ;;  %4149 = vmatpush2.bf16.msra.mxu0 %v8216_v25 }
 0x572   : > { %4150 = vmatprep.subr.bf16.mxu0 %v8224_v34 }
 0x574   : > { %4075 = vmatpush2.bf16.msra.mxu1 %v8431_v45 }
 0x575   : > { %4076 = vmatprep.subr.bf16.mxu1 %v8436_v50  ;;  %4151 = vmatpush2.bf16.msra.mxu0 %v8232_v29 }
 0x576   : > { %4152 = vmatprep.subr.bf16.mxu0 %v8240_v61 }
 0x578   : > { %4077 = vmatpush2.bf16.msra.mxu1 %v8441_v33 }
 0x579   : > { %4078 = vmatprep.subr.bf16.mxu1 %v8446_v14  ;;  %4153 = vmatpush2.bf16.msra.mxu0 %v8248_v32 }
 0x57a   : > { %4154 = vmatprep.subr.bf16.mxu0 %v8256_v35 }
 0x57c   : > { %4079 = vmatpush2.bf16.msra.mxu1 %v8451_v42 }
 0x57d   : > { %4165 = vmatprep.subr.bf16.mxu1 %v8085_v58  ;;  %4155 = vmatpush2.bf16.msra.mxu0 %v8264_v36  ;;  %v9941_v58 = vld [vmem:[#allocation30_spill] sm:$0xff] }
 0x57e   : > { %4234 = vmatprep.subr.bf16.mxu0 %v8272_v38 }
 0x57f   : > { %4081 = vmatmul.mubr.bf16.vlgmr.msra.gmra.mxu1 %v8517_v46  ;;  %v9958_v46 = vld [vmem:[#allocation48_spill] sm:$0xff] }
 0x580   : > { %4166 = vmatpush1.bf16.msra.mxu1 %v8088_v59  ;;  %v9945_v59 = vld [vmem:[#allocation35_spill] sm:$0xff] }
 0x581   : > { %4167 = vmatprep.subr.bf16.mxu1 %v8097_v12  ;;  %v9946_v12 = vld [vmem:[#allocation36_spill] sm:$0xff] }
 0x584   : > { %4168 = vmatpush1.bf16.msra.mxu1 %v8100_v15  ;;  %v9947_v15 = vld [vmem:[#allocation37_spill] sm:$0xff] }
 0x585   : > { %4169 = vmatprep.subr.bf16.mxu1 %v8112_v30  ;;  %v9948_v30 = vld [vmem:[#allocation38_spill] sm:$0xff] }
 0x588   : > { %4170 = vmatpush1.bf16.msra.mxu1 %v9938_v20  ;;  %v9960_v20 = vld [vmem:[#allocation52_spill] sm:$0xff] }
 0x589   : > { %4171 = vmatprep.subr.bf16.mxu1 %v9939_v7  ;;  %v9961_v7 = vld [vmem:[#allocation54_spill] sm:$0xff] }
 0x58c   : > { %4172 = vmatpush1.bf16.msra.mxu1 %v9940_v62  ;;  %v9962_v62 = vld [vmem:[#allocation56_spill] sm:$0xff] }
 0x58d   : > { %4173 = vmatprep.subr.bf16.mxu1 %v9941_v58  ;;  %v9963_v58 = vld [vmem:[#allocation58_spill] sm:$0xff] }
 0x590   : > { %4174 = vmatpush1.bf16.msra.mxu1 %v9942_v1  ;;  %v9964_v1 = vld [vmem:[#allocation60_spill] sm:$0xff] }
 0x591   : > { %4175 = vmatprep.subr.bf16.mxu1 %v9943_v22  ;;  %v8618_v22 = vld [vmem:[%s7631_s22 + $0xe4] ss:$16 sps:$4 sm:$0xff]  }
 0x592   : > { %9965 = vst [vmem:[#allocation49_spill] sm:$0xff] %v8618_v22 }
 0x594   : > { %4176 = vmatpush1.bf16.msra.mxu1 %v9944_v17 }
 0x595   : > { %4177 = vmatprep.subr.bf16.mxu1 %v9945_v59 }
 0x598   : > { %4178 = vmatpush1.bf16.msra.mxu1 %v9946_v12 }
 0x599   : > { %4179 = vmatprep.subr.bf16.mxu1 %v9947_v15 }
 0x59c   : > { %4180 = vmatpush1.bf16.msra.mxu1 %v9948_v30 }
 0x59d   : > { %4181 = vmatprep.subr.bf16.mxu1 %v9949_v28 }
 0x5a0   : > { %4182 = vmatpush2.bf16.msra.mxu1 %v9950_v26 }
 0x5a1   : > { %4183 = vmatprep.subr.bf16.mxu1 %v9951_v48 }
 0x5a4   : > { %4184 = vmatpush2.bf16.msra.mxu1 %v9952_v9  ;;  %v3932_v9 = vld [vmem:[#allocation2 + $0x40] sm:$0xff] }
 0x5a5   : > { %4185 = vmatprep.subr.bf16.mxu1 %v9953_v37  ;;  %v3933_v37 = vld [vmem:[#allocation2 + $0x178] sm:$0xff] }
 0x5a8   : > { %4186 = vmatpush2.bf16.msra.mxu1 %v9954_v43 }
 0x5a9   : > { %4187 = vmatprep.subr.bf16.mxu1 %v9955_v40 }
 0x5ac   : > { %4188 = vmatpush2.bf16.msra.mxu1 %v9956_v21 }
 0x5ad   : > { %4189 = vmatprep.subr.bf16.mxu1 %v9957_v5 }
 0x5b0   : > { %4190 = vmatpush2.bf16.msra.mxu1 %v9958_v46 }
 0x5b1   : > { %4191 = vmatprep.subr.bf16.mxu1 %v9959_v23 }
 0x5b4   : > { %4192 = vmatpush2.bf16.msra.mxu1 %v9960_v20  ;;  %v3935_v20 = vld [vmem:[#allocation2 + $0x110] sm:$0xff] }
 0x5b5   : > { %4193 = vmatprep.subr.bf16.mxu1 %v9961_v7 }
 0x5b8   : > { %4194 = vmatpush2.bf16.msra.mxu1 %v9962_v62 }
 0x5b9   : > { %4195 = vmatprep.subr.bf16.mxu1 %v9963_v58 }
 0x5bc   : > { %4196 = vmatpush2.bf16.msra.mxu1 %v9964_v1  ;;  %v3934_v1 = vld [vmem:[#allocation2 + $0x108] sm:$0xff] }
 0x5bd   : > { %4310 = vmatprep.subr.bf16.mxu1 %v8618_v22 }
 0x5ff   : > { %v3972_v17 = vpop.f32.mrf.mxu1  ;;  %v4013_v59 = vpop.f32.mrf.mxu0 }
 0x600   : > { %v4020_v43 = vadd.f32 %v3972_v17, %v3932_v9  ;;  %v4034_v23 = vadd.f32 %v4013_v59, %v3934_v1  ;;  %v3936_v1 = vld [vmem:[#allocation2 + $0x90] sm:$0xff] }
 0x601   : > { %v3974_v12 = vpop.f32.mrf.mxu1  ;;  %v4015_v15 = vpop.f32.mrf.mxu0 }
 0x602   : > { %v4021_v62 = vadd.f32 %v3974_v12, %v3933_v37  ;;  %v5845_v7 = vmul.f32 -1.442695, %v4020_v43  ;;  %v4035_v22 = vadd.f32 %v4015_v15, %v3935_v20  ;;  %v5847_v46 = vmul.f32 -1.442695, %v4034_v23 }
 0x603   : > { %v3976_v30 = vpop.f32.mrf.mxu1  ;;  %v4017_v28 = vpop.f32.mrf.mxu0 }
 0x604   : > { %v5846_v58 = vmul.f32 -1.442695, %v4021_v62  ;;  %6627 = vpow2.f32 %v5845_v7  ;;  %v5848_v5 = vmul.f32 -1.442695, %v4035_v22  ;;  %v9967_v22 = vld [vmem:[#allocation81_spill] sm:$0xff] }
 0x605   : > { %v3977_v26 = vpop.f32.mrf.mxu1  ;;  %v4018_v48 = vpop.f32.mrf.mxu0 }
 0x606   : > { %6629 = vpow2.f32 %v5846_v58  ;;  %v9966_v58 = vld [vmem:[#allocation80_spill] sm:$0xff] }
 0x607   : > { %6631 = vpow2.f32 %v5847_v46 }
 0x608   : > { %6633 = vpow2.f32 %v5848_v5 }
 0x611   : > { %v6628_v21 = vpop.eup %6627 }
 0x612   : > { %v4028_v28 = vadd.f32 1.0, %v6628_v21  ;;  %v3937_v21 = vld [vmem:[#allocation2 + $0x118] sm:$0xff] }
 0x613   : > { %v6630_v30 = vpop.eup %6629 }
 0x614   : > { %v4029_v26 = vadd.f32 1.0, %v6630_v30  ;;  %6635 = vrcp.f32 %v4028_v28  ;;  %v6632_v17 = vpop.eup %6631 }
 0x615   : > { %v6634_v12 = vpop.eup %6633  ;;  %v4042_v48 = vadd.f32 1.0, %v6632_v17 }
 0x616   : > { %6637 = vrcp.f32 %v4029_v26  ;;  %v4043_v7 = vadd.f32 1.0, %v6634_v12 }
 0x617   : > { %6639 = vrcp.f32 %v4042_v48 }
 0x618   : > { %6641 = vrcp.f32 %v4043_v7 }
 0x621   : > { %v6636_v37 = vpop.eup %6635 }
 0x623   : > { %v6638_v59 = vpop.eup %6637 }
 0x624   : > { %v6640_v26 = vpop.eup %6639 }
 0x625   : > { %v6642_v17 = vpop.eup %6641  ;;  %v4095_v12 = vsub.f32 1.0, %v6640_v26 }
 0x63f   : > { %v4082_v62 = vpop.f32.mrf.mxu1 }
 0x640   : > { %v4083_v9 = vadd.f32 %v4082_v62, %v9966_v58  ;;  %v4096_v58 = vsub.f32 1.0, %v6642_v17 }
 0x641   : > { %v4084_v20 = vpop.f32.mrf.mxu1 }
 0x642   : > { %v4089_v23 = vmul.f32 %v6636_v37, %v4083_v9  ;;  %v4085_v46 = vadd.f32 %v4084_v20, %v9967_v22  ;;  %v4099_v9 = vmul.f32 %v6640_v26, %v8507_v13  ;;  %v4100_v20 = vmul.f32 %v6642_v17, %v8509_v27  ;;  %v8642_v13 = vld [vmem:[%s7631_s22 + $0xe0] ss:$16 sps:$4 sm:$0xff]   ;;  %v8646_v27 = vld [vmem:[%s7631_s22 + $0xc4] ss:$16 sps:$4 sm:$0xff]   ;;  %v10001_v26 = vld [vmem:[#allocation52_spill] sm:$0xff] }
 0x643   : > { %v4086_v5 = vpop.f32.mrf.mxu1  ;;  %v10002_v17 = vld [vmem:[#allocation54_spill] sm:$0xff] }
 0x644   : > { %v4091_v15 = vadd.f32 %v4089_v23, %v3936_v1  ;;  %v4090_v43 = vmul.f32 %v6638_v59, %v4085_v46  ;;  %v9996_v5 = vld [vmem:[#allocation45_spill] sm:$0xff] }
 0x645   : > { %v4087_v30 = vpop.f32.mrf.mxu1 }
 0x646   : > { %6643 = vtanh.f32 %v4091_v15  ;;  %v4092_v28 = vadd.f32 %v4090_v43, %v3937_v21  ;;  %v8857_v21 = vld [vmem:[%s7631_s22 + $0x1a8] ss:$16 sps:$4 sm:$0xff]   ;;  %v9998_v43 = vld [vmem:[#allocation47_spill] sm:$0xff] }
 0x647   : > { %9995 = vst [vmem:[#allocation29_spill] sm:$0xff] %v8857_v21  ;;  %v9997_v15 = vld [vmem:[#allocation46_spill] sm:$0xff]  ;;  %v9999_v30 = vld [vmem:[#allocation48_spill] sm:$0xff] }
 0x648   : > { %6645 = vtanh.f32 %v4092_v28  ;;  %v10000_v28 = vld [vmem:[#allocation50_spill] sm:$0xff] }
 0x653   : > { %v6644_v62 = vpop.eup %6643 }
 0x654   : > { %v4097_v40 = vmul.f32 %v6644_v62, %v4095_v12  ;;  %v10003_v12 = vld [vmem:[#allocation56_spill] sm:$0xff]  ;;  %v10004_v62 = vld [vmem:[#allocation58_spill] sm:$0xff] }
 0x655   : > { %v6646_v48 = vpop.eup %6645 }
 0x656   : > { %v4098_v37 = vmul.f32 %v6646_v48, %v4096_v58  ;;  %v8625_v7 = vadd.f32 %v4099_v9, %v4097_v40  ;;  %v8652_v40 = vld [vmem:[%s7631_s22 + $0xc0] ss:$16 sps:$4 sm:$0xff]   ;;  %v8746_v58 = vld [vmem:[%s7631_s22 + $0x184] ss:$16 sps:$4 sm:$0xff]   ;;  %v10005_v48 = vld [vmem:[#allocation60_spill] sm:$0xff] }
 0x657   : > { %9972 = vst [vmem:[#allocation59_spill] sm:$0xff] %v8746_v58  ;;  %v10006_v9 = vld [vmem:[#allocation49_spill] sm:$0xff] }
 0x658   : > { %v8627_v1 = vadd.f32 %v4100_v20, %v4098_v37  ;;  %v8635_v59 = vpack.c.bf16 %v8625_v7, %v8625_v7 }
 0x65a   : > { %v4104_v23 = vpack.c.bf16 %v8627_v1, %v8627_v1  ;;  %v5887_v46 = vpack.c.bf16 %v8627_v1, %v8625_v7 }
 0x65c   : > { %4156 = vmatprep.mubr.bf16.mxu0 %v4104_v23  ;;  %4197 = vmatprep.mubr.bf16.mxu1 %v4104_v23  ;;  %4114 = vst [vmem:[#allocation3 + $0x38] sm:$0xff] %v5887_v46 }
 0x65d   : > { %4157 = vmatmul.mubr.bf16.vlgmr.msra.gmra.mxu0 %v8635_v59  ;;  %4198 = vmatmul.mubr.bf16.vlgmr.msra.gmra.mxu1 %v8635_v59 }
 0x65e   : > { %4235 = vmatpush1.bf16.msra.mxu0 %v9912_v60  ;;  %4266 = vmatprep.mubr.bf16.mxu0 %v4104_v23  ;;  %v8656_v60 = vld [vmem:[%s7631_s22 + $0xa4] ss:$16 sps:$4 sm:$0xff]  }
 0x65f   : > { %4236 = vmatprep.subr.bf16.mxu0 %v9913_v63  ;;  %4311 = vmatpush1.bf16.msra.mxu1 %v8642_v13  ;;  %v8662_v63 = vld [vmem:[%s7631_s22 + $0xa0] ss:$16 sps:$4 sm:$0xff]  }
 0x660   : > { %4312 = vmatprep.subr.bf16.mxu1 %v8646_v27 }
 0x662   : > { %4237 = vmatpush1.bf16.msra.mxu0 %v9914_v39  ;;  %v8666_v39 = vld [vmem:[%s7631_s22 + $0x84] ss:$16 sps:$4 sm:$0xff]  }
 0x663   : > { %4238 = vmatprep.subr.bf16.mxu0 %v9915_v10  ;;  %4313 = vmatpush1.bf16.msra.mxu1 %v8652_v40  ;;  %v8672_v10 = vld [vmem:[%s7631_s22 + $0x80] ss:$16 sps:$4 sm:$0xff]  }
 0x664   : > { %4314 = vmatprep.subr.bf16.mxu1 %v8656_v60 }
 0x666   : > { %4239 = vmatpush1.bf16.msra.mxu0 %v9916_v31  ;;  %v8676_v31 = vld [vmem:[%s7631_s22 + $0x64] ss:$16 sps:$4 sm:$0xff]  }
 0x667   : > { %4240 = vmatprep.subr.bf16.mxu0 %v9917_v3  ;;  %4315 = vmatpush1.bf16.msra.mxu1 %v8662_v63  ;;  %v8682_v3 = vld [vmem:[%s7631_s22 + $0x60] ss:$16 sps:$4 sm:$0xff]  }
 0x668   : > { %4316 = vmatprep.subr.bf16.mxu1 %v8666_v39 }
 0x66a   : > { %4241 = vmatpush1.bf16.msra.mxu0 %v9918_v0  ;;  %v8686_v0 = vld [vmem:[%s7631_s22 + $0x44] ss:$16 sps:$4 sm:$0xff]  }
 0x66b   : > { %4242 = vmatprep.subr.bf16.mxu0 %v9919_v47  ;;  %4317 = vmatpush1.bf16.msra.mxu1 %v8672_v10  ;;  %v8692_v47 = vld [vmem:[%s7631_s22 + $0x40] ss:$16 sps:$4 sm:$0xff]  }
 0x66c   : > { %4318 = vmatprep.subr.bf16.mxu1 %v8676_v31 }
 0x66e   : > { %4243 = vmatpush1.bf16.msra.mxu0 %v9920_v49  ;;  %v8696_v49 = vld [vmem:[%s7631_s22 + $0x24] ss:$16 sps:$4 sm:$0xff]  }
 0x66f   : > { %4244 = vmatprep.subr.bf16.mxu0 %v9921_v51  ;;  %4319 = vmatpush1.bf16.msra.mxu1 %v8682_v3  ;;  %v8702_v51 = vld [vmem:[%s7631_s22 + $0x20] ss:$16 sps:$4 sm:$0xff]  }
 0x670   : > { %4320 = vmatprep.subr.bf16.mxu1 %v8686_v0 }
 0x672   : > { %4245 = vmatpush1.bf16.msra.mxu0 %v9922_v52  ;;  %v8706_v52 = vld [vmem:[%s7631_s22 + $0x4] ss:$16 sps:$4 sm:$0xff]  }
 0x673   : > { %4246 = vmatprep.subr.bf16.mxu0 %v9923_v53  ;;  %4321 = vmatpush1.bf16.msra.mxu1 %v8692_v47  ;;  %v8712_v53 = vld [vmem:[%s7631_s22] ss:$16 sps:$4 sm:$0xff]  }
 0x674   : > { %4322 = vmatprep.subr.bf16.mxu1 %v8696_v49 }
 0x676   : > { %4247 = vmatpush1.bf16.msra.mxu0 %v9924_v54  ;;  %v8716_v54 = vld [vmem:[%s7631_s22 + $0x1e4] ss:$16 sps:$4 sm:$0xff]  }
 0x677   : > { %4248 = vmatprep.subr.bf16.mxu0 %v9925_v55  ;;  %4323 = vmatpush1.bf16.msra.mxu1 %v8702_v51  ;;  %9968 = vst [vmem:[#allocation51_spill] sm:$0xff] %v8716_v54  ;;  %v8722_v55 = vld [vmem:[%s7631_s22 + $0x1e0] ss:$16 sps:$4 sm:$0xff]  }
 0x678   : > { %4324 = vmatprep.subr.bf16.mxu1 %v8706_v52 }
 0x67a   : > { %4249 = vmatpush1.bf16.msra.mxu0 %v9926_v56  ;;  %v8726_v56 = vld [vmem:[%s7631_s22 + $0x1c4] ss:$16 sps:$4 sm:$0xff]  }
 0x67b   : > { %4250 = vmatprep.subr.bf16.mxu0 %v9927_v57  ;;  %4325 = vmatpush1.bf16.msra.mxu1 %v8712_v53  ;;  %9969 = vst [vmem:[#allocation53_spill] sm:$0xff] %v8726_v56  ;;  %v8732_v57 = vld [vmem:[%s7631_s22 + $0x1c0] ss:$16 sps:$4 sm:$0xff]  }
 0x67c   : > { %4326 = vmatprep.subr.bf16.mxu1 %v8716_v54 }
 0x67e   : > { %4251 = vmatpush2.bf16.msra.mxu0 %v9928_v6  ;;  %v8736_v6 = vld [vmem:[%s7631_s22 + $0x1a4] ss:$16 sps:$4 sm:$0xff]  }
 0x67f   : > { %4252 = vmatprep.subr.bf16.mxu0 %v9929_v19  ;;  %4327 = vmatpush2.bf16.msra.mxu1 %v8722_v55  ;;  %9970 = vst [vmem:[#allocation55_spill] sm:$0xff] %v8736_v6  ;;  %v8742_v19 = vld [vmem:[%s7631_s22 + $0x1a0] ss:$16 sps:$4 sm:$0xff]  }
 0x680   : > { %4328 = vmatprep.subr.bf16.mxu1 %v8726_v56  ;;  %9971 = vst [vmem:[#allocation57_spill] sm:$0xff] %v8742_v19 }
 0x682   : > { %4253 = vmatpush2.bf16.msra.mxu0 %v9931_v41  ;;  %v8752_v41 = vld [vmem:[%s7631_s22 + $0x180] ss:$16 sps:$4 sm:$0xff]  }
 0x683   : > { %4254 = vmatprep.subr.bf16.mxu0 %v9932_v2  ;;  %4329 = vmatpush2.bf16.msra.mxu1 %v8732_v57  ;;  %9973 = vst [vmem:[#allocation61_spill] sm:$0xff] %v8752_v41  ;;  %v8833_v2 = vld [vmem:[%s7631_s22 + $0x8] ss:$16 sps:$4 sm:$0xff]  }
 0x684   : > { %4330 = vmatprep.subr.bf16.mxu1 %v8736_v6  ;;  %9989 = vst [vmem:[#allocation76_spill] sm:$0xff] %v8833_v2 }
 0x686   : > { %4255 = vmatpush2.bf16.msra.mxu0 %v9933_v4  ;;  %v8837_v4 = vld [vmem:[%s7631_s22 + $0x1ec] ss:$16 sps:$4 sm:$0xff]  }
 0x687   : > { %4256 = vmatprep.subr.bf16.mxu0 %v9934_v8  ;;  %4331 = vmatpush2.bf16.msra.mxu1 %v8742_v19  ;;  %9990 = vst [vmem:[#allocation77_spill] sm:$0xff] %v8837_v4  ;;  %v8841_v8 = vld [vmem:[%s7631_s22 + $0x1e8] ss:$16 sps:$4 sm:$0xff]  }
 0x688   : > { %4332 = vmatprep.subr.bf16.mxu1 %v8746_v58  ;;  %9991 = vst [vmem:[#allocation78_spill] sm:$0xff] %v8841_v8 }
 0x68a   : > { %4257 = vmatpush2.bf16.msra.mxu0 %v9935_v11  ;;  %v8845_v11 = vld [vmem:[%s7631_s22 + $0x1cc] ss:$16 sps:$4 sm:$0xff]  }
 0x68b   : > { %4258 = vmatprep.subr.bf16.mxu0 %v9936_v16  ;;  %4333 = vmatpush2.bf16.msra.mxu1 %v8752_v41  ;;  %9992 = vst [vmem:[#allocation79_spill] sm:$0xff] %v8845_v11  ;;  %v8849_v16 = vld [vmem:[%s7631_s22 + $0x1c8] ss:$16 sps:$4 sm:$0xff]  }
 0x68c   : > { %4334 = vmatprep.subr.bf16.mxu1 %v8208_v24  ;;  %v8770_v24 = vld [vmem:[%s7631_s22 + $0xec] ss:$16 sps:$4 sm:$0xff]   ;;  %9993 = vst [vmem:[#allocation27_spill] sm:$0xff] %v8849_v16 }
 0x68d   : > { %9974 = vst [vmem:[#allocation62_spill] sm:$0xff] %v8770_v24 }
 0x68e   : > { %4259 = vmatpush2.bf16.msra.mxu0 %v9937_v18  ;;  %v8853_v18 = vld [vmem:[%s7631_s22 + $0x1ac] ss:$16 sps:$4 sm:$0xff]  }
 0x68f   : > { %4260 = vmatprep.subr.bf16.mxu0 %v8426_v44  ;;  %4335 = vmatpush2.bf16.msra.mxu1 %v8216_v25  ;;  %v8781_v25 = vld [vmem:[%s7631_s22 + $0xcc] ss:$16 sps:$4 sm:$0xff]   ;;  %v8825_v44 = vld [vmem:[%s7631_s22 + $0x28] ss:$16 sps:$4 sm:$0xff]   ;;  %9994 = vst [vmem:[#allocation28_spill] sm:$0xff] %v8853_v18 }
 0x690   : > { %4336 = vmatprep.subr.bf16.mxu1 %v8224_v34  ;;  %9976 = vst [vmem:[#allocation64_spill] sm:$0xff] %v8781_v25  ;;  %v8785_v34 = vld [vmem:[%s7631_s22 + $0xc8] ss:$16 sps:$4 sm:$0xff]   ;;  %9987 = vst [vmem:[#allocation74_spill] sm:$0xff] %v8825_v44 }
 0x691   : > { %9977 = vst [vmem:[#allocation65_spill] sm:$0xff] %v8785_v34 }
 0x692   : > { %4261 = vmatpush2.bf16.msra.mxu0 %v8431_v45  ;;  %v8829_v45 = vld [vmem:[%s7631_s22 + $0xc] ss:$16 sps:$4 sm:$0xff]  }
 0x693   : > { %4262 = vmatprep.subr.bf16.mxu0 %v8436_v50  ;;  %4337 = vmatpush2.bf16.msra.mxu1 %v8232_v29  ;;  %v8789_v29 = vld [vmem:[%s7631_s22 + $0xac] ss:$16 sps:$4 sm:$0xff]   ;;  %v8809_v50 = vld [vmem:[%s7631_s22 + $0x68] ss:$16 sps:$4 sm:$0xff]   ;;  %9988 = vst [vmem:[#allocation75_spill] sm:$0xff] %v8829_v45 }
 0x694   : > { %4338 = vmatprep.subr.bf16.mxu1 %v8240_v61  ;;  %9978 = vst [vmem:[#allocation66_spill] sm:$0xff] %v8789_v29  ;;  %v8793_v61 = vld [vmem:[%s7631_s22 + $0xa8] ss:$16 sps:$4 sm:$0xff]   ;;  %9983 = vst [vmem:[#allocation71_spill] sm:$0xff] %v8809_v50 }
 0x695   : > { %9979 = vst [vmem:[#allocation67_spill] sm:$0xff] %v8793_v61 }
 0x696   : > { %4263 = vmatpush2.bf16.msra.mxu0 %v8441_v33  ;;  %v8801_v33 = vld [vmem:[%s7631_s22 + $0x88] ss:$16 sps:$4 sm:$0xff]  }
 0x697   : > { %4264 = vmatprep.subr.bf16.mxu0 %v8446_v14  ;;  %4339 = vmatpush2.bf16.msra.mxu1 %v8248_v32  ;;  %v8777_v14 = vld [vmem:[%s7631_s22 + $0xe8] ss:$16 sps:$4 sm:$0xff]   ;;  %v8797_v32 = vld [vmem:[%s7631_s22 + $0x8c] ss:$16 sps:$4 sm:$0xff]   ;;  %9981 = vst [vmem:[#allocation69_spill] sm:$0xff] %v8801_v33 }
 0x698   : > { %4340 = vmatprep.subr.bf16.mxu1 %v8256_v35  ;;  %9975 = vst [vmem:[#allocation63_spill] sm:$0xff] %v8777_v14  ;;  %9980 = vst [vmem:[#allocation68_spill] sm:$0xff] %v8797_v32  ;;  %v8805_v35 = vld [vmem:[%s7631_s22 + $0x6c] ss:$16 sps:$4 sm:$0xff]  }
 0x699   : > { %9982 = vst [vmem:[#allocation70_spill] sm:$0xff] %v8805_v35 }
 0x69a   : > { %4265 = vmatpush2.bf16.msra.mxu0 %v8451_v42  ;;  %v8821_v42 = vld [vmem:[%s7631_s22 + $0x2c] ss:$16 sps:$4 sm:$0xff]  }
 0x69b   : > { %4351 = vmatprep.subr.bf16.mxu0 %v8770_v24  ;;  %4341 = vmatpush2.bf16.msra.mxu1 %v8264_v36  ;;  %v8813_v36 = vld [vmem:[%s7631_s22 + $0x4c] ss:$16 sps:$4 sm:$0xff]   ;;  %9986 = vst [vmem:[#allocation73_spill] sm:$0xff] %v8821_v42 }
 0x69c   : > { %4420 = vmatprep.subr.bf16.mxu1 %v8272_v38  ;;  %9984 = vst [vmem:[#allocation72_spill] sm:$0xff] %v8813_v36  ;;  %v8817_v38 = vld [vmem:[%s7631_s22 + $0x48] ss:$16 sps:$4 sm:$0xff]  }
 0x69d   : > { %4267 = vmatmul.mubr.bf16.vlgmr.msra.gmra.mxu0 %v8635_v59  ;;  %9985 = vst [vmem:[#allocation32_spill] sm:$0xff] %v8817_v38 }
 0x69e   : > { %4352 = vmatpush1.bf16.msra.mxu0 %v8777_v14 }
 0x69f   : > { %4353 = vmatprep.subr.bf16.mxu0 %v8781_v25 }
 0x6a2   : > { %4354 = vmatpush1.bf16.msra.mxu0 %v8785_v34 }
 0x6a3   : > { %4355 = vmatprep.subr.bf16.mxu0 %v8789_v29 }
 0x6a6   : > { %4356 = vmatpush1.bf16.msra.mxu0 %v8793_v61 }
 0x6a7   : > { %4357 = vmatprep.subr.bf16.mxu0 %v8797_v32 }
 0x6aa   : > { %4358 = vmatpush1.bf16.msra.mxu0 %v8801_v33 }
 0x6ab   : > { %4359 = vmatprep.subr.bf16.mxu0 %v8805_v35 }
 0x6ae   : > { %4360 = vmatpush1.bf16.msra.mxu0 %v8809_v50 }
 0x6af   : > { %4361 = vmatprep.subr.bf16.mxu0 %v8813_v36 }
 0x6b2   : > { %4362 = vmatpush1.bf16.msra.mxu0 %v8817_v38 }
 0x6b3   : > { %4363 = vmatprep.subr.bf16.mxu0 %v8821_v42 }
 0x6b6   : > { %4364 = vmatpush1.bf16.msra.mxu0 %v8825_v44 }
 0x6b7   : > { %4365 = vmatprep.subr.bf16.mxu0 %v8829_v45 }
 0x6ba   : > { %4366 = vmatpush1.bf16.msra.mxu0 %v8833_v2 }
 0x6bb   : > { %4367 = vmatprep.subr.bf16.mxu0 %v8837_v4 }
 0x6be   : > { %4368 = vmatpush2.bf16.msra.mxu0 %v8841_v8 }
 0x6bf   : > { %4369 = vmatprep.subr.bf16.mxu0 %v8845_v11 }
 0x6c2   : > { %4370 = vmatpush2.bf16.msra.mxu0 %v8849_v16 }
 0x6c3   : > { %4371 = vmatprep.subr.bf16.mxu0 %v8853_v18 }
 0x6c6   : > { %4372 = vmatpush2.bf16.msra.mxu0 %v8857_v21 }
 0x6c7   : > { %4373 = vmatprep.subr.bf16.mxu0 %v9996_v5 }
 0x6ca   : > { %4374 = vmatpush2.bf16.msra.mxu0 %v9997_v15 }
 0x6cb   : > { %4375 = vmatprep.subr.bf16.mxu0 %v9998_v43 }
 0x6ce   : > { %4376 = vmatpush2.bf16.msra.mxu0 %v9999_v30  ;;  %v4118_v30 = vld [vmem:[#allocation2 + $0x148] sm:$0xff] }
 0x6cf   : > { %4377 = vmatprep.subr.bf16.mxu0 %v10000_v28  ;;  %v4119_v28 = vld [vmem:[#allocation2 + $0x100] sm:$0xff] }
 0x6d2   : > { %4378 = vmatpush2.bf16.msra.mxu0 %v10001_v26 }
 0x6d3   : > { %4379 = vmatprep.subr.bf16.mxu0 %v10002_v17 }
 0x6d6   : > { %4380 = vmatpush2.bf16.msra.mxu0 %v10003_v12 }
 0x6d7   : > { %4381 = vmatprep.subr.bf16.mxu0 %v10004_v62  ;;  %v4120_v62 = vld [vmem:[#allocation2 + $0x58] sm:$0xff] }
 0x6da   : > { %4382 = vmatpush2.bf16.msra.mxu0 %v10005_v48  ;;  %v4121_v48 = vld [vmem:[#allocation2 + $0xd8] sm:$0xff] }
 0x6db   : > { %4496 = vmatprep.subr.bf16.mxu0 %v10006_v9 }
 0x71d   : > { %v4158_v37 = vpop.f32.mrf.mxu0  ;;  %v4199_v20 = vpop.f32.mrf.mxu1 }
 0x71e   : > { %v4206_v26 = vadd.f32 %v4158_v37, %v4118_v30  ;;  %v4220_v18 = vadd.f32 %v4199_v20, %v4120_v62  ;;  %v4122_v20 = vld [vmem:[#allocation2 + $0x80] sm:$0xff] }
 0x71f   : > { %v4160_v23 = vpop.f32.mrf.mxu0  ;;  %v4201_v46 = vpop.f32.mrf.mxu1 }
 0x720   : > { %v4207_v17 = vadd.f32 %v4160_v23, %v4119_v28  ;;  %v5850_v21 = vmul.f32 -1.442695, %v4206_v26  ;;  %v4221_v9 = vadd.f32 %v4201_v46, %v4121_v48  ;;  %v5852_v16 = vmul.f32 -1.442695, %v4220_v18  ;;  %v10007_v28 = vld [vmem:[#allocation80_spill] sm:$0xff] }
 0x721   : > { %v4162_v59 = vpop.f32.mrf.mxu0  ;;  %v4203_v5 = vpop.f32.mrf.mxu1 }
 0x722   : > { %v5851_v12 = vmul.f32 -1.442695, %v4207_v17  ;;  %6647 = vpow2.f32 %v5850_v21  ;;  %v5853_v11 = vmul.f32 -1.442695, %v4221_v9 }
 0x723   : > { %v4163_v15 = vpop.f32.mrf.mxu0  ;;  %v4204_v43 = vpop.f32.mrf.mxu1 }
 0x724   : > { %6649 = vpow2.f32 %v5851_v12 }
 0x725   : > { %6651 = vpow2.f32 %v5852_v16 }
 0x726   : > { %6653 = vpow2.f32 %v5853_v11 }
 0x72f   : > { %v6648_v8 = vpop.eup %6647 }
 0x730   : > { %v4214_v5 = vadd.f32 1.0, %v6648_v8  ;;  %v4123_v8 = vld [vmem:[#allocation2 + $0x130] sm:$0xff] }
 0x731   : > { %v6650_v59 = vpop.eup %6649 }
 0x732   : > { %v4215_v15 = vadd.f32 1.0, %v6650_v59  ;;  %6655 = vrcp.f32 %v4214_v5  ;;  %v6652_v37 = vpop.eup %6651 }
 0x733   : > { %v6654_v23 = vpop.eup %6653  ;;  %v4228_v43 = vadd.f32 1.0, %v6652_v37 }
 0x734   : > { %6657 = vrcp.f32 %v4215_v15  ;;  %v4229_v21 = vadd.f32 1.0, %v6654_v23 }
 0x735   : > { %6659 = vrcp.f32 %v4228_v43 }
 0x736   : > { %6661 = vrcp.f32 %v4229_v21 }
 0x73f   : > { %v6656_v17 = vpop.eup %6655 }
 0x741   : > { %v6658_v9 = vpop.eup %6657 }
 0x742   : > { %v6660_v5 = vpop.eup %6659 }
 0x743   : > { %v6662_v15 = vpop.eup %6661  ;;  %v4281_v37 = vsub.f32 1.0, %v6660_v5 }
 0x744   : > { %v4286_v21 = vmul.f32 %v6662_v15, %v8627_v1  ;;  %v8894_v1 = vld [vmem:[%s7637_s0 + $0x64] ss:$8 sps:$4 sm:$0xff]  }
 0x75d   : > { %v4268_v30 = vpop.f32.mrf.mxu0 }
 0x75e   : > { %v4269_v26 = vadd.f32 %v4268_v30, %v10007_v28  ;;  %v4282_v30 = vsub.f32 1.0, %v6662_v15  ;;  %v8930_v15 = vld [vmem:[%s7637_s0 + $0x30] ss:$8 sps:$4 sm:$0xff]  }
 0x75f   : > { %v4270_v46 = vpop.f32.mrf.mxu0 }
 0x760   : > { %v4275_v18 = vmul.f32 %v6656_v17, %v4269_v26  ;;  %v4271_v16 = vadd.f32 %v4270_v46, %v9967_v22  ;;  %v4285_v17 = vmul.f32 %v6660_v5, %v8625_v7  ;;  %v8890_v7 = vld [vmem:[%s7637_s0 + $0x70] ss:$8 sps:$4 sm:$0xff]   ;;  %v8924_v5 = vld [vmem:[%s7637_s0 + $0x34] ss:$8 sps:$4 sm:$0xff]  }
 0x761   : > { %v4272_v11 = vpop.f32.mrf.mxu0 }
 0x762   : > { %v4277_v12 = vadd.f32 %v4275_v18, %v4122_v20  ;;  %v4276_v62 = vmul.f32 %v6658_v9, %v4271_v16  ;;  %v8900_v11 = vld [vmem:[%s7637_s0 + $0x60] ss:$8 sps:$4 sm:$0xff]  }
 0x763   : > { %v4273_v48 = vpop.f32.mrf.mxu0 }
 0x764   : > { %6663 = vtanh.f32 %v4277_v12  ;;  %v4278_v59 = vadd.f32 %v4276_v62, %v4123_v8  ;;  %v8904_v12 = vld [vmem:[%s7637_s0 + $0x54] ss:$8 sps:$4 sm:$0xff]   ;;  %v8910_v62 = vld [vmem:[%s7637_s0 + $0x50] ss:$8 sps:$4 sm:$0xff]   ;;  %v8914_v48 = vld [vmem:[%s7637_s0 + $0x44] ss:$8 sps:$4 sm:$0xff]  }
 0x766   : > { %6665 = vtanh.f32 %v4278_v59  ;;  %v8920_v59 = vld [vmem:[%s7637_s0 + $0x40] ss:$8 sps:$4 sm:$0xff]  }
 0x771   : > { %v6664_v23 = vpop.eup %6663 }
 0x772   : > { %v4283_v43 = vmul.f32 %v6664_v23, %v4281_v37  ;;  %v8934_v37 = vld [vmem:[%s7637_s0 + $0x24] ss:$8 sps:$4 sm:$0xff]   ;;  %v8940_v23 = vld [vmem:[%s7637_s0 + $0x20] ss:$8 sps:$4 sm:$0xff]  }
 0x773   : > { %v6666_v26 = vpop.eup %6665 }
 0x774   : > { %v4284_v46 = vmul.f32 %v6666_v26, %v4282_v30  ;;  %v8875_v20 = vadd.f32 %v4285_v17, %v4283_v43  ;;  %v8944_v30 = vld [vmem:[%s7637_s0 + $0x14] ss:$8 sps:$4 sm:$0xff]   ;;  %v8950_v43 = vld [vmem:[%s7637_s0 + $0x10] ss:$8 sps:$4 sm:$0xff]   ;;  %v8954_v26 = vld [vmem:[%s7637_s0 + $0x4] ss:$8 sps:$4 sm:$0xff]  }
 0x775   : > { %v8960_v17 = vld [vmem:[%s7637_s0] ss:$8 sps:$4 sm:$0xff]  }
 0x776   : > { %v8877_v18 = vadd.f32 %v4286_v21, %v4284_v46  ;;  %v8885_v8 = vpack.c.bf16 %v8875_v20, %v8875_v20  ;;  %v8964_v46 = vld [vmem:[%s7637_s0 + $0xf4] ss:$8 sps:$4 sm:$0xff]   ;;  %v8970_v21 = vld [vmem:[%s7637_s0 + $0xf0] ss:$8 sps:$4 sm:$0xff]  }
 0x778   : > { %v4290_v16 = vpack.c.bf16 %v8877_v18, %v8877_v18  ;;  %v5888_v9 = vpack.c.bf16 %v8877_v18, %v8875_v20 }
 0x77a   : > { %4342 = vmatprep.mubr.bf16.mxu1 %v4290_v16  ;;  %4383 = vmatprep.mubr.bf16.mxu0 %v4290_v16  ;;  %4300 = vst [vmem:[#allocation3 + $0x8] sm:$0xff] %v5888_v9  ;;  %v8980_v9 = vld [vmem:[%s7637_s0 + $0xe0] ss:$8 sps:$4 sm:$0xff]  }
 0x77b   : > { %4343 = vmatmul.mubr.bf16.vlgmr.msra.gmra.mxu1 %v8885_v8  ;;  %4384 = vmatmul.mubr.bf16.vlgmr.msra.gmra.mxu0 %v8885_v8 }
 0x77c   : > { %4421 = vmatpush1.bf16.msra.mxu1 %v8890_v7  ;;  %4452 = vmatprep.mubr.bf16.mxu1 %v4290_v16  ;;  %v8974_v16 = vld [vmem:[%s7637_s0 + $0xe4] ss:$8 sps:$4 sm:$0xff]  }
 0x77d   : > { %4422 = vmatprep.subr.bf16.mxu1 %v8894_v1  ;;  %4497 = vmatpush1.bf16.msra.mxu0 %v8642_v13  ;;  %10008 = vst [vmem:[#allocation30_spill] sm:$0xff] %v8974_v16 }
 0x77e   : > { %4498 = vmatprep.subr.bf16.mxu0 %v8646_v27 }
 0x780   : > { %4423 = vmatpush1.bf16.msra.mxu1 %v8900_v11 }
 0x781   : > { %4424 = vmatprep.subr.bf16.mxu1 %v8904_v12  ;;  %4499 = vmatpush1.bf16.msra.mxu0 %v8652_v40 }
 0x782   : > { %4500 = vmatprep.subr.bf16.mxu0 %v8656_v60 }
 0x784   : > { %4425 = vmatpush1.bf16.msra.mxu1 %v8910_v62 }
 0x785   : > { %4426 = vmatprep.subr.bf16.mxu1 %v8914_v48  ;;  %4501 = vmatpush1.bf16.msra.mxu0 %v8662_v63 }
 0x786   : > { %4502 = vmatprep.subr.bf16.mxu0 %v8666_v39 }
 0x788   : > { %4427 = vmatpush1.bf16.msra.mxu1 %v8920_v59 }
 0x789   : > { %4428 = vmatprep.subr.bf16.mxu1 %v8924_v5  ;;  %4503 = vmatpush1.bf16.msra.mxu0 %v8672_v10 }
 0x78a   : > { %4504 = vmatprep.subr.bf16.mxu0 %v8676_v31 }
 0x78c   : > { %4429 = vmatpush1.bf16.msra.mxu1 %v8930_v15 }
 0x78d   : > { %4430 = vmatprep.subr.bf16.mxu1 %v8934_v37  ;;  %4505 = vmatpush1.bf16.msra.mxu0 %v8682_v3 }
 0x78e   : > { %4506 = vmatprep.subr.bf16.mxu0 %v8686_v0 }
 0x790   : > { %4431 = vmatpush1.bf16.msra.mxu1 %v8940_v23 }
 0x791   : > { %4432 = vmatprep.subr.bf16.mxu1 %v8944_v30  ;;  %4507 = vmatpush1.bf16.msra.mxu0 %v8692_v47 }
 0x792   : > { %4508 = vmatprep.subr.bf16.mxu0 %v8696_v49 }
 0x794   : > { %4433 = vmatpush1.bf16.msra.mxu1 %v8950_v43 }
 0x795   : > { %4434 = vmatprep.subr.bf16.mxu1 %v8954_v26  ;;  %4509 = vmatpush1.bf16.msra.mxu0 %v8702_v51 }
 0x796   : > { %4510 = vmatprep.subr.bf16.mxu0 %v8706_v52 }
 0x798   : > { %4435 = vmatpush1.bf16.msra.mxu1 %v8960_v17 }
 0x799   : > { %4436 = vmatprep.subr.bf16.mxu1 %v8964_v46  ;;  %4511 = vmatpush1.bf16.msra.mxu0 %v8712_v53 }
 0x79a   : > { %4512 = vmatprep.subr.bf16.mxu0 %v8716_v54  ;;  %v8984_v54 = vld [vmem:[%s7637_s0 + $0xd4] ss:$8 sps:$4 sm:$0xff]  }
 0x79b   : > { %10009 = vst [vmem:[#allocation31_spill] sm:$0xff] %v8984_v54 }
 0x79c   : > { %4437 = vmatpush2.bf16.msra.mxu1 %v8970_v21 }
 0x79d   : > { %4438 = vmatprep.subr.bf16.mxu1 %v8974_v16  ;;  %4513 = vmatpush2.bf16.msra.mxu0 %v8722_v55  ;;  %v8990_v16 = vld [vmem:[%s7637_s0 + $0xd0] ss:$8 sps:$4 sm:$0xff]  }
 0x79e   : > { %4514 = vmatprep.subr.bf16.mxu0 %v8726_v56  ;;  %10010 = vst [vmem:[#allocation33_spill] sm:$0xff] %v8990_v16  ;;  %v8994_v56 = vld [vmem:[%s7637_s0 + $0xc4] ss:$8 sps:$4 sm:$0xff]  }
 0x79f   : > { %10011 = vst [vmem:[#allocation34_spill] sm:$0xff] %v8994_v56 }
 0x7a0   : > { %4439 = vmatpush2.bf16.msra.mxu1 %v8980_v9 }
 0x7a1   : > { %4440 = vmatprep.subr.bf16.mxu1 %v8984_v54  ;;  %4515 = vmatpush2.bf16.msra.mxu0 %v8732_v57  ;;  %v9000_v54 = vld [vmem:[%s7637_s0 + $0xc0] ss:$8 sps:$4 sm:$0xff]  }
 0x7a2   : > { %4516 = vmatprep.subr.bf16.mxu0 %v8736_v6  ;;  %10012 = vst [vmem:[#allocation35_spill] sm:$0xff] %v9000_v54  ;;  %v9004_v6 = vld [vmem:[%s7637_s0 + $0xb4] ss:$8 sps:$4 sm:$0xff]  }
 0x7a3   : > { %10013 = vst [vmem:[#allocation36_spill] sm:$0xff] %v9004_v6 }
 0x7a4   : > { %4441 = vmatpush2.bf16.msra.mxu1 %v8990_v16  ;;  %v9009_v16 = vld [vmem:[%s7631_s22 + $0x164] ss:$16 sps:$4 sm:$0xff]  }
 0x7a5   : > { %4442 = vmatprep.subr.bf16.mxu1 %v8994_v56  ;;  %4517 = vmatpush2.bf16.msra.mxu0 %v8742_v19  ;;  %10014 = vst [vmem:[#allocation37_spill] sm:$0xff] %v9009_v16  ;;  %v9013_v19 = vld [vmem:[%s7637_s0 + $0xb0] ss:$8 sps:$4 sm:$0xff]  }
 0x7a6   : > { %4518 = vmatprep.subr.bf16.mxu0 %v8746_v58  ;;  %10015 = vst [vmem:[#allocation38_spill] sm:$0xff] %v9013_v19  ;;  %v9017_v58 = vld [vmem:[%s7637_s0 + $0xa4] ss:$8 sps:$4 sm:$0xff]  }
 0x7a7   : > { %10016 = vst [vmem:[#allocation39_spill] sm:$0xff] %v9017_v58 }
 0x7a8   : > { %4443 = vmatpush2.bf16.msra.mxu1 %v9000_v54  ;;  %v9021_v54 = vld [vmem:[%s7631_s22 + $0x160] ss:$16 sps:$4 sm:$0xff]  }
 0x7a9   : > { %4444 = vmatprep.subr.bf16.mxu1 %v9004_v6  ;;  %4519 = vmatpush2.bf16.msra.mxu0 %v8752_v41  ;;  %10017 = vst [vmem:[#allocation40_spill] sm:$0xff] %v9021_v54  ;;  %v9025_v41 = vld [vmem:[%s7631_s22 + $0x144] ss:$16 sps:$4 sm:$0xff]  }
 0x7aa   : > { %4520 = vmatprep.subr.bf16.mxu0 %v9009_v16  ;;  %10018 = vst [vmem:[#allocation41_spill] sm:$0xff] %v9025_v41  ;;  %v9029_v16 = vld [vmem:[%s7637_s0 + $0xa0] ss:$8 sps:$4 sm:$0xff]   ;;  %v9049_v6 = vld [vmem:[%s7637_s0 + $0x84] ss:$8 sps:$4 sm:$0xff]  }
 0x7ab   : > { %10019 = vst [vmem:[#allocation42_spill] sm:$0xff] %v9029_v16  ;;  %10024 = vst [vmem:[#allocation46_spill] sm:$0xff] %v9049_v6 }
 0x7ac   : > { %4445 = vmatpush2.bf16.msra.mxu1 %v9013_v19  ;;  %v9033_v19 = vld [vmem:[%s7637_s0 + $0x94] ss:$8 sps:$4 sm:$0xff]  }
 0x7ad   : > { %4446 = vmatprep.subr.bf16.mxu1 %v9017_v58  ;;  %4521 = vmatpush2.bf16.msra.mxu0 %v9021_v54  ;;  %10020 = vst [vmem:[#allocation43_spill] sm:$0xff] %v9033_v19  ;;  %v9037_v58 = vld [vmem:[%s7631_s22 + $0x140] ss:$16 sps:$4 sm:$0xff]   ;;  %v9041_v54 = vld [vmem:[%s7631_s22 + $0x124] ss:$16 sps:$4 sm:$0xff]  }
 0x7ae   : > { %4522 = vmatprep.subr.bf16.mxu0 %v9025_v41  ;;  %10021 = vst [vmem:[#allocation44_spill] sm:$0xff] %v9037_v58  ;;  %10022 = vst [vmem:[#allocation81_spill] sm:$0xff] %v9041_v54  ;;  %v9045_v41 = vld [vmem:[%s7637_s0 + $0x90] ss:$8 sps:$4 sm:$0xff]  }
 0x7af   : > { %10023 = vst [vmem:[#allocation45_spill] sm:$0xff] %v9045_v41 }
 0x7b0   : > { %4447 = vmatpush2.bf16.msra.mxu1 %v9029_v16  ;;  %v9053_v16 = vld [vmem:[%s7631_s22 + $0x120] ss:$16 sps:$4 sm:$0xff]  }
 0x7b1   : > { %4448 = vmatprep.subr.bf16.mxu1 %v9033_v19  ;;  %4523 = vmatpush2.bf16.msra.mxu0 %v9037_v58  ;;  %10025 = vst [vmem:[#allocation47_spill] sm:$0xff] %v9053_v16  ;;  %v9057_v19 = vld [vmem:[%s7631_s22 + $0x104] ss:$16 sps:$4 sm:$0xff]   ;;  %v9061_v58 = vld [vmem:[%s7637_s0 + $0x80] ss:$8 sps:$4 sm:$0xff]  }
 0x7b2   : > { %4524 = vmatprep.subr.bf16.mxu0 %v9041_v54  ;;  %10026 = vst [vmem:[#allocation48_spill] sm:$0xff] %v9057_v19  ;;  %10027 = vst [vmem:[#allocation50_spill] sm:$0xff] %v9061_v58  ;;  %v9066_v54 = vld [vmem:[%s7631_s22 + $0x100] ss:$16 sps:$4 sm:$0xff]  }
 0x7b3   : > { %10028 = vst [vmem:[#allocation52_spill] sm:$0xff] %v9066_v54 }
 0x7b4   : > { %4449 = vmatpush2.bf16.msra.mxu1 %v9045_v41  ;;  %v9070_v41 = vld [vmem:[%s7637_s0 + $0x74] ss:$8 sps:$4 sm:$0xff]  }
 0x7b5   : > { %4450 = vmatprep.subr.bf16.mxu1 %v9049_v6  ;;  %4525 = vmatpush2.bf16.msra.mxu0 %v9053_v16  ;;  %10029 = vst [vmem:[#allocation54_spill] sm:$0xff] %v9070_v41 }
 0x7b6   : > { %4526 = vmatprep.subr.bf16.mxu0 %v9057_v19 }
 0x7b8   : > { %4451 = vmatpush2.bf16.msra.mxu1 %v9061_v58 }
 0x7b9   : > { %4537 = vmatprep.subr.bf16.mxu1 %v8770_v24  ;;  %4527 = vmatpush2.bf16.msra.mxu0 %v9066_v54 }
 0x7ba   : > { %4606 = vmatprep.subr.bf16.mxu0 %v9070_v41 }
 0x7bb   : > { %4453 = vmatmul.mubr.bf16.vlgmr.msra.gmra.mxu1 %v8885_v8  ;;  %v10030_v8 = vld [vmem:[#allocation78_spill] sm:$0xff] }
 0x7bc   : > { %4538 = vmatpush1.bf16.msra.mxu1 %v8777_v14  ;;  %v4306_v14 = vld [vmem:[#allocation2 + $0xe0] sm:$0xff] }
 0x7bd   : > { %4539 = vmatprep.subr.bf16.mxu1 %v8781_v25 }
 0x7c0   : > { %4540 = vmatpush1.bf16.msra.mxu1 %v8785_v34 }
 0x7c1   : > { %4541 = vmatprep.subr.bf16.mxu1 %v8789_v29 }
 0x7c4   : > { %4542 = vmatpush1.bf16.msra.mxu1 %v8793_v61  ;;  %v4304_v61 = vld [vmem:[#allocation2 + $0x138] sm:$0xff] }
 0x7c5   : > { %4543 = vmatprep.subr.bf16.mxu1 %v8797_v32 }
 0x7c8   : > { %4544 = vmatpush1.bf16.msra.mxu1 %v8801_v33 }
 0x7c9   : > { %4545 = vmatprep.subr.bf16.mxu1 %v8805_v35 }
 0x7cc   : > { %4546 = vmatpush1.bf16.msra.mxu1 %v8809_v50  ;;  %v10031_v50 = vld [vmem:[#allocation79_spill] sm:$0xff] }
 0x7cd   : > { %4547 = vmatprep.subr.bf16.mxu1 %v8813_v36  ;;  %v10032_v36 = vld [vmem:[#allocation27_spill] sm:$0xff] }
 0x7d0   : > { %4548 = vmatpush1.bf16.msra.mxu1 %v8817_v38  ;;  %v10033_v38 = vld [vmem:[#allocation28_spill] sm:$0xff] }
 0x7d1   : > { %4549 = vmatprep.subr.bf16.mxu1 %v8821_v42  ;;  %v10034_v42 = vld [vmem:[#allocation29_spill] sm:$0xff] }
 0x7d4   : > { %4550 = vmatpush1.bf16.msra.mxu1 %v8825_v44  ;;  %v9096_v44 = vld [vmem:[%s7631_s22 + $0x18c] ss:$16 sps:$4 sm:$0xff]  }
 0x7d5   : > { %4551 = vmatprep.subr.bf16.mxu1 %v8829_v45  ;;  %10035 = vst [vmem:[#allocation56_spill] sm:$0xff] %v9096_v44 }
 0x7d8   : > { %4552 = vmatpush1.bf16.msra.mxu1 %v8833_v2  ;;  %v9100_v2 = vld [vmem:[%s7631_s22 + $0x188] ss:$16 sps:$4 sm:$0xff]  }
 0x7d9   : > { %4553 = vmatprep.subr.bf16.mxu1 %v8837_v4  ;;  %10036 = vst [vmem:[#allocation58_spill] sm:$0xff] %v9100_v2 }
 0x7dc   : > { %4554 = vmatpush2.bf16.msra.mxu1 %v10030_v8  ;;  %v9104_v8 = vld [vmem:[%s7631_s22 + $0x16c] ss:$16 sps:$4 sm:$0xff]  }
 0x7dd   : > { %4555 = vmatprep.subr.bf16.mxu1 %v10031_v50  ;;  %10037 = vst [vmem:[#allocation60_spill] sm:$0xff] %v9104_v8 }
 0x7e0   : > { %4556 = vmatpush2.bf16.msra.mxu1 %v10032_v36  ;;  %v9108_v36 = vld [vmem:[%s7631_s22 + $0x168] ss:$16 sps:$4 sm:$0xff]  }
 0x7e1   : > { %4557 = vmatprep.subr.bf16.mxu1 %v10033_v38  ;;  %10038 = vst [vmem:[#allocation80_spill] sm:$0xff] %v9108_v36  ;;  %v9112_v38 = vld [vmem:[%s7631_s22 + $0x14c] ss:$16 sps:$4 sm:$0xff]  }
 0x7e2   : > { %10039 = vst [vmem:[#allocation82_spill] sm:$0xff] %v9112_v38 }
 0x7e4   : > { %4558 = vmatpush2.bf16.msra.mxu1 %v10034_v42  ;;  %v9116_v42 = vld [vmem:[%s7631_s22 + $0x148] ss:$16 sps:$4 sm:$0xff]  }
 0x7e5   : > { %4559 = vmatprep.subr.bf16.mxu1 %v9096_v44  ;;  %10040 = vst [vmem:[#allocation83_spill] sm:$0xff] %v9116_v42  ;;  %v9120_v44 = vld [vmem:[%s7631_s22 + $0x12c] ss:$16 sps:$4 sm:$0xff]  }
 0x7e6   : > { %10041 = vst [vmem:[#allocation84_spill] sm:$0xff] %v9120_v44 }
 0x7e8   : > { %4560 = vmatpush2.bf16.msra.mxu1 %v9100_v2  ;;  %v9124_v2 = vld [vmem:[%s7631_s22 + $0x128] ss:$16 sps:$4 sm:$0xff]  }
 0x7e9   : > { %4561 = vmatprep.subr.bf16.mxu1 %v9104_v8  ;;  %10042 = vst [vmem:[#allocation85_spill] sm:$0xff] %v9124_v2  ;;  %v9128_v8 = vld [vmem:[%s7631_s22 + $0x10c] ss:$16 sps:$4 sm:$0xff]  }
 0x7ea   : > { %10043 = vst [vmem:[#allocation86_spill] sm:$0xff] %v9128_v8 }
 0x7ec   : > { %4562 = vmatpush2.bf16.msra.mxu1 %v9108_v36  ;;  %v9132_v36 = vld [vmem:[%s7631_s22 + $0x108] ss:$16 sps:$4 sm:$0xff]  }
 0x7ed   : > { %4563 = vmatprep.subr.bf16.mxu1 %v9112_v38  ;;  %10044 = vst [vmem:[#allocation87_spill] sm:$0xff] %v9132_v36  ;;  %v10045_v38 = vld [vmem:[#allocation49_spill] sm:$0xff] }
 0x7f0   : > { %4564 = vmatpush2.bf16.msra.mxu1 %v9116_v42 }
 0x7f1   : > { %4565 = vmatprep.subr.bf16.mxu1 %v9120_v44 }
 0x7f4   : > { %4566 = vmatpush2.bf16.msra.mxu1 %v9124_v2  ;;  %v4305_v2 = vld [vmem:[#allocation2 + $0x120] sm:$0xff] }
 0x7f5   : > { %4567 = vmatprep.subr.bf16.mxu1 %v9128_v8 }
 0x7f8   : > { %4568 = vmatpush2.bf16.msra.mxu1 %v9132_v36  ;;  %v4307_v36 = vld [vmem:[#allocation2 + $0xa8] sm:$0xff] }
 0x7f9   : > { %4682 = vmatprep.subr.bf16.mxu1 %v10045_v38 }
 0x83b   : > { %v4344_v50 = vpop.f32.mrf.mxu1  ;;  %v4385_v42 = vpop.f32.mrf.mxu0 }
 0x83c   : > { %v4392_v29 = vadd.f32 %v4344_v50, %v4304_v61  ;;  %v4406_v41 = vadd.f32 %v4385_v42, %v4306_v14  ;;  %v4308_v14 = vld [vmem:[#allocation2 + $0xb8] sm:$0xff] }
 0x83d   : > { %v4346_v4 = vpop.f32.mrf.mxu1  ;;  %v4387_v45 = vpop.f32.mrf.mxu0 }
 0x83e   : > { %v4393_v34 = vadd.f32 %v4346_v4, %v4305_v2  ;;  %v5855_v25 = vmul.f32 -1.442695, %v4392_v29  ;;  %v4407_v38 = vadd.f32 %v4387_v45, %v4307_v36  ;;  %v5857_v54 = vmul.f32 -1.442695, %v4406_v41 }
 0x83f   : > { %v4348_v35 = vpop.f32.mrf.mxu1  ;;  %v4389_v44 = vpop.f32.mrf.mxu0 }
 0x840   : > { %v5856_v8 = vmul.f32 -1.442695, %v4393_v34  ;;  %6667 = vpow2.f32 %v5855_v25  ;;  %v5858_v24 = vmul.f32 -1.442695, %v4407_v38 }
 0x841   : > { %v4349_v33 = vpop.f32.mrf.mxu1  ;;  %v4390_v32 = vpop.f32.mrf.mxu0 }
 0x842   : > { %6669 = vpow2.f32 %v5856_v8 }
 0x843   : > { %6671 = vpow2.f32 %v5857_v54 }
 0x844   : > { %6673 = vpow2.f32 %v5858_v24 }
 0x84d   : > { %v6668_v58 = vpop.eup %6667 }
 0x84e   : > { %v4400_v44 = vadd.f32 1.0, %v6668_v58  ;;  %v4309_v58 = vld [vmem:[#allocation2 + $0x168] sm:$0xff] }
 0x84f   : > { %v6670_v35 = vpop.eup %6669 }
 0x850   : > { %v4401_v32 = vadd.f32 1.0, %v6670_v35  ;;  %6675 = vrcp.f32 %v4400_v44  ;;  %v6672_v61 = vpop.eup %6671 }
 0x851   : > { %v6674_v33 = vpop.eup %6673  ;;  %v4414_v29 = vadd.f32 1.0, %v6672_v61 }
 0x852   : > { %6677 = vrcp.f32 %v4401_v32  ;;  %v4415_v25 = vadd.f32 1.0, %v6674_v33 }
 0x853   : > { %6679 = vrcp.f32 %v4414_v29 }
 0x854   : > { %6681 = vrcp.f32 %v4415_v25 }
 0x85d   : > { %v6676_v2 = vpop.eup %6675 }
 0x85f   : > { %v6678_v38 = vpop.eup %6677 }
 0x860   : > { %v6680_v35 = vpop.eup %6679 }
 0x861   : > { %v6682_v44 = vpop.eup %6681  ;;  %v4467_v32 = vsub.f32 1.0, %v6680_v35 }
 0x862   : > { %v4468_v33 = vsub.f32 1.0, %v6682_v44 }
 0x87b   : > { %v4454_v34 = vpop.f32.mrf.mxu1 }
 0x87c   : > { %v4455_v50 = vadd.f32 %v4454_v34, %v10007_v28 }
 0x87d   : > { %v4456_v36 = vpop.f32.mrf.mxu1 }
 0x87e   : > { %v4461_v41 = vmul.f32 %v6676_v2, %v4455_v50  ;;  %v4457_v54 = vadd.f32 %v4456_v36, %v9967_v22  ;;  %v4471_v50 = vmul.f32 %v6680_v35, %v8875_v20  ;;  %v4472_v36 = vmul.f32 %v6682_v44, %v8877_v18  ;;  %v10046_v20 = vld [vmem:[#allocation51_spill] sm:$0xff]  ;;  %v10047_v18 = vld [vmem:[#allocation30_spill] sm:$0xff]  ;;  %v10055_v44 = vld [vmem:[#allocation36_spill] sm:$0xff] }
 0x87f   : > { %v4458_v24 = vpop.f32.mrf.mxu1  ;;  %v10054_v35 = vld [vmem:[#allocation35_spill] sm:$0xff] }
 0x880   : > { %v4463_v42 = vadd.f32 %v4461_v41, %v4308_v14  ;;  %v4462_v45 = vmul.f32 %v6678_v38, %v4457_v54  ;;  %v10048_v38 = vld [vmem:[#allocation53_spill] sm:$0xff] }
 0x881   : > { %v4459_v4 = vpop.f32.mrf.mxu1 }
 0x882   : > { %6683 = vtanh.f32 %v4463_v42  ;;  %v4464_v8 = vadd.f32 %v4462_v45, %v4309_v58  ;;  %v10049_v58 = vld [vmem:[#allocation31_spill] sm:$0xff]  ;;  %v10051_v45 = vld [vmem:[#allocation33_spill] sm:$0xff] }
 0x883   : > { %v10050_v42 = vld [vmem:[#allocation55_spill] sm:$0xff]  ;;  %v10052_v4 = vld [vmem:[#allocation57_spill] sm:$0xff] }
 0x884   : > { %6685 = vtanh.f32 %v4464_v8  ;;  %v10053_v8 = vld [vmem:[#allocation59_spill] sm:$0xff] }
 0x88f   : > { %v6684_v61 = vpop.eup %6683 }
 0x890   : > { %v4469_v34 = vmul.f32 %v6684_v61, %v4467_v32  ;;  %v10056_v32 = vld [vmem:[#allocation61_spill] sm:$0xff] }
 0x891   : > { %v6686_v29 = vpop.eup %6685  ;;  %v10057_v61 = vld [vmem:[#allocation37_spill] sm:$0xff] }
 0x892   : > { %v4470_v2 = vmul.f32 %v6686_v29, %v4468_v33  ;;  %v9140_v24 = vadd.f32 %v4471_v50, %v4469_v34  ;;  %v10058_v33 = vld [vmem:[#allocation38_spill] sm:$0xff]  ;;  %v10059_v34 = vld [vmem:[#allocation39_spill] sm:$0xff]  ;;  %v10060_v29 = vld [vmem:[#allocation40_spill] sm:$0xff] }
 0x893   : > { %v10061_v50 = vld [vmem:[#allocation41_spill] sm:$0xff] }
 0x894   : > { %v9142_v25 = vadd.f32 %v4472_v36, %v4470_v2  ;;  %v9150_v54 = vpack.c.bf16 %v9140_v24, %v9140_v24  ;;  %v10062_v2 = vld [vmem:[#allocation42_spill] sm:$0xff]  ;;  %v10063_v36 = vld [vmem:[#allocation43_spill] sm:$0xff] }
 0x896   : > { %v4476_v14 = vpack.c.bf16 %v9142_v25, %v9142_v25  ;;  %v5889_v41 = vpack.c.bf16 %v9142_v25, %v9140_v24 }
 0x898   : > { %4528 = vmatprep.mubr.bf16.mxu0 %v4476_v14  ;;  %4569 = vmatprep.mubr.bf16.mxu1 %v4476_v14  ;;  %4486 = vst [vmem:[#allocation3 + $0x20] sm:$0xff] %v5889_v41  ;;  %v10065_v41 = vld [vmem:[#allocation81_spill] sm:$0xff] }
 0x899   : > { %4529 = vmatmul.mubr.bf16.vlgmr.msra.gmra.mxu0 %v9150_v54  ;;  %4570 = vmatmul.mubr.bf16.vlgmr.msra.gmra.mxu1 %v9150_v54 }
 0x89a   : > { %4607 = vmatpush1.bf16.msra.mxu0 %v8890_v7  ;;  %4638 = vmatprep.mubr.bf16.mxu0 %v4476_v14  ;;  %v10064_v14 = vld [vmem:[#allocation44_spill] sm:$0xff] }
 0x89b   : > { %4608 = vmatprep.subr.bf16.mxu0 %v8894_v1  ;;  %4683 = vmatpush1.bf16.msra.mxu1 %v8642_v13 }
 0x89c   : > { %4684 = vmatprep.subr.bf16.mxu1 %v8646_v27 }
 0x89e   : > { %4609 = vmatpush1.bf16.msra.mxu0 %v8900_v11 }
 0x89f   : > { %4610 = vmatprep.subr.bf16.mxu0 %v8904_v12  ;;  %4685 = vmatpush1.bf16.msra.mxu1 %v8652_v40 }
 0x8a0   : > { %4686 = vmatprep.subr.bf16.mxu1 %v8656_v60 }
 0x8a2   : > { %4611 = vmatpush1.bf16.msra.mxu0 %v8910_v62 }
 0x8a3   : > { %4612 = vmatprep.subr.bf16.mxu0 %v8914_v48  ;;  %4687 = vmatpush1.bf16.msra.mxu1 %v8662_v63 }
 0x8a4   : > { %4688 = vmatprep.subr.bf16.mxu1 %v8666_v39 }
 0x8a6   : > { %4613 = vmatpush1.bf16.msra.mxu0 %v8920_v59 }
 0x8a7   : > { %4614 = vmatprep.subr.bf16.mxu0 %v8924_v5  ;;  %4689 = vmatpush1.bf16.msra.mxu1 %v8672_v10 }
 0x8a8   : > { %4690 = vmatprep.subr.bf16.mxu1 %v8676_v31 }
 0x8aa   : > { %4615 = vmatpush1.bf16.msra.mxu0 %v8930_v15 }
 0x8ab   : > { %4616 = vmatprep.subr.bf16.mxu0 %v8934_v37  ;;  %4691 = vmatpush1.bf16.msra.mxu1 %v8682_v3 }
 0x8ac   : > { %4692 = vmatprep.subr.bf16.mxu1 %v8686_v0 }
 0x8ae   : > { %4617 = vmatpush1.bf16.msra.mxu0 %v8940_v23 }
 0x8af   : > { %4618 = vmatprep.subr.bf16.mxu0 %v8944_v30  ;;  %4693 = vmatpush1.bf16.msra.mxu1 %v8692_v47 }
 0x8b0   : > { %4694 = vmatprep.subr.bf16.mxu1 %v8696_v49 }
 0x8b2   : > { %4619 = vmatpush1.bf16.msra.mxu0 %v8950_v43 }
 0x8b3   : > { %4620 = vmatprep.subr.bf16.mxu0 %v8954_v26  ;;  %4695 = vmatpush1.bf16.msra.mxu1 %v8702_v51 }
 0x8b4   : > { %4696 = vmatprep.subr.bf16.mxu1 %v8706_v52 }
 0x8b6   : > { %4621 = vmatpush1.bf16.msra.mxu0 %v8960_v17 }
 0x8b7   : > { %4622 = vmatprep.subr.bf16.mxu0 %v8964_v46  ;;  %4697 = vmatpush1.bf16.msra.mxu1 %v8712_v53 }
 0x8b8   : > { %4698 = vmatprep.subr.bf16.mxu1 %v10046_v20 }
 0x8ba   : > { %4623 = vmatpush2.bf16.msra.mxu0 %v8970_v21 }
 0x8bb   : > { %4624 = vmatprep.subr.bf16.mxu0 %v10047_v18  ;;  %4699 = vmatpush2.bf16.msra.mxu1 %v8722_v55 }
 0x8bc   : > { %4700 = vmatprep.subr.bf16.mxu1 %v10048_v38 }
 0x8be   : > { %4625 = vmatpush2.bf16.msra.mxu0 %v8980_v9 }
 0x8bf   : > { %4626 = vmatprep.subr.bf16.mxu0 %v10049_v58  ;;  %4701 = vmatpush2.bf16.msra.mxu1 %v8732_v57 }
 0x8c0   : > { %4702 = vmatprep.subr.bf16.mxu1 %v10050_v42 }
 0x8c2   : > { %4627 = vmatpush2.bf16.msra.mxu0 %v10051_v45 }
 0x8c3   : > { %4628 = vmatprep.subr.bf16.mxu0 %v8994_v56  ;;  %4703 = vmatpush2.bf16.msra.mxu1 %v10052_v4 }
 0x8c4   : > { %4704 = vmatprep.subr.bf16.mxu1 %v10053_v8 }
 0x8c6   : > { %4629 = vmatpush2.bf16.msra.mxu0 %v10054_v35 }
 0x8c7   : > { %4630 = vmatprep.subr.bf16.mxu0 %v10055_v44  ;;  %4705 = vmatpush2.bf16.msra.mxu1 %v10056_v32  ;;  %v10066_v44 = vld [vmem:[#allocation45_spill] sm:$0xff] }
 0x8c8   : > { %4706 = vmatprep.subr.bf16.mxu1 %v10057_v61  ;;  %v4490_v32 = vld [vmem:[#allocation2 + $0xe8] sm:$0xff] }
 0x8ca   : > { %4631 = vmatpush2.bf16.msra.mxu0 %v10058_v33 }
 0x8cb   : > { %4632 = vmatprep.subr.bf16.mxu0 %v10059_v34  ;;  %4707 = vmatpush2.bf16.msra.mxu1 %v10060_v29  ;;  %v10067_v34 = vld [vmem:[#allocation50_spill] sm:$0xff] }
 0x8cc   : > { %4708 = vmatprep.subr.bf16.mxu1 %v10061_v50  ;;  %v10068_v29 = vld [vmem:[#allocation62_spill] sm:$0xff]  ;;  %v10069_v50 = vld [vmem:[#allocation52_spill] sm:$0xff] }
 0x8ce   : > { %4633 = vmatpush2.bf16.msra.mxu0 %v10062_v2  ;;  %v10070_v2 = vld [vmem:[#allocation54_spill] sm:$0xff] }
 0x8cf   : > { %4634 = vmatprep.subr.bf16.mxu0 %v10063_v36  ;;  %4709 = vmatpush2.bf16.msra.mxu1 %v10064_v14  ;;  %v10071_v14 = vld [vmem:[#allocation63_spill] sm:$0xff] }
 0x8d0   : > { %4710 = vmatprep.subr.bf16.mxu1 %v10065_v41  ;;  %v10072_v41 = vld [vmem:[#allocation64_spill] sm:$0xff] }
 0x8d2   : > { %4635 = vmatpush2.bf16.msra.mxu0 %v10066_v44  ;;  %v10073_v44 = vld [vmem:[#allocation65_spill] sm:$0xff] }
 0x8d3   : > { %4636 = vmatprep.subr.bf16.mxu0 %v9049_v6  ;;  %4711 = vmatpush2.bf16.msra.mxu1 %v9053_v16  ;;  %v10074_v6 = vld [vmem:[#allocation66_spill] sm:$0xff]  ;;  %v10075_v16 = vld [vmem:[#allocation67_spill] sm:$0xff] }
 0x8d4   : > { %4712 = vmatprep.subr.bf16.mxu1 %v9057_v19  ;;  %v10076_v19 = vld [vmem:[#allocation68_spill] sm:$0xff] }
 0x8d6   : > { %4637 = vmatpush2.bf16.msra.mxu0 %v10067_v34  ;;  %v10077_v34 = vld [vmem:[#allocation69_spill] sm:$0xff] }
 0x8d7   : > { %4723 = vmatprep.subr.bf16.mxu0 %v10068_v29  ;;  %4713 = vmatpush2.bf16.msra.mxu1 %v10069_v50  ;;  %v10078_v29 = vld [vmem:[#allocation70_spill] sm:$0xff]  ;;  %v10079_v50 = vld [vmem:[#allocation71_spill] sm:$0xff] }
 0x8d8   : > { %4792 = vmatprep.subr.bf16.mxu1 %v10070_v2  ;;  %v10080_v2 = vld [vmem:[#allocation72_spill] sm:$0xff] }
 0x8d9   : > { %4639 = vmatmul.mubr.bf16.vlgmr.msra.gmra.mxu0 %v9150_v54  ;;  %v10081_v54 = vld [vmem:[#allocation32_spill] sm:$0xff] }
 0x8da   : > { %4724 = vmatpush1.bf16.msra.mxu0 %v10071_v14  ;;  %v10082_v14 = vld [vmem:[#allocation73_spill] sm:$0xff] }
 0x8db   : > { %4725 = vmatprep.subr.bf16.mxu0 %v10072_v41  ;;  %v10083_v41 = vld [vmem:[#allocation74_spill] sm:$0xff] }
 0x8de   : > { %4726 = vmatpush1.bf16.msra.mxu0 %v10073_v44  ;;  %v10084_v44 = vld [vmem:[#allocation75_spill] sm:$0xff] }
 0x8df   : > { %4727 = vmatprep.subr.bf16.mxu0 %v10074_v6  ;;  %v10085_v6 = vld [vmem:[#allocation76_spill] sm:$0xff] }
 0x8e2   : > { %4728 = vmatpush1.bf16.msra.mxu0 %v10075_v16  ;;  %v10086_v16 = vld [vmem:[#allocation77_spill] sm:$0xff] }
 0x8e3   : > { %4729 = vmatprep.subr.bf16.mxu0 %v10076_v19  ;;  %v10087_v19 = vld [vmem:[#allocation78_spill] sm:$0xff] }
 0x8e6   : > { %4730 = vmatpush1.bf16.msra.mxu0 %v10077_v34  ;;  %v10088_v34 = vld [vmem:[#allocation79_spill] sm:$0xff] }
 0x8e7   : > { %4731 = vmatprep.subr.bf16.mxu0 %v10078_v29  ;;  %v10089_v29 = vld [vmem:[#allocation27_spill] sm:$0xff] }
 0x8ea   : > { %4732 = vmatpush1.bf16.msra.mxu0 %v10079_v50  ;;  %v10090_v50 = vld [vmem:[#allocation28_spill] sm:$0xff] }
 0x8eb   : > { %4733 = vmatprep.subr.bf16.mxu0 %v10080_v2  ;;  %v10091_v2 = vld [vmem:[#allocation29_spill] sm:$0xff] }
 0x8ee   : > { %4734 = vmatpush1.bf16.msra.mxu0 %v10081_v54  ;;  %v10092_v54 = vld [vmem:[#allocation56_spill] sm:$0xff] }
 0x8ef   : > { %4735 = vmatprep.subr.bf16.mxu0 %v10082_v14  ;;  %v10093_v14 = vld [vmem:[#allocation58_spill] sm:$0xff] }
 0x8f2   : > { %4736 = vmatpush1.bf16.msra.mxu0 %v10083_v41  ;;  %v10094_v41 = vld [vmem:[#allocation60_spill] sm:$0xff] }
 0x8f3   : > { %4737 = vmatprep.subr.bf16.mxu0 %v10084_v44  ;;  %v10095_v44 = vld [vmem:[#allocation80_spill] sm:$0xff] }
 0x8f6   : > { %4738 = vmatpush1.bf16.msra.mxu0 %v10085_v6  ;;  %v10096_v6 = vld [vmem:[#allocation82_spill] sm:$0xff] }
 0x8f7   : > { %4739 = vmatprep.subr.bf16.mxu0 %v10086_v16  ;;  %v10097_v16 = vld [vmem:[#allocation83_spill] sm:$0xff] }
 0x8fa   : > { %4740 = vmatpush2.bf16.msra.mxu0 %v10087_v19  ;;  %v10098_v19 = vld [vmem:[#allocation84_spill] sm:$0xff] }
 0x8fb   : > { %4741 = vmatprep.subr.bf16.mxu0 %v10088_v34  ;;  %v10099_v34 = vld [vmem:[#allocation85_spill] sm:$0xff] }
 0x8fe   : > { %4742 = vmatpush2.bf16.msra.mxu0 %v10089_v29  ;;  %v10100_v29 = vld [vmem:[#allocation86_spill] sm:$0xff] }
 0x8ff   : > { %4743 = vmatprep.subr.bf16.mxu0 %v10090_v50  ;;  %v10101_v50 = vld [vmem:[#allocation87_spill] sm:$0xff] }
 0x902   : > { %4744 = vmatpush2.bf16.msra.mxu0 %v10091_v2  ;;  %v10102_v2 = vld [vmem:[#allocation49_spill] sm:$0xff] }
 0x903   : > { %4745 = vmatprep.subr.bf16.mxu0 %v10092_v54 }
 0x906   : > { %4746 = vmatpush2.bf16.msra.mxu0 %v10093_v14 }
 0x907   : > { %4747 = vmatprep.subr.bf16.mxu0 %v10094_v41 }
 0x90a   : > { %4748 = vmatpush2.bf16.msra.mxu0 %v10095_v44 }
 0x90b   : > { %4749 = vmatprep.subr.bf16.mxu0 %v10096_v6 }
 0x90e   : > { %4750 = vmatpush2.bf16.msra.mxu0 %v10097_v16  ;;  %v4491_v16 = vld [vmem:[#allocation2 + $0xf8] sm:$0xff] }
 0x90f   : > { %4751 = vmatprep.subr.bf16.mxu0 %v10098_v19 }
 0x912   : > { %4752 = vmatpush2.bf16.msra.mxu0 %v10099_v34 }
 0x913   : > { %4753 = vmatprep.subr.bf16.mxu0 %v10100_v29  ;;  %v4492_v29 = vld [vmem:[#allocation2 + $0x20] sm:$0xff] }
 0x916   : > { %4754 = vmatpush2.bf16.msra.mxu0 %v10101_v50  ;;  %v4493_v50 = vld [vmem:[#allocation2 + $0x88] sm:$0xff] }
 0x917   : > { %4868 = vmatprep.subr.bf16.mxu0 %v10102_v2 }
 0x959   : > { %v4530_v54 = vpop.f32.mrf.mxu0  ;;  %v4571_v14 = vpop.f32.mrf.mxu1 }
 0x95a   : > { %v4578_v35 = vadd.f32 %v4530_v54, %v4490_v32  ;;  %v4592_v4 = vadd.f32 %v4571_v14, %v4492_v29  ;;  %v4494_v29 = vld [vmem:[#allocation2 + $0xa0] sm:$0xff] }
 0x95b   : > { %v4532_v36 = vpop.f32.mrf.mxu0  ;;  %v4573_v41 = vpop.f32.mrf.mxu1 }
 0x95c   : > { %v4579_v19 = vadd.f32 %v4532_v36, %v4491_v16  ;;  %v5860_v8 = vmul.f32 -1.442695, %v4578_v35  ;;  %v4593_v2 = vadd.f32 %v4573_v41, %v4493_v50  ;;  %v5862_v56 = vmul.f32 -1.442695, %v4592_v4 }
 0x95d   : > { %v4534_v33 = vpop.f32.mrf.mxu0  ;;  %v4575_v44 = vpop.f32.mrf.mxu1 }
 0x95e   : > { %v5861_v34 = vmul.f32 -1.442695, %v4579_v19  ;;  %6687 = vpow2.f32 %v5860_v8  ;;  %v5863_v45 = vmul.f32 -1.442695, %v4593_v2 }
 0x95f   : > { %v4535_v61 = vpop.f32.mrf.mxu0  ;;  %v4576_v6 = vpop.f32.mrf.mxu1 }
 0x960   : > { %6689 = vpow2.f32 %v5861_v34 }
 0x961   : > { %6691 = vpow2.f32 %v5862_v56 }
 0x962   : > { %6693 = vpow2.f32 %v5863_v45 }
 0x96b   : > { %v6688_v42 = vpop.eup %6687 }
 0x96c   : > { %v4586_v44 = vadd.f32 1.0, %v6688_v42  ;;  %v4495_v42 = vld [vmem:[#allocation2 + $0x170] sm:$0xff] }
 0x96d   : > { %v6690_v33 = vpop.eup %6689 }
 0x96e   : > { %v4587_v6 = vadd.f32 1.0, %v6690_v33  ;;  %6695 = vrcp.f32 %v4586_v44  ;;  %v6692_v32 = vpop.eup %6691 }
 0x96f   : > { %v6694_v16 = vpop.eup %6693  ;;  %v4600_v35 = vadd.f32 1.0, %v6692_v32 }
 0x970   : > { %6697 = vrcp.f32 %v4587_v6  ;;  %v4601_v8 = vadd.f32 1.0, %v6694_v16 }
 0x971   : > { %6699 = vrcp.f32 %v4600_v35 }
 0x972   : > { %6701 = vrcp.f32 %v4601_v8 }
 0x97b   : > { %v6696_v34 = vpop.eup %6695 }
 0x97d   : > { %v6698_v36 = vpop.eup %6697 }
 0x97e   : > { %v6700_v33 = vpop.eup %6699 }
 0x97f   : > { %v6702_v44 = vpop.eup %6701  ;;  %v4653_v6 = vsub.f32 1.0, %v6700_v33 }
 0x980   : > { %v4654_v16 = vsub.f32 1.0, %v6702_v44 }
 0x999   : > { %v4640_v19 = vpop.f32.mrf.mxu0 }
 0x99a   : > { %v4641_v61 = vadd.f32 %v4640_v19, %v10007_v28 }
 0x99b   : > { %v4642_v50 = vpop.f32.mrf.mxu0 }
 0x99c   : > { %v4647_v4 = vmul.f32 %v6696_v34, %v4641_v61  ;;  %v4643_v56 = vadd.f32 %v4642_v50, %v9967_v22  ;;  %v4657_v61 = vmul.f32 %v6700_v33, %v9140_v24  ;;  %v4658_v50 = vmul.f32 %v6702_v44, %v9142_v25  ;;  %v10120_v24 = vld [vmem:[#allocation45_spill] sm:$0xff]  ;;  %v10121_v25 = vld [vmem:[#allocation46_spill] sm:$0xff] }
 0x99d   : > { %v4644_v45 = vpop.f32.mrf.mxu0  ;;  %v10130_v33 = vld [vmem:[#allocation65_spill] sm:$0xff]  ;;  %v10131_v44 = vld [vmem:[#allocation66_spill] sm:$0xff] }
 0x99e   : > { %v4649_v14 = vadd.f32 %v4647_v4, %v4494_v29  ;;  %v4648_v41 = vmul.f32 %v6698_v36, %v4643_v56  ;;  %v10124_v36 = vld [vmem:[#allocation50_spill] sm:$0xff] }
 0x99f   : > { %v4645_v54 = vpop.f32.mrf.mxu0 }
 0x9a0   : > { %6703 = vtanh.f32 %v4649_v14  ;;  %v4650_v2 = vadd.f32 %v4648_v41, %v4495_v42  ;;  %v10125_v42 = vld [vmem:[#allocation62_spill] sm:$0xff]  ;;  %v10126_v14 = vld [vmem:[#allocation52_spill] sm:$0xff]  ;;  %v10128_v54 = vld [vmem:[#allocation63_spill] sm:$0xff] }
 0x9a1   : > { %v10127_v41 = vld [vmem:[#allocation54_spill] sm:$0xff] }
 0x9a2   : > { %6705 = vtanh.f32 %v4650_v2  ;;  %v10129_v2 = vld [vmem:[#allocation64_spill] sm:$0xff] }
 0x9ad   : > { %v6704_v32 = vpop.eup %6703 }
 0x9ae   : > { %v4655_v19 = vmul.f32 %v6704_v32, %v4653_v6  ;;  %v10132_v6 = vld [vmem:[#allocation67_spill] sm:$0xff]  ;;  %v10133_v32 = vld [vmem:[#allocation68_spill] sm:$0xff] }
 0x9af   : > { %v6706_v35 = vpop.eup %6705 }
 0x9b0   : > { %v4656_v34 = vmul.f32 %v6706_v35, %v4654_v16  ;;  %v9255_v45 = vadd.f32 %v4657_v61, %v4655_v19  ;;  %v10134_v16 = vld [vmem:[#allocation69_spill] sm:$0xff]  ;;  %v10135_v19 = vld [vmem:[#allocation70_spill] sm:$0xff]  ;;  %v10136_v35 = vld [vmem:[#allocation71_spill] sm:$0xff] }
 0x9b1   : > { %v10137_v61 = vld [vmem:[#allocation72_spill] sm:$0xff] }
 0x9b2   : > { %v9257_v8 = vadd.f32 %v4658_v50, %v4656_v34  ;;  %v9265_v56 = vpack.c.bf16 %v9255_v45, %v9255_v45  ;;  %v10138_v34 = vld [vmem:[#allocation32_spill] sm:$0xff]  ;;  %v10139_v50 = vld [vmem:[#allocation73_spill] sm:$0xff] }
 0x9b4   : > { %v4662_v29 = vpack.c.bf16 %v9257_v8, %v9257_v8  ;;  %v5890_v4 = vpack.c.bf16 %v9257_v8, %v9255_v45 }
 0x9b6   : > { %4714 = vmatprep.mubr.bf16.mxu1 %v4662_v29  ;;  %4755 = vmatprep.mubr.bf16.mxu0 %v4662_v29  ;;  %4672 = vst [vmem:[#allocation3 + $0x28] sm:$0xff] %v5890_v4  ;;  %v10141_v4 = vld [vmem:[#allocation75_spill] sm:$0xff] }
 0x9b7   : > { %4715 = vmatmul.mubr.bf16.vlgmr.msra.gmra.mxu1 %v9265_v56  ;;  %4756 = vmatmul.mubr.bf16.vlgmr.msra.gmra.mxu0 %v9265_v56 }
 0x9b8   : > { %4793 = vmatpush1.bf16.msra.mxu1 %v8890_v7  ;;  %4824 = vmatprep.mubr.bf16.mxu1 %v4662_v29  ;;  %v10140_v29 = vld [vmem:[#allocation74_spill] sm:$0xff] }
 0x9b9   : > { %4794 = vmatprep.subr.bf16.mxu1 %v8894_v1  ;;  %4869 = vmatpush1.bf16.msra.mxu0 %v8642_v13  ;;  %v10103_v13 = vld [vmem:[#allocation55_spill] sm:$0xff] }
 0x9ba   : > { %4870 = vmatprep.subr.bf16.mxu0 %v8646_v27  ;;  %v10104_v27 = vld [vmem:[#allocation33_spill] sm:$0xff] }
 0x9bc   : > { %4795 = vmatpush1.bf16.msra.mxu1 %v8900_v11 }
 0x9bd   : > { %4796 = vmatprep.subr.bf16.mxu1 %v8904_v12  ;;  %4871 = vmatpush1.bf16.msra.mxu0 %v8652_v40  ;;  %v10105_v40 = vld [vmem:[#allocation34_spill] sm:$0xff] }
 0x9be   : > { %4872 = vmatprep.subr.bf16.mxu0 %v8656_v60  ;;  %v10106_v60 = vld [vmem:[#allocation57_spill] sm:$0xff] }
 0x9c0   : > { %4797 = vmatpush1.bf16.msra.mxu1 %v8910_v62 }
 0x9c1   : > { %4798 = vmatprep.subr.bf16.mxu1 %v8914_v48  ;;  %4873 = vmatpush1.bf16.msra.mxu0 %v8662_v63  ;;  %v10107_v63 = vld [vmem:[#allocation59_spill] sm:$0xff] }
 0x9c2   : > { %4874 = vmatprep.subr.bf16.mxu0 %v8666_v39  ;;  %v10108_v39 = vld [vmem:[#allocation35_spill] sm:$0xff] }
 0x9c4   : > { %4799 = vmatpush1.bf16.msra.mxu1 %v8920_v59 }
 0x9c5   : > { %4800 = vmatprep.subr.bf16.mxu1 %v8924_v5  ;;  %4875 = vmatpush1.bf16.msra.mxu0 %v8672_v10  ;;  %v10109_v10 = vld [vmem:[#allocation36_spill] sm:$0xff] }
 0x9c6   : > { %4876 = vmatprep.subr.bf16.mxu0 %v8676_v31  ;;  %v10110_v31 = vld [vmem:[#allocation61_spill] sm:$0xff] }
 0x9c8   : > { %4801 = vmatpush1.bf16.msra.mxu1 %v8930_v15 }
 0x9c9   : > { %4802 = vmatprep.subr.bf16.mxu1 %v8934_v37  ;;  %4877 = vmatpush1.bf16.msra.mxu0 %v8682_v3  ;;  %v10111_v3 = vld [vmem:[#allocation37_spill] sm:$0xff] }
 0x9ca   : > { %4878 = vmatprep.subr.bf16.mxu0 %v8686_v0  ;;  %v10112_v0 = vld [vmem:[#allocation38_spill] sm:$0xff] }
 0x9cc   : > { %4803 = vmatpush1.bf16.msra.mxu1 %v8940_v23 }
 0x9cd   : > { %4804 = vmatprep.subr.bf16.mxu1 %v8944_v30  ;;  %4879 = vmatpush1.bf16.msra.mxu0 %v8692_v47  ;;  %v10113_v47 = vld [vmem:[#allocation39_spill] sm:$0xff] }
 0x9ce   : > { %4880 = vmatprep.subr.bf16.mxu0 %v8696_v49  ;;  %v10114_v49 = vld [vmem:[#allocation40_spill] sm:$0xff] }
 0x9d0   : > { %4805 = vmatpush1.bf16.msra.mxu1 %v8950_v43 }
 0x9d1   : > { %4806 = vmatprep.subr.bf16.mxu1 %v8954_v26  ;;  %4881 = vmatpush1.bf16.msra.mxu0 %v8702_v51  ;;  %v10115_v51 = vld [vmem:[#allocation41_spill] sm:$0xff] }
 0x9d2   : > { %4882 = vmatprep.subr.bf16.mxu0 %v8706_v52  ;;  %v10116_v52 = vld [vmem:[#allocation42_spill] sm:$0xff] }
 0x9d4   : > { %4807 = vmatpush1.bf16.msra.mxu1 %v8960_v17 }
 0x9d5   : > { %4808 = vmatprep.subr.bf16.mxu1 %v8964_v46  ;;  %4883 = vmatpush1.bf16.msra.mxu0 %v8712_v53  ;;  %v10117_v53 = vld [vmem:[#allocation43_spill] sm:$0xff] }
 0x9d6   : > { %4884 = vmatprep.subr.bf16.mxu0 %v10046_v20  ;;  %v10122_v20 = vld [vmem:[#allocation47_spill] sm:$0xff] }
 0x9d8   : > { %4809 = vmatpush2.bf16.msra.mxu1 %v8970_v21 }
 0x9d9   : > { %4810 = vmatprep.subr.bf16.mxu1 %v10047_v18  ;;  %4885 = vmatpush2.bf16.msra.mxu0 %v8722_v55  ;;  %v10118_v55 = vld [vmem:[#allocation44_spill] sm:$0xff] }
 0x9da   : > { %4886 = vmatprep.subr.bf16.mxu0 %v10048_v38  ;;  %v10123_v38 = vld [vmem:[#allocation48_spill] sm:$0xff] }
 0x9dc   : > { %4811 = vmatpush2.bf16.msra.mxu1 %v8980_v9 }
 0x9dd   : > { %4812 = vmatprep.subr.bf16.mxu1 %v10049_v58  ;;  %4887 = vmatpush2.bf16.msra.mxu0 %v8732_v57  ;;  %v10119_v57 = vld [vmem:[#allocation81_spill] sm:$0xff] }
 0x9de   : > { %4888 = vmatprep.subr.bf16.mxu0 %v10103_v13  ;;  %v10143_v13 = vld [vmem:[#allocation77_spill] sm:$0xff] }
 0x9e0   : > { %4813 = vmatpush2.bf16.msra.mxu1 %v10104_v27 }
 0x9e1   : > { %4814 = vmatprep.subr.bf16.mxu1 %v10105_v40  ;;  %4889 = vmatpush2.bf16.msra.mxu0 %v10106_v60  ;;  %v10144_v60 = vld [vmem:[#allocation78_spill] sm:$0xff] }
 0x9e2   : > { %4890 = vmatprep.subr.bf16.mxu0 %v10107_v63  ;;  %v10145_v63 = vld [vmem:[#allocation79_spill] sm:$0xff] }
 0x9e4   : > { %4815 = vmatpush2.bf16.msra.mxu1 %v10108_v39 }
 0x9e5   : > { %4816 = vmatprep.subr.bf16.mxu1 %v10109_v10  ;;  %4891 = vmatpush2.bf16.msra.mxu0 %v10110_v31  ;;  %v10146_v31 = vld [vmem:[#allocation27_spill] sm:$0xff] }
 0x9e6   : > { %4892 = vmatprep.subr.bf16.mxu0 %v10111_v3 }
 0x9e8   : > { %4817 = vmatpush2.bf16.msra.mxu1 %v10112_v0 }
 0x9e9   : > { %4818 = vmatprep.subr.bf16.mxu1 %v10113_v47  ;;  %4893 = vmatpush2.bf16.msra.mxu0 %v10114_v49 }
 0x9ea   : > { %4894 = vmatprep.subr.bf16.mxu0 %v10115_v51 }
 0x9ec   : > { %4819 = vmatpush2.bf16.msra.mxu1 %v10116_v52 }
 0x9ed   : > { %4820 = vmatprep.subr.bf16.mxu1 %v10117_v53  ;;  %4895 = vmatpush2.bf16.msra.mxu0 %v10118_v55 }
 0x9ee   : > { %4896 = vmatprep.subr.bf16.mxu0 %v10119_v57 }
 0x9f0   : > { %4821 = vmatpush2.bf16.msra.mxu1 %v10120_v24 }
 0x9f1   : > { %4822 = vmatprep.subr.bf16.mxu1 %v10121_v25  ;;  %4897 = vmatpush2.bf16.msra.mxu0 %v10122_v20 }
 0x9f2   : > { %4898 = vmatprep.subr.bf16.mxu0 %v10123_v38 }
 0x9f4   : > { %4823 = vmatpush2.bf16.msra.mxu1 %v10124_v36 }
 0x9f5   : > { %4909 = vmatprep.subr.bf16.mxu1 %v10125_v42  ;;  %4899 = vmatpush2.bf16.msra.mxu0 %v10126_v14  ;;  %v10147_v42 = vld [vmem:[#allocation28_spill] sm:$0xff] }
 0x9f6   : > { %4978 = vmatprep.subr.bf16.mxu0 %v10127_v41 }
 0x9f7   : > { %4825 = vmatmul.mubr.bf16.vlgmr.msra.gmra.mxu1 %v9265_v56  ;;  %v10142_v56 = vld [vmem:[#allocation76_spill] sm:$0xff] }
 0x9f8   : > { %4910 = vmatpush1.bf16.msra.mxu1 %v10128_v54  ;;  %v10148_v54 = vld [vmem:[#allocation29_spill] sm:$0xff] }
 0x9f9   : > { %4911 = vmatprep.subr.bf16.mxu1 %v10129_v2  ;;  %v10149_v2 = vld [vmem:[#allocation56_spill] sm:$0xff] }
 0x9fc   : > { %4912 = vmatpush1.bf16.msra.mxu1 %v10130_v33  ;;  %v10150_v33 = vld [vmem:[#allocation58_spill] sm:$0xff] }
 0x9fd   : > { %4913 = vmatprep.subr.bf16.mxu1 %v10131_v44  ;;  %v10151_v44 = vld [vmem:[#allocation60_spill] sm:$0xff] }
 0xa00   : > { %4914 = vmatpush1.bf16.msra.mxu1 %v10132_v6  ;;  %v10152_v6 = vld [vmem:[#allocation80_spill] sm:$0xff] }
 0xa01   : > { %4915 = vmatprep.subr.bf16.mxu1 %v10133_v32  ;;  %v10153_v32 = vld [vmem:[#allocation82_spill] sm:$0xff] }
 0xa04   : > { %4916 = vmatpush1.bf16.msra.mxu1 %v10134_v16  ;;  %v10154_v16 = vld [vmem:[#allocation83_spill] sm:$0xff] }
 0xa05   : > { %4917 = vmatprep.subr.bf16.mxu1 %v10135_v19  ;;  %v10155_v19 = vld [vmem:[#allocation84_spill] sm:$0xff] }
 0xa08   : > { %4918 = vmatpush1.bf16.msra.mxu1 %v10136_v35  ;;  %v10156_v35 = vld [vmem:[#allocation85_spill] sm:$0xff] }
 0xa09   : > { %4919 = vmatprep.subr.bf16.mxu1 %v10137_v61  ;;  %v10157_v61 = vld [vmem:[#allocation86_spill] sm:$0xff] }
 0xa0c   : > { %4920 = vmatpush1.bf16.msra.mxu1 %v10138_v34  ;;  %v10158_v34 = vld [vmem:[#allocation87_spill] sm:$0xff] }
 0xa0d   : > { %4921 = vmatprep.subr.bf16.mxu1 %v10139_v50  ;;  %v6863_v50 = vld [vmem:[%s7631_s22 + $0xe4] ss:$16 sps:$4 sm:$0xff]  }
 0xa10   : > { %4922 = vmatpush1.bf16.msra.mxu1 %v10140_v29 }
 0xa11   : > { %4923 = vmatprep.subr.bf16.mxu1 %v10141_v4 }
 0xa14   : > { %4924 = vmatpush1.bf16.msra.mxu1 %v10142_v56 }
 0xa15   : > { %4925 = vmatprep.subr.bf16.mxu1 %v10143_v13 }
 0xa18   : > { %4926 = vmatpush2.bf16.msra.mxu1 %v10144_v60 }
 0xa19   : > { %4927 = vmatprep.subr.bf16.mxu1 %v10145_v63 }
 0xa1c   : > { %4928 = vmatpush2.bf16.msra.mxu1 %v10146_v31 }
 0xa1d   : > { %4929 = vmatprep.subr.bf16.mxu1 %v10147_v42 }
 0xa20   : > { %4930 = vmatpush2.bf16.msra.mxu1 %v10148_v54  ;;  %v4676_v54 = vld [vmem:[#allocation2 + $0xf0] sm:$0xff] }
 0xa21   : > { %4931 = vmatprep.subr.bf16.mxu1 %v10149_v2 }
 0xa24   : > { %4932 = vmatpush2.bf16.msra.mxu1 %v10150_v33 }
 0xa25   : > { %4933 = vmatprep.subr.bf16.mxu1 %v10151_v44 }
 0xa28   : > { %4934 = vmatpush2.bf16.msra.mxu1 %v10152_v6 }
 0xa29   : > { %4935 = vmatprep.subr.bf16.mxu1 %v10153_v32 }
 0xa2c   : > { %4936 = vmatpush2.bf16.msra.mxu1 %v10154_v16  ;;  %v4677_v16 = vld [vmem:[#allocation2 + $0x140] sm:$0xff] }
 0xa2d   : > { %4937 = vmatprep.subr.bf16.mxu1 %v10155_v19 }
 0xa30   : > { %4938 = vmatpush2.bf16.msra.mxu1 %v10156_v35 }
 0xa31   : > { %4939 = vmatprep.subr.bf16.mxu1 %v10157_v61  ;;  %v4678_v61 = vld [vmem:[#allocation2 + $0x60] sm:$0xff] }
 0xa34   : > { %4940 = vmatpush2.bf16.msra.mxu1 %v10158_v34  ;;  %v4679_v34 = vld [vmem:[#allocation2 + $0xc8] sm:$0xff] }
 0xa35   : > { %5054 = vmatprep.subr.bf16.mxu1 %v6863_v50 }
 0xa77   : > { %v4716_v29 = vpop.f32.mrf.mxu1  ;;  %v4757_v4 = vpop.f32.mrf.mxu0 }
 0xa78   : > { %v4764_v32 = vadd.f32 %v4716_v29, %v4676_v54  ;;  %v4778_v44 = vadd.f32 %v4757_v4, %v4678_v61  ;;  %v4680_v61 = vld [vmem:[#allocation2 + $0x28] sm:$0xff] }
 0xa79   : > { %v4718_v56 = vpop.f32.mrf.mxu1  ;;  %v4759_v13 = vpop.f32.mrf.mxu0 }
 0xa7a   : > { %v4765_v19 = vadd.f32 %v4718_v56, %v4677_v16  ;;  %v5865_v6 = vmul.f32 -1.442695, %v4764_v32  ;;  %v4779_v50 = vadd.f32 %v4759_v13, %v4679_v34  ;;  %v5867_v33 = vmul.f32 -1.442695, %v4778_v44 }
 0xa7b   : > { %v4720_v60 = vpop.f32.mrf.mxu1  ;;  %v4761_v63 = vpop.f32.mrf.mxu0 }
 0xa7c   : > { %v5866_v35 = vmul.f32 -1.442695, %v4765_v19  ;;  %6707 = vpow2.f32 %v5865_v6  ;;  %v5868_v2 = vmul.f32 -1.442695, %v4779_v50 }
 0xa7d   : > { %v4721_v31 = vpop.f32.mrf.mxu1  ;;  %v4762_v42 = vpop.f32.mrf.mxu0 }
 0xa7e   : > { %6709 = vpow2.f32 %v5866_v35 }
 0xa7f   : > { %6711 = vpow2.f32 %v5867_v33 }
 0xa80   : > { %6713 = vpow2.f32 %v5868_v2 }
 0xa89   : > { %v6708_v41 = vpop.eup %6707 }
 0xa8a   : > { %v4772_v63 = vadd.f32 1.0, %v6708_v41  ;;  %v4681_v41 = vld [vmem:[#allocation2 + $0x38] sm:$0xff] }
 0xa8b   : > { %v6710_v60 = vpop.eup %6709 }
 0xa8c   : > { %v4773_v31 = vadd.f32 1.0, %v6710_v60  ;;  %6715 = vrcp.f32 %v4772_v63  ;;  %v6712_v29 = vpop.eup %6711 }
 0xa8d   : > { %v6714_v16 = vpop.eup %6713  ;;  %v4786_v32 = vadd.f32 1.0, %v6712_v29 }
 0xa8e   : > { %6717 = vrcp.f32 %v4773_v31  ;;  %v4787_v6 = vadd.f32 1.0, %v6714_v16 }
 0xa8f   : > { %6719 = vrcp.f32 %v4786_v32 }
 0xa90   : > { %6721 = vrcp.f32 %v4787_v6 }
 0xa99   : > { %v6716_v56 = vpop.eup %6715 }
 0xa9b   : > { %v6718_v4 = vpop.eup %6717 }
 0xa9c   : > { %v6720_v60 = vpop.eup %6719 }
 0xa9d   : > { %v6722_v63 = vpop.eup %6721  ;;  %v4839_v31 = vsub.f32 1.0, %v6720_v60 }
 0xa9e   : > { %v4840_v16 = vsub.f32 1.0, %v6722_v63 }
 0xab7   : > { %v4826_v19 = vpop.f32.mrf.mxu1 }
 0xab8   : > { %v4827_v35 = vadd.f32 %v4826_v19, %v10007_v28 }
 0xab9   : > { %v4828_v34 = vpop.f32.mrf.mxu1 }
 0xaba   : > { %v4833_v44 = vmul.f32 %v6716_v56, %v4827_v35  ;;  %v4829_v33 = vadd.f32 %v4828_v34, %v9967_v22  ;;  %v4843_v35 = vmul.f32 %v6720_v60, %v9255_v45  ;;  %v4844_v34 = vmul.f32 %v6722_v63, %v9257_v8  ;;  %v6864_v45 = vld [vmem:[%s7631_s22 + $0xe0] ss:$16 sps:$4 sm:$0xff]   ;;  %v6865_v8 = vld [vmem:[%s7631_s22 + $0xc4] ss:$16 sps:$4 sm:$0xff]   ;;  %v10161_v60 = vld [vmem:[#allocation58_spill] sm:$0xff] }
 0xabb   : > { %v4830_v2 = vpop.f32.mrf.mxu1  ;;  %v10162_v63 = vld [vmem:[#allocation60_spill] sm:$0xff] }
 0xabc   : > { %v4835_v13 = vadd.f32 %v4833_v44, %v4680_v61  ;;  %v4834_v42 = vmul.f32 %v6718_v4, %v4829_v33  ;;  %v6867_v2 = vld [vmem:[%s7631_s22 + $0xa4] ss:$16 sps:$4 sm:$0xff]  }
 0xabd   : > { %v4831_v54 = vpop.f32.mrf.mxu1 }
 0xabe   : > { %6723 = vtanh.f32 %v4835_v13  ;;  %v4836_v50 = vadd.f32 %v4834_v42, %v4681_v41  ;;  %v6866_v41 = vld [vmem:[%s7631_s22 + $0xc0] ss:$16 sps:$4 sm:$0xff]   ;;  %v6907_v42 = vld [vmem:[%s7631_s22 + $0x1ac] ss:$16 sps:$4 sm:$0xff]   ;;  %v6908_v54 = vld [vmem:[%s7631_s22 + $0x1a8] ss:$16 sps:$4 sm:$0xff]  }
 0xabf   : > { %v6886_v13 = vld [vmem:[%s7631_s22 + $0x180] ss:$16 sps:$4 sm:$0xff]  }
 0xac0   : > { %6725 = vtanh.f32 %v4836_v50  ;;  %v10160_v50 = vld [vmem:[#allocation56_spill] sm:$0xff] }
 0xacb   : > { %v6724_v29 = vpop.eup %6723 }
 0xacc   : > { %v4841_v19 = vmul.f32 %v6724_v29, %v4839_v31  ;;  %v10163_v31 = vld [vmem:[#allocation80_spill] sm:$0xff]  ;;  %v10164_v29 = vld [vmem:[#allocation82_spill] sm:$0xff] }
 0xacd   : > { %v6726_v32 = vpop.eup %6725 }
 0xace   : > { %v4842_v56 = vmul.f32 %v6726_v32, %v4840_v16  ;;  %v9370_v6 = vadd.f32 %v4843_v35, %v4841_v19  ;;  %v10165_v16 = vld [vmem:[#allocation83_spill] sm:$0xff]  ;;  %v10166_v19 = vld [vmem:[#allocation84_spill] sm:$0xff]  ;;  %v10167_v32 = vld [vmem:[#allocation85_spill] sm:$0xff] }
 0xacf   : > { %v10168_v35 = vld [vmem:[#allocation86_spill] sm:$0xff] }
 0xad0   : > { %v9372_v61 = vadd.f32 %v4844_v34, %v4842_v56  ;;  %v9380_v4 = vpack.c.bf16 %v9370_v6, %v9370_v6  ;;  %v10169_v56 = vld [vmem:[#allocation87_spill] sm:$0xff] }
 0xad2   : > { %v4848_v44 = vpack.c.bf16 %v9372_v61, %v9372_v61  ;;  %v5891_v33 = vpack.c.bf16 %v9372_v61, %v9370_v6 }
 0xad4   : > { %4900 = vmatprep.mubr.bf16.mxu0 %v4848_v44  ;;  %4941 = vmatprep.mubr.bf16.mxu1 %v4848_v44  ;;  %4858 = vst [vmem:[#allocation3 + $0x30] sm:$0xff] %v5891_v33 }
 0xad5   : > { %4901 = vmatmul.mubr.bf16.vlgmr.msra.gmra.mxu0 %v9380_v4  ;;  %4942 = vmatmul.mubr.bf16.vlgmr.msra.gmra.mxu1 %v9380_v4 }
 0xad6   : > { %4979 = vmatpush1.bf16.msra.mxu0 %v8890_v7  ;;  %5010 = vmatprep.mubr.bf16.mxu0 %v4848_v44  ;;  %v6868_v7 = vld [vmem:[%s7631_s22 + $0xa0] ss:$16 sps:$4 sm:$0xff]  }
 0xad7   : > { %4980 = vmatprep.subr.bf16.mxu0 %v8894_v1  ;;  %5055 = vmatpush1.bf16.msra.mxu1 %v6864_v45  ;;  %v6869_v1 = vld [vmem:[%s7631_s22 + $0x84] ss:$16 sps:$4 sm:$0xff]  }
 0xad8   : > { %5056 = vmatprep.subr.bf16.mxu1 %v6865_v8 }
 0xada   : > { %4981 = vmatpush1.bf16.msra.mxu0 %v8900_v11  ;;  %v6870_v11 = vld [vmem:[%s7631_s22 + $0x80] ss:$16 sps:$4 sm:$0xff]  }
 0xadb   : > { %4982 = vmatprep.subr.bf16.mxu0 %v8904_v12  ;;  %5057 = vmatpush1.bf16.msra.mxu1 %v6866_v41  ;;  %v6871_v12 = vld [vmem:[%s7631_s22 + $0x64] ss:$16 sps:$4 sm:$0xff]  }
 0xadc   : > { %5058 = vmatprep.subr.bf16.mxu1 %v6867_v2 }
 0xade   : > { %4983 = vmatpush1.bf16.msra.mxu0 %v8910_v62  ;;  %v6872_v62 = vld [vmem:[%s7631_s22 + $0x60] ss:$16 sps:$4 sm:$0xff]  }
 0xadf   : > { %4984 = vmatprep.subr.bf16.mxu0 %v8914_v48  ;;  %5059 = vmatpush1.bf16.msra.mxu1 %v6868_v7  ;;  %v6873_v48 = vld [vmem:[%s7631_s22 + $0x44] ss:$16 sps:$4 sm:$0xff]  }
 0xae0   : > { %5060 = vmatprep.subr.bf16.mxu1 %v6869_v1  ;;  %v4862_v7 = vld [vmem:[#allocation2 + $0xc0] sm:$0xff]  ;;  %v4863_v1 = vld [vmem:[#allocation2 + $0x18] sm:$0xff] }
 0xae2   : > { %4985 = vmatpush1.bf16.msra.mxu0 %v8920_v59  ;;  %v6874_v59 = vld [vmem:[%s7631_s22 + $0x40] ss:$16 sps:$4 sm:$0xff]  }
 0xae3   : > { %4986 = vmatprep.subr.bf16.mxu0 %v8924_v5  ;;  %5061 = vmatpush1.bf16.msra.mxu1 %v6870_v11  ;;  %v6875_v5 = vld [vmem:[%s7631_s22 + $0x24] ss:$16 sps:$4 sm:$0xff]  }
 0xae4   : > { %5062 = vmatprep.subr.bf16.mxu1 %v6871_v12 }
 0xae6   : > { %4987 = vmatpush1.bf16.msra.mxu0 %v8930_v15  ;;  %v6876_v15 = vld [vmem:[%s7631_s22 + $0x20] ss:$16 sps:$4 sm:$0xff]  }
 0xae7   : > { %4988 = vmatprep.subr.bf16.mxu0 %v8934_v37  ;;  %5063 = vmatpush1.bf16.msra.mxu1 %v6872_v62  ;;  %v6877_v37 = vld [vmem:[%s7631_s22 + $0x4] ss:$16 sps:$4 sm:$0xff]  }
 0xae8   : > { %5064 = vmatprep.subr.bf16.mxu1 %v6873_v48 }
 0xaea   : > { %4989 = vmatpush1.bf16.msra.mxu0 %v8940_v23  ;;  %v6878_v23 = vld [vmem:[%s7631_s22] ss:$16 sps:$4 sm:$0xff]  }
 0xaeb   : > { %4990 = vmatprep.subr.bf16.mxu0 %v8944_v30  ;;  %5065 = vmatpush1.bf16.msra.mxu1 %v6874_v59  ;;  %v6879_v30 = vld [vmem:[%s7631_s22 + $0x1e4] ss:$16 sps:$4 sm:$0xff]  }
 0xaec   : > { %5066 = vmatprep.subr.bf16.mxu1 %v6875_v5  ;;  %v4864_v59 = vld [vmem:[#allocation2 + $0x98] sm:$0xff]  ;;  %v4865_v5 = vld [vmem:[#allocation2 + $0x8] sm:$0xff] }
 0xaee   : > { %4991 = vmatpush1.bf16.msra.mxu0 %v8950_v43  ;;  %v6880_v43 = vld [vmem:[%s7631_s22 + $0x1e0] ss:$16 sps:$4 sm:$0xff]  }
 0xaef   : > { %4992 = vmatprep.subr.bf16.mxu0 %v8954_v26  ;;  %5067 = vmatpush1.bf16.msra.mxu1 %v6876_v15  ;;  %v6881_v26 = vld [vmem:[%s7631_s22 + $0x1c4] ss:$16 sps:$4 sm:$0xff]  }
 0xaf0   : > { %5068 = vmatprep.subr.bf16.mxu1 %v6877_v37 }
 0xaf2   : > { %4993 = vmatpush1.bf16.msra.mxu0 %v8960_v17  ;;  %v6882_v17 = vld [vmem:[%s7631_s22 + $0x1c0] ss:$16 sps:$4 sm:$0xff]  }
 0xaf3   : > { %4994 = vmatprep.subr.bf16.mxu0 %v8964_v46  ;;  %5069 = vmatpush1.bf16.msra.mxu1 %v6878_v23  ;;  %v6883_v46 = vld [vmem:[%s7631_s22 + $0x1a4] ss:$16 sps:$4 sm:$0xff]  }
 0xaf4   : > { %5070 = vmatprep.subr.bf16.mxu1 %v6879_v30 }
 0xaf6   : > { %4995 = vmatpush2.bf16.msra.mxu0 %v8970_v21  ;;  %v6884_v21 = vld [vmem:[%s7631_s22 + $0x1a0] ss:$16 sps:$4 sm:$0xff]  }
 0xaf7   : > { %4996 = vmatprep.subr.bf16.mxu0 %v10047_v18  ;;  %5071 = vmatpush2.bf16.msra.mxu1 %v6880_v43  ;;  %v6885_v18 = vld [vmem:[%s7631_s22 + $0x184] ss:$16 sps:$4 sm:$0xff]  }
 0xaf8   : > { %5072 = vmatprep.subr.bf16.mxu1 %v6881_v26 }
 0xafa   : > { %4997 = vmatpush2.bf16.msra.mxu0 %v8980_v9  ;;  %v6887_v9 = vld [vmem:[%s7631_s22 + $0xec] ss:$16 sps:$4 sm:$0xff]  }
 0xafb   : > { %4998 = vmatprep.subr.bf16.mxu0 %v10049_v58  ;;  %5073 = vmatpush2.bf16.msra.mxu1 %v6882_v17  ;;  %v10159_v58 = vld [vmem:[#allocation54_spill] sm:$0xff] }
 0xafc   : > { %5074 = vmatprep.subr.bf16.mxu1 %v6883_v46 }
 0xafe   : > { %4999 = vmatpush2.bf16.msra.mxu0 %v10104_v27  ;;  %v6888_v27 = vld [vmem:[%s7631_s22 + $0xe8] ss:$16 sps:$4 sm:$0xff]  }
 0xaff   : > { %5000 = vmatprep.subr.bf16.mxu0 %v10105_v40  ;;  %5075 = vmatpush2.bf16.msra.mxu1 %v6884_v21  ;;  %v6889_v40 = vld [vmem:[%s7631_s22 + $0xcc] ss:$16 sps:$4 sm:$0xff]  }
 0xb00   : > { %5076 = vmatprep.subr.bf16.mxu1 %v6885_v18 }
 0xb02   : > { %5001 = vmatpush2.bf16.msra.mxu0 %v10108_v39  ;;  %v6890_v39 = vld [vmem:[%s7631_s22 + $0xc8] ss:$16 sps:$4 sm:$0xff]  }
 0xb03   : > { %5002 = vmatprep.subr.bf16.mxu0 %v10109_v10  ;;  %5077 = vmatpush2.bf16.msra.mxu1 %v6886_v13  ;;  %v6891_v10 = vld [vmem:[%s7631_s22 + $0xac] ss:$16 sps:$4 sm:$0xff]  }
 0xb04   : > { %5078 = vmatprep.subr.bf16.mxu1 %v10111_v3  ;;  %v6892_v3 = vld [vmem:[%s7631_s22 + $0xa8] ss:$16 sps:$4 sm:$0xff]  }
 0xb06   : > { %5003 = vmatpush2.bf16.msra.mxu0 %v10112_v0  ;;  %v6893_v0 = vld [vmem:[%s7631_s22 + $0x8c] ss:$16 sps:$4 sm:$0xff]  }
 0xb07   : > { %5004 = vmatprep.subr.bf16.mxu0 %v10113_v47  ;;  %5079 = vmatpush2.bf16.msra.mxu1 %v10114_v49  ;;  %v6894_v47 = vld [vmem:[%s7631_s22 + $0x88] ss:$16 sps:$4 sm:$0xff]   ;;  %v6895_v49 = vld [vmem:[%s7631_s22 + $0x6c] ss:$16 sps:$4 sm:$0xff]  }
 0xb08   : > { %5080 = vmatprep.subr.bf16.mxu1 %v10115_v51  ;;  %v6896_v51 = vld [vmem:[%s7631_s22 + $0x68] ss:$16 sps:$4 sm:$0xff]  }
 0xb0a   : > { %5005 = vmatpush2.bf16.msra.mxu0 %v10116_v52  ;;  %v6897_v52 = vld [vmem:[%s7631_s22 + $0x4c] ss:$16 sps:$4 sm:$0xff]  }
 0xb0b   : > { %5006 = vmatprep.subr.bf16.mxu0 %v10117_v53  ;;  %5081 = vmatpush2.bf16.msra.mxu1 %v10118_v55  ;;  %v6898_v53 = vld [vmem:[%s7631_s22 + $0x48] ss:$16 sps:$4 sm:$0xff]   ;;  %v6899_v55 = vld [vmem:[%s7631_s22 + $0x2c] ss:$16 sps:$4 sm:$0xff]  }
 0xb0c   : > { %5082 = vmatprep.subr.bf16.mxu1 %v10119_v57  ;;  %v6900_v57 = vld [vmem:[%s7631_s22 + $0x28] ss:$16 sps:$4 sm:$0xff]  }
 0xb0e   : > { %5007 = vmatpush2.bf16.msra.mxu0 %v10120_v24  ;;  %v6901_v24 = vld [vmem:[%s7631_s22 + $0xc] ss:$16 sps:$4 sm:$0xff]  }
 0xb0f   : > { %5008 = vmatprep.subr.bf16.mxu0 %v10121_v25  ;;  %5083 = vmatpush2.bf16.msra.mxu1 %v10122_v20  ;;  %v6902_v25 = vld [vmem:[%s7631_s22 + $0x8] ss:$16 sps:$4 sm:$0xff]   ;;  %v6903_v20 = vld [vmem:[%s7631_s22 + $0x1ec] ss:$16 sps:$4 sm:$0xff]  }
 0xb10   : > { %5084 = vmatprep.subr.bf16.mxu1 %v10123_v38  ;;  %v6904_v38 = vld [vmem:[%s7631_s22 + $0x1e8] ss:$16 sps:$4 sm:$0xff]  }
 0xb12   : > { %5009 = vmatpush2.bf16.msra.mxu0 %v10124_v36  ;;  %v6905_v36 = vld [vmem:[%s7631_s22 + $0x1cc] ss:$16 sps:$4 sm:$0xff]  }
 0xb13   : > { %5095 = vmatprep.subr.bf16.mxu0 %v6887_v9  ;;  %5085 = vmatpush2.bf16.msra.mxu1 %v10126_v14  ;;  %v6906_v14 = vld [vmem:[%s7631_s22 + $0x1c8] ss:$16 sps:$4 sm:$0xff]  }
 0xb14   : > { %5164 = vmatprep.subr.bf16.mxu1 %v10159_v58 }
 0xb15   : > { %5011 = vmatmul.mubr.bf16.vlgmr.msra.gmra.mxu0 %v9380_v4 }
 0xb16   : > { %5096 = vmatpush1.bf16.msra.mxu0 %v6888_v27 }
 0xb17   : > { %5097 = vmatprep.subr.bf16.mxu0 %v6889_v40 }
 0xb1a   : > { %5098 = vmatpush1.bf16.msra.mxu0 %v6890_v39  ;;  %v4866_v39 = vld [vmem:[#allocation2] sm:$0xff] }
 0xb1b   : > { %5099 = vmatprep.subr.bf16.mxu0 %v6891_v10 }
 0xb1e   : > { %5100 = vmatpush1.bf16.msra.mxu0 %v6892_v3 }
 0xb1f   : > { %5101 = vmatprep.subr.bf16.mxu0 %v6893_v0 }
 0xb22   : > { %5102 = vmatpush1.bf16.msra.mxu0 %v6894_v47 }
 0xb23   : > { %5103 = vmatprep.subr.bf16.mxu0 %v6895_v49  ;;  %v4867_v49 = vld [vmem:[#allocation2 + $0x78] sm:$0xff] }
 0xb26   : > { %5104 = vmatpush1.bf16.msra.mxu0 %v6896_v51 }
 0xb27   : > { %5105 = vmatprep.subr.bf16.mxu0 %v6897_v52 }
 0xb2a   : > { %5106 = vmatpush1.bf16.msra.mxu0 %v6898_v53 }
 0xb2b   : > { %5107 = vmatprep.subr.bf16.mxu0 %v6899_v55 }
 0xb2e   : > { %5108 = vmatpush1.bf16.msra.mxu0 %v6900_v57 }
 0xb2f   : > { %5109 = vmatprep.subr.bf16.mxu0 %v6901_v24 }
 0xb32   : > { %5110 = vmatpush1.bf16.msra.mxu0 %v6902_v25 }
 0xb33   : > { %5111 = vmatprep.subr.bf16.mxu0 %v6903_v20 }
 0xb36   : > { %5112 = vmatpush2.bf16.msra.mxu0 %v6904_v38 }
 0xb37   : > { %5113 = vmatprep.subr.bf16.mxu0 %v6905_v36 }
 0xb3a   : > { %5114 = vmatpush2.bf16.msra.mxu0 %v6906_v14 }
 0xb3b   : > { %5115 = vmatprep.subr.bf16.mxu0 %v6907_v42 }
 0xb3e   : > { %5116 = vmatpush2.bf16.msra.mxu0 %v6908_v54 }
 0xb3f   : > { %5117 = vmatprep.subr.bf16.mxu0 %v10160_v50 }
 0xb42   : > { %5118 = vmatpush2.bf16.msra.mxu0 %v10161_v60 }
 0xb43   : > { %5119 = vmatprep.subr.bf16.mxu0 %v10162_v63 }
 0xb46   : > { %5120 = vmatpush2.bf16.msra.mxu0 %v10163_v31 }
 0xb47   : > { %5121 = vmatprep.subr.bf16.mxu0 %v10164_v29 }
 0xb4a   : > { %5122 = vmatpush2.bf16.msra.mxu0 %v10165_v16 }
 0xb4b   : > { %5123 = vmatprep.subr.bf16.mxu0 %v10166_v19  ;;  %v6910_v19 = vld [vmem:[%s7637_s0 + $0x64] ss:$8 sps:$4 sm:$0xff]  }
 0xb4e   : > { %5124 = vmatpush2.bf16.msra.mxu0 %v10167_v32  ;;  %v6911_v32 = vld [vmem:[%s7637_s0 + $0x60] ss:$8 sps:$4 sm:$0xff]  }
 0xb4f   : > { %5125 = vmatprep.subr.bf16.mxu0 %v10168_v35  ;;  %v6912_v35 = vld [vmem:[%s7637_s0 + $0x54] ss:$8 sps:$4 sm:$0xff]  }
 0xb52   : > { %5126 = vmatpush2.bf16.msra.mxu0 %v10169_v56  ;;  %v6913_v56 = vld [vmem:[%s7637_s0 + $0x50] ss:$8 sps:$4 sm:$0xff]  }
 0xb95   : > { %v4902_v34 = vpop.f32.mrf.mxu0  ;;  %v4943_v44 = vpop.f32.mrf.mxu1 }
 0xb96   : > { %v4950_v11 = vadd.f32 %v4902_v34, %v4862_v7  ;;  %v4964_v15 = vadd.f32 %v4943_v44, %v4864_v59  ;;  %v6914_v34 = vld [vmem:[%s7637_s0 + $0x44] ss:$8 sps:$4 sm:$0xff]   ;;  %v6915_v44 = vld [vmem:[%s7637_s0 + $0x40] ss:$8 sps:$4 sm:$0xff]   ;;  %v6928_v59 = vld [vmem:[%s7637_s0 + $0xd4] ss:$8 sps:$4 sm:$0xff]  }
 0xb97   : > { %v4904_v33 = vpop.f32.mrf.mxu0  ;;  %v4945_v4 = vpop.f32.mrf.mxu1  ;;  %v6922_v7 = vld [vmem:[%s7637_s0 + $0x4] ss:$8 sps:$4 sm:$0xff]  }
 0xb98   : > { %v4951_v12 = vadd.f32 %v4904_v33, %v4863_v1  ;;  %v5870_v62 = vmul.f32 -1.442695, %v4950_v11  ;;  %v4965_v37 = vadd.f32 %v4945_v4, %v4865_v5  ;;  %v5872_v23 = vmul.f32 -1.442695, %v4964_v15  ;;  %v6916_v33 = vld [vmem:[%s7637_s0 + $0x34] ss:$8 sps:$4 sm:$0xff]  }
 0xb99   : > { %v4906_v45 = vpop.f32.mrf.mxu0  ;;  %v4947_v8 = vpop.f32.mrf.mxu1  ;;  %v6917_v4 = vld [vmem:[%s7637_s0 + $0x30] ss:$8 sps:$4 sm:$0xff]   ;;  %v6923_v1 = vld [vmem:[%s7637_s0] ss:$8 sps:$4 sm:$0xff]   ;;  %v6924_v11 = vld [vmem:[%s7637_s0 + $0xf4] ss:$8 sps:$4 sm:$0xff]  }
 0xb9a   : > { %v5871_v48 = vmul.f32 -1.442695, %v4951_v12  ;;  %6727 = vpow2.f32 %v5870_v62  ;;  %v5873_v30 = vmul.f32 -1.442695, %v4965_v37  ;;  %v6918_v45 = vld [vmem:[%s7637_s0 + $0x24] ss:$8 sps:$4 sm:$0xff]  }
 0xb9b   : > { %v4907_v41 = vpop.f32.mrf.mxu0  ;;  %v4948_v2 = vpop.f32.mrf.mxu1  ;;  %v6919_v8 = vld [vmem:[%s7637_s0 + $0x20] ss:$8 sps:$4 sm:$0xff]   ;;  %v6925_v12 = vld [vmem:[%s7637_s0 + $0xf0] ss:$8 sps:$4 sm:$0xff]   ;;  %v6926_v62 = vld [vmem:[%s7637_s0 + $0xe4] ss:$8 sps:$4 sm:$0xff]  }
 0xb9c   : > { %6729 = vpow2.f32 %v5871_v48  ;;  %v6920_v41 = vld [vmem:[%s7637_s0 + $0x14] ss:$8 sps:$4 sm:$0xff]   ;;  %v6921_v2 = vld [vmem:[%s7637_s0 + $0x10] ss:$8 sps:$4 sm:$0xff]   ;;  %v6927_v48 = vld [vmem:[%s7637_s0 + $0xe0] ss:$8 sps:$4 sm:$0xff]  }
 0xb9d   : > { %6731 = vpow2.f32 %v5872_v23  ;;  %v6929_v5 = vld [vmem:[%s7637_s0 + $0xd0] ss:$8 sps:$4 sm:$0xff]   ;;  %v6930_v15 = vld [vmem:[%s7637_s0 + $0xc4] ss:$8 sps:$4 sm:$0xff]   ;;  %v6931_v37 = vld [vmem:[%s7637_s0 + $0xc0] ss:$8 sps:$4 sm:$0xff]  }
 0xb9e   : > { %6733 = vpow2.f32 %v5873_v30  ;;  %v6932_v23 = vld [vmem:[%s7637_s0 + $0xb4] ss:$8 sps:$4 sm:$0xff]   ;;  %v6933_v30 = vld [vmem:[%s7637_s0 + $0xb0] ss:$8 sps:$4 sm:$0xff]  }
 0xba7   : > { %v6728_v43 = vpop.eup %6727 }
 0xba8   : > { %v4958_v17 = vadd.f32 1.0, %v6728_v43  ;;  %v6934_v43 = vld [vmem:[%s7637_s0 + $0xa4] ss:$8 sps:$4 sm:$0xff]  }
 0xba9   : > { %v6730_v26 = vpop.eup %6729 }
 0xbaa   : > { %v4959_v46 = vadd.f32 1.0, %v6730_v26  ;;  %6735 = vrcp.f32 %v4958_v17  ;;  %v6732_v21 = vpop.eup %6731  ;;  %v6935_v26 = vld [vmem:[%s7637_s0 + $0xa0] ss:$8 sps:$4 sm:$0xff]   ;;  %v6936_v17 = vld [vmem:[%s7637_s0 + $0x94] ss:$8 sps:$4 sm:$0xff]  }
 0xbab   : > { %v6734_v18 = vpop.eup %6733  ;;  %v4972_v13 = vadd.f32 1.0, %v6732_v21  ;;  %v6938_v21 = vld [vmem:[%s7637_s0 + $0x84] ss:$8 sps:$4 sm:$0xff]  }
 0xbac   : > { %6737 = vrcp.f32 %v4959_v46  ;;  %v4973_v58 = vadd.f32 1.0, %v6734_v18  ;;  %v6937_v46 = vld [vmem:[%s7637_s0 + $0x90] ss:$8 sps:$4 sm:$0xff]   ;;  %v6939_v18 = vld [vmem:[%s7637_s0 + $0x80] ss:$8 sps:$4 sm:$0xff]  }
 0xbad   : > { %6739 = vrcp.f32 %v4972_v13 }
 0xbae   : > { %6741 = vrcp.f32 %v4973_v58 }
 0xbb7   : > { %v6736_v40 = vpop.eup %6735 }
 0xbb9   : > { %v6738_v47 = vpop.eup %6737 }
 0xbba   : > { %v6740_v24 = vpop.eup %6739 }
 0xbbb   : > { %v6742_v25 = vpop.eup %6741  ;;  %v5025_v20 = vsub.f32 1.0, %v6740_v24  ;;  %v5029_v54 = vmul.f32 %v6740_v24, %v9370_v6 }
 0xbbc   : > { %v5026_v36 = vsub.f32 1.0, %v6742_v25  ;;  %v5030_v60 = vmul.f32 %v6742_v25, %v9372_v61  ;;  %v6909_v61 = vld [vmem:[%s7637_s0 + $0x70] ss:$8 sps:$4 sm:$0xff]  }
 0xbd5   : > { %v5012_v9 = vpop.f32.mrf.mxu0 }
 0xbd6   : > { %v5013_v27 = vadd.f32 %v5012_v9, %v10007_v28 }
 0xbd7   : > { %v5014_v10 = vpop.f32.mrf.mxu0 }
 0xbd8   : > { %v5019_v3 = vmul.f32 %v6736_v40, %v5013_v27  ;;  %v5015_v0 = vadd.f32 %v5014_v10, %v9967_v22 }
 0xbd9   : > { %v5016_v51 = vpop.f32.mrf.mxu0 }
 0xbda   : > { %v5021_v52 = vadd.f32 %v5019_v3, %v4866_v39  ;;  %v5020_v53 = vmul.f32 %v6738_v47, %v5015_v0  ;;  %v5048_v0 = vld [vmem:[#allocation2 + $0x50] sm:$0xff]  ;;  %v5049_v47 = vld [vmem:[#allocation2 + $0x68] sm:$0xff] }
 0xbdb   : > { %v5017_v55 = vpop.f32.mrf.mxu0 }
 0xbdc   : > { %6743 = vtanh.f32 %v5021_v52  ;;  %v5022_v57 = vadd.f32 %v5020_v53, %v4867_v49  ;;  %v5050_v55 = vld [vmem:[#allocation2 + $0x70] sm:$0xff] }
 0xbde   : > { %6745 = vtanh.f32 %v5022_v57  ;;  %v5051_v57 = vld [vmem:[#allocation2 + $0x30] sm:$0xff] }
 0xbe9   : > { %v6744_v38 = vpop.eup %6743 }
 0xbea   : > { %v5027_v14 = vmul.f32 %v6744_v38, %v5025_v20 }
 0xbeb   : > { %v6746_v42 = vpop.eup %6745 }
 0xbec   : > { %v5028_v50 = vmul.f32 %v6746_v42, %v5026_v36  ;;  %v9484_v63 = vadd.f32 %v5029_v54, %v5027_v14 }
 0xbee   : > { %v9486_v31 = vadd.f32 %v5030_v60, %v5028_v50  ;;  %v9494_v6 = vpack.c.bf16 %v9484_v63, %v9484_v63 }
 0xbf0   : > { %v5034_v29 = vpack.c.bf16 %v9486_v31, %v9486_v31  ;;  %v5892_v16 = vpack.c.bf16 %v9486_v31, %v9484_v63 }
 0xbf2   : > { %5086 = vmatprep.mubr.bf16.mxu1 %v5034_v29  ;;  %5127 = vmatprep.mubr.bf16.mxu0 %v5034_v29  ;;  %5044 = vst [vmem:[#allocation3 + $0x10] sm:$0xff] %v5892_v16 }
 0xbf3   : > { %5087 = vmatmul.mubr.bf16.vlgmr.msra.gmra.mxu1 %v9494_v6  ;;  %5128 = vmatmul.mubr.bf16.vlgmr.msra.gmra.mxu0 %v9494_v6 }
 0xbf4   : > { %5165 = vmatpush1.bf16.msra.mxu1 %v6909_v61  ;;  %5196 = vmatprep.mubr.bf16.mxu1 %v5034_v29 }
 0xbf5   : > { %5166 = vmatprep.subr.bf16.mxu1 %v6910_v19 }
 0xbf8   : > { %5167 = vmatpush1.bf16.msra.mxu1 %v6911_v32  ;;  %v5052_v32 = vld [vmem:[#allocation2 + $0x158] sm:$0xff] }
 0xbf9   : > { %5168 = vmatprep.subr.bf16.mxu1 %v6912_v35 }
 0xbfc   : > { %5169 = vmatpush1.bf16.msra.mxu1 %v6913_v56 }
 0xbfd   : > { %5170 = vmatprep.subr.bf16.mxu1 %v6914_v34 }
 0xc00   : > { %5171 = vmatpush1.bf16.msra.mxu1 %v6915_v44 }
 0xc01   : > { %5172 = vmatprep.subr.bf16.mxu1 %v6916_v33  ;;  %v5053_v33 = vld [vmem:[#allocation2 + $0x150] sm:$0xff] }
 0xc04   : > { %5173 = vmatpush1.bf16.msra.mxu1 %v6917_v4 }
 0xc05   : > { %5174 = vmatprep.subr.bf16.mxu1 %v6918_v45 }
 0xc08   : > { %5175 = vmatpush1.bf16.msra.mxu1 %v6919_v8 }
 0xc09   : > { %5176 = vmatprep.subr.bf16.mxu1 %v6920_v41 }
 0xc0c   : > { %5177 = vmatpush1.bf16.msra.mxu1 %v6921_v2 }
 0xc0d   : > { %5178 = vmatprep.subr.bf16.mxu1 %v6922_v7 }
 0xc10   : > { %5179 = vmatpush1.bf16.msra.mxu1 %v6923_v1 }
 0xc11   : > { %5180 = vmatprep.subr.bf16.mxu1 %v6924_v11 }
 0xc14   : > { %5181 = vmatpush2.bf16.msra.mxu1 %v6925_v12 }
 0xc15   : > { %5182 = vmatprep.subr.bf16.mxu1 %v6926_v62 }
 0xc18   : > { %5183 = vmatpush2.bf16.msra.mxu1 %v6927_v48 }
 0xc19   : > { %5184 = vmatprep.subr.bf16.mxu1 %v6928_v59 }
 0xc1c   : > { %5185 = vmatpush2.bf16.msra.mxu1 %v6929_v5 }
 0xc1d   : > { %5186 = vmatprep.subr.bf16.mxu1 %v6930_v15 }
 0xc20   : > { %5187 = vmatpush2.bf16.msra.mxu1 %v6931_v37 }
 0xc21   : > { %5188 = vmatprep.subr.bf16.mxu1 %v6932_v23 }
 0xc24   : > { %5189 = vmatpush2.bf16.msra.mxu1 %v6933_v30 }
 0xc25   : > { %5190 = vmatprep.subr.bf16.mxu1 %v6934_v43 }
 0xc28   : > { %5191 = vmatpush2.bf16.msra.mxu1 %v6935_v26 }
 0xc29   : > { %5192 = vmatprep.subr.bf16.mxu1 %v6936_v17 }
 0xc2c   : > { %5193 = vmatpush2.bf16.msra.mxu1 %v6937_v46 }
 0xc2d   : > { %5194 = vmatprep.subr.bf16.mxu1 %v6938_v21 }
 0xc30   : > { %5195 = vmatpush2.bf16.msra.mxu1 %v6939_v18 }
 0xc33   : > { %5197 = vmatmul.mubr.bf16.vlgmr.msra.gmra.mxu1 %v9494_v6 }
 0xcb3   : > { %v5088_v13 = vpop.f32.mrf.mxu1  ;;  %v5129_v9 = vpop.f32.mrf.mxu0 }
 0xcb4   : > { %v5136_v49 = vadd.f32 %v5088_v13, %v5048_v0  ;;  %v5150_v24 = vadd.f32 %v5129_v9, %v5050_v55 }
 0xcb5   : > { %v5090_v58 = vpop.f32.mrf.mxu1  ;;  %v5131_v27 = vpop.f32.mrf.mxu0 }
 0xcb6   : > { %v5137_v51 = vadd.f32 %v5090_v58, %v5049_v47  ;;  %v5875_v52 = vmul.f32 -1.442695, %v5136_v49  ;;  %v5151_v25 = vadd.f32 %v5131_v27, %v5051_v57  ;;  %v5877_v20 = vmul.f32 -1.442695, %v5150_v24 }
 0xcb7   : > { %v5092_v40 = vpop.f32.mrf.mxu1  ;;  %v5133_v39 = vpop.f32.mrf.mxu0 }
 0xcb8   : > { %v5876_v53 = vmul.f32 -1.442695, %v5137_v51  ;;  %6747 = vpow2.f32 %v5875_v52  ;;  %v5878_v38 = vmul.f32 -1.442695, %v5151_v25 }
 0xcb9   : > { %v5093_v10 = vpop.f32.mrf.mxu1  ;;  %v5134_v3 = vpop.f32.mrf.mxu0 }
 0xcba   : > { %6749 = vpow2.f32 %v5876_v53 }
 0xcbb   : > { %6751 = vpow2.f32 %v5877_v20 }
 0xcbc   : > { %6753 = vpow2.f32 %v5878_v38 }
 0xcc5   : > { %v6748_v36 = vpop.eup %6747 }
 0xcc6   : > { %v5144_v42 = vadd.f32 1.0, %v6748_v36 }
 0xcc7   : > { %v6750_v14 = vpop.eup %6749 }
 0xcc8   : > { %v5145_v54 = vadd.f32 1.0, %v6750_v14  ;;  %6755 = vrcp.f32 %v5144_v42  ;;  %v6752_v50 = vpop.eup %6751 }
 0xcc9   : > { %v6754_v60 = vpop.eup %6753  ;;  %v5158_v29 = vadd.f32 1.0, %v6752_v50 }
 0xcca   : > { %6757 = vrcp.f32 %v5145_v54  ;;  %v5159_v6 = vadd.f32 1.0, %v6754_v60 }
 0xccb   : > { %6759 = vrcp.f32 %v5158_v29 }
 0xccc   : > { %6761 = vrcp.f32 %v5159_v6 }
 0xcd5   : > { %v6756_v19 = vpop.eup %6755 }
 0xcd7   : > { %v6758_v44 = vpop.eup %6757 }
 0xcf3   : > { %v5198_v16 = vpop.f32.mrf.mxu1 }
 0xcf4   : > { %v5199_v61 = vadd.f32 %v5198_v16, %v10007_v28  ;;  %v6760_v28 = vpop.eup %6759 }
 0xcf5   : > { %v5200_v35 = vpop.f32.mrf.mxu1  ;;  %v6762_v7 = vpop.eup %6761  ;;  %v5211_v1 = vsub.f32 1.0, %v6760_v28  ;;  %v5215_v12 = vmul.f32 %v6760_v28, %v9484_v63 }
 0xcf6   : > { %v5205_v56 = vmul.f32 %v6756_v19, %v5199_v61  ;;  %v5201_v34 = vadd.f32 %v5200_v35, %v9967_v22  ;;  %v5212_v62 = vsub.f32 1.0, %v6762_v7  ;;  %v5216_v59 = vmul.f32 %v6762_v7, %v9486_v31 }
 0xcf7   : > { %v5202_v4 = vpop.f32.mrf.mxu1 }
 0xcf8   : > { %v5207_v45 = vadd.f32 %v5205_v56, %v5052_v32  ;;  %v5206_v8 = vmul.f32 %v6758_v44, %v5201_v34 }
 0xcf9   : > { %v5203_v41 = vpop.f32.mrf.mxu1 }
 0xcfa   : > { %6763 = vtanh.f32 %v5207_v45  ;;  %v5208_v2 = vadd.f32 %v5206_v8, %v5053_v33 }
 0xcfc   : > { %6765 = vtanh.f32 %v5208_v2 }
 0xd07   : > { %v6764_v11 = vpop.eup %6763 }
 0xd08   : > { %v5213_v22 = vmul.f32 %v6764_v11, %v5211_v1 }
 0xd09   : > { %v6766_v48 = vpop.eup %6765 }
 0xd0a   : > { %v5217_v5 = vadd.f32 %v5215_v12, %v5213_v22  ;;  %v5214_v15 = vmul.f32 %v6766_v48, %v5212_v62 }
 0xd0c   : > { %5231 = vst [vmem:[%s7656_s23] sm:$0xff] %v5217_v5  ;;  %v5218_v37 = vadd.f32 %v5216_v59, %v5214_v15 }
 0xd0e   : > { %v5893_v23 = vpack.c.bf16 %v5218_v37, %v5217_v5  ;;  %5232 = vst [vmem:[%s7656_s23 + $0x8] sm:$0xff] %v5218_v37 }
 0xd10   : > { %5230 = vst [vmem:[#allocation3] sm:$0xff] %v5893_v23 }
 0xd11 PF: > { %s10170_s23 = sld [smem:[#allocation24_spill]]  ;;  %s10174_s17 = smov %s7216_s18 }
 0xd12   : > { %s10171_s24 = sld [smem:[#allocation26_spill]]  ;;  %s10175_s18 = smov %s7220_s19 }
 0xd13   : > { %s10172_s10 = sld [smem:[#allocation23_spill]]  ;;  %s10177_s20 = smov %s7228_s21 }
 0xd14   : > { %s10173_s22 = sld [smem:[#allocation25_spill]] }
 0xd17   : > { %p30_p7 = scmp.ge.s32.totalorder %s10170_s23, 6  }
 0xd18   : > { %s10176_s19 = smov %s10171_s24 }
 0xd19   : > { %s10178_s21 = smov %s10172_s10  ;;  %32 = sbr.rel (!%p30_p7) target bundleno = 20 (0x14), region = 193 }
 0xd1e   :  { %5260 = vsyncpa [#allocation5], 1 }
 0xd1f   :  { %5262 = vsyncpa [#allocation5 + $0x1], 1 }
 0xd20   :  { %5263 = vsyncpa [#allocation7], 1 }
 0xd21   :  { %5264 = vsyncpa [#allocation10], 1 }
 0xd22   :  { %5266 = vsyncpa [#allocation10 + $0x1], 1 }
 0xd23   :  { %5267 = vsyncpa [#allocation13], 1 }
 0xd24   :  { %5269 = vsyncpa [#allocation13 + $0x1], 1 }
 0xd25   :  { %5270 = vsyncpa [#allocation16], 1 }
 0xd26   :  { %5272 = vsyncpa [#allocation16 + $0x1], 1 }

</bundles_post_ra>
